<compile_context>
chip_gen: v6e
topology: v6e:2x2x1
jax: 0.10.0
libtpu: 0.0.40
codegen_flags: <defaults>
</compile_context>

<pallas_src>
import functools
import math

import jax
import jax.numpy as jnp
from jax.experimental import pallas as pl
from jax.experimental.pallas import tpu as pltpu


# ----------------------------------------------------------------------------
# Fused kernel: whole SelfAttention block for a (S, Bb, D) batch chunk.
# ----------------------------------------------------------------------------
def _fused_self_attention_kernel(
    x_ref,      # (S, Bb, D)  input block, native PyTorch (seq, batch, feat) layout
    w_ref,      # (D, 4*D)    packed weights: [Wq^T*scale | Wk^T | Wv^T | Wo^T]
    v_ref,      # (4, 3*D)    packed vectors: [b_qkv ; b_out|0 ; ln_gamma|0 ; ln_beta|0]
    o_ref,      # (S, Bb, D)  output block
    *, nhead, d_model, eps, matmul_dtype,
):
    D, H = d_model, nhead
    dh = D // H
    Bb = x_ref.shape[1]

    # ---- hoisted parameter loads (once per grid step) ------------------------
    wqkv = w_ref[:, 0:3 * D]                                              # (D, 3D)
    wo_h = [w_ref[h * dh:(h + 1) * dh, 3 * D:4 * D] for h in range(H)]    # H x (dh, D)
    bqkv = v_ref[0:1, :]                                                  # (1, 3D) f32
    bo   = v_ref[1:2, 0:D]                                                # (1, D)
    g    = v_ref[2:3, 0:D]                                                # (1, D)
    beta = v_ref[3:4, 0:D]                                                # (1, D)

    # ---- per-sequence attention + out-proj + residual + LayerNorm ------------
    for b in range(Bb):                                 # static unroll (Bb tiny)
        x = x_ref[:, b, :]                              # (S, D) f32
        xm = x.astype(matmul_dtype)

        # Fused QKV projection: ONE MXU push instead of 3*H; scale folded in.
        qkv = jnp.dot(xm, wqkv, preferred_element_type=jnp.float32) + bqkv   # (S, 3D)

        acc = x + bo                                    # residual + out-proj bias

        for h in range(H):                              # static unroll (H small)
            q = qkv[:, h * dh:(h + 1) * dh]             # (S, dh), already pre-scaled
            k = qkv[:, D + h * dh: D + (h + 1) * dh]    # (S, dh)
            v = qkv[:, 2 * D + h * dh: 2 * D + (h + 1) * dh]   # (S, dh)

            s = jax.lax.dot_general(                    # (S, S) scores, f32
                q.astype(matmul_dtype), k.astype(matmul_dtype),
                dimension_numbers=(((1,), (1,)), ((), ())),
                preferred_element_type=jnp.float32)

            m = jnp.max(s, axis=-1, keepdims=True)      # stabilized softmax (unnormalized)
            p = jnp.exp(s - m)
            r = jnp.sum(p, axis=-1, keepdims=True)

            oh = jnp.dot(p.astype(matmul_dtype), v.astype(matmul_dtype),
                         preferred_element_type=jnp.float32)    # (S, dh)
            # Deferred softmax normalization on the EUP (approximate reciprocal),
            # applied to the (S, dh) output instead of the (S, S) matrix.
            oh = oh * pl.reciprocal(r, approx=True)

            # out_proj restricted to this head's rows; summing over heads ==
            # out_proj(concat_heads(...)) -- the concat is folded away.
            acc = acc + jnp.dot(oh.astype(matmul_dtype), wo_h[h],
                                preferred_element_type=jnp.float32)   # (S, D)

        # Dropout(p=0.1) is identity in eval mode.
        # LayerNorm(out + src): biased variance, matches PyTorch.
        mean = jnp.mean(acc, axis=-1, keepdims=True)
        var = jnp.mean((acc - mean) ** 2, axis=-1, keepdims=True)
        yn = (acc - mean) * jax.lax.rsqrt(var + eps)
        o_ref[:, b, :] = (yn * g + beta).astype(o_ref.dtype)


# ----------------------------------------------------------------------------
# Wrapper
# ----------------------------------------------------------------------------
def self_attention_forward(src, packed, *, nhead, eps=1e-5,
                           matmul_dtype=jnp.float32, num_batch_blocks=1):
    """src: (S, B, D) float32 -> (S, B, D) float32 (PyTorch batch_first=False layout).

    No wrapper-side transposes/reshapes: the kernel works in (S, B, D) directly.
    num_batch_blocks: grid steps over the batch axis. 1 (default) is optimal on
    single-TensorCore chips (v5e/v6e); pass 2 on v7x so each TensorCore owns
    half the batch.
    """
    S, B, D = src.shape
    assert B % num_batch_blocks == 0
    Bb = B // num_batch_blocks

    kernel = functools.partial(
        _fused_self_attention_kernel,
        nhead=nhead, d_model=D, eps=eps, matmul_dtype=matmul_dtype)

    return pl.pallas_call(
        kernel,
        out_shape=jax.ShapeDtypeStruct((S, B, D), src.dtype),
        grid=(num_batch_blocks,),
        in_specs=[
            pl.BlockSpec((S, Bb, D), lambda i: (0, i, 0)),       # x: batch chunk
            pl.BlockSpec(packed["w"].shape, lambda i: (0, 0)),   # packed weights
            pl.BlockSpec(packed["v"].shape, lambda i: (0, 0)),   # packed bias/LN vectors
        ],
        out_specs=pl.BlockSpec((S, Bb, D), lambda i: (0, i, 0)),
        compiler_params=pltpu.CompilerParams(
            dimension_semantics=("parallel",)),
    )(src, packed["w"], packed["v"])


# ----------------------------------------------------------------------------
# Parameter construction (PyTorch layout) + one-time repack into kernel layout
# ----------------------------------------------------------------------------
def make_torch_params(key, d_model):
    def nrm(k, shape, scl=0.05):
        return scl * jax.random.normal(k, shape, dtype=jnp.float32)

    k1, k2, k3, k4 = jax.random.split(key, 4)
    return dict(
        in_proj_weight=nrm(k1, (3 * d_model, d_model)),    # PyTorch (3D, D)
        in_proj_bias=nrm(k2, (3 * d_model,)),
        out_proj_weight=nrm(k3, (d_model, d_model)),        # PyTorch (D, D)
        out_proj_bias=nrm(k4, (d_model,)),
        ln_weight=jnp.ones((d_model,), jnp.float32),
        ln_bias=jnp.zeros((d_model,), jnp.float32),
    )


def pack_params(tp, d_model, nhead, matmul_dtype=jnp.float32):
    """Repack PyTorch-layout MHA + LayerNorm params into TWO kernel tensors.

    w: (D, 4D) = [Wq^T * (1/sqrt(dh)) | Wk^T | Wv^T | Wo^T]   (matmul_dtype)
    v: (4, 3D) = [b_qkv (bq pre-scaled) ; b_out|0 ; ln_gamma|0 ; ln_beta|0]  (f32)
    """
    D = d_model
    dh = D // nhead
    scale = 1.0 / math.sqrt(dh)

    w_in, b_in = tp["in_proj_weight"], tp["in_proj_bias"]
    wq, wk, wv = w_in[:D], w_in[D:2 * D], w_in[2 * D:]
    bq, bk, bv = b_in[:D], b_in[D:2 * D], b_in[2 * D:]

    w = jnp.concatenate(
        [wq.T * scale, wk.T, wv.T, tp["out_proj_weight"].T], axis=1)   # (D, 4D)
    bqkv = jnp.concatenate([bq * scale, bk, bv])                        # (3D,)
    pad = lambda t: jnp.pad(t, (0, 2 * D))                              # (D,) -> (3D,)
    v = jnp.stack([bqkv, pad(tp["out_proj_bias"]),
                   pad(tp["ln_weight"]), pad(tp["ln_bias"])], axis=0)   # (4, 3D)
    return dict(w=w.astype(matmul_dtype), v=v.astype(jnp.float32))


# ----------------------------------------------------------------------------
# Pure-JAX reference (for correctness check only)
# ----------------------------------------------------------------------------
def self_attention_reference(src, tp, *, nhead, eps=1e-5):
    S, B, D = src.shape
    H, dh = nhead, D // nhead
    hi = jax.lax.Precision.HIGHEST

    qkv = jnp.einsum("sbd,ed->sbe", src, tp["in_proj_weight"], precision=hi) \
        + tp["in_proj_bias"]
    q, k, v = jnp.split(qkv, 3, axis=-1)

    def heads(t):
        return t.reshape(S, B, H, dh).transpose(1, 2, 0, 3)   # (B, H, S, dh)

    q, k, v = heads(q), heads(k), heads(v)
    s = jnp.einsum("bhqd,bhkd->bhqk", q, k, precision=hi) / math.sqrt(dh)
    p = jax.nn.softmax(s, axis=-1)
    o = jnp.einsum("bhqk,bhkd->bhqd", p, v, precision=hi)
    o = o.transpose(2, 0, 1, 3).reshape(S, B, D)
    o = jnp.einsum("sbd,ed->sbe", o, tp["out_proj_weight"], precision=hi) \
        + tp["out_proj_bias"]

    y = o + src
    mean = y.mean(-1, keepdims=True)
    var = ((y - mean) ** 2).mean(-1, keepdims=True)
    return (y - mean) / jnp.sqrt(var + eps) * tp["ln_weight"] + tp["ln_bias"]


# ----------------------------------------------------------------------------
if __name__ == "__main__":
    d_model, nhead = 32, 4
    S, B = 16, 4                      # (seq_len, batch): batch_first=False layout

    key = jax.random.PRNGKey(0)
    key, kx, kp = jax.random.split(key, 3)

    src = jax.random.normal(kx, (S, B, d_model), dtype=jnp.float32)
    torch_params = make_torch_params(kp, d_model)
    packed = pack_params(torch_params, d_model, nhead)

    fwd = jax.jit(functools.partial(self_attention_forward, nhead=nhead))
    out = jax.block_until_ready(fwd(src, packed))

    assert out.shape == (S, B, d_model), out.shape
    assert out.dtype == jnp.float32
    assert bool(jnp.all(jnp.isfinite(out)))

    ref = self_attention_reference(src, torch_params, nhead=nhead)
    max_err = float(jnp.max(jnp.abs(out - ref)))
    assert max_err < 1e-3, f"max abs error vs reference: {max_err}"

    print("KERNEL_OK")
</pallas_src>

<mosaic_0001>
module attributes {stable_mosaic.version = 11 : i64} {
  func.func @_fused_self_attention_kernel(%arg0: i32, %arg1: memref<16x4x32xf32, #tpu.memory_space<vmem>>, %arg2: memref<32x128xf32, #tpu.memory_space<vmem>>, %arg3: memref<4x96xf32, #tpu.memory_space<vmem>>, %arg4: memref<16x4x32xf32, #tpu.memory_space<vmem>>) attributes {dimension_semantics = [#tpu.dimension_semantics<parallel>], iteration_bounds = array<i64: 1>, scalar_prefetch = 0 : i64, scratch_operands = 0 : i64, tpu.core_type = #tpu.core_type<tc>, window_params = [{transform_indices = @transform_0, window_bounds = array<i64: 16, 4, 32>}, {pipeline_mode = #tpu.pipeline_mode<synchronous>, transform_indices = @transform_1, window_bounds = array<i64: 32, 128>}, {pipeline_mode = #tpu.pipeline_mode<synchronous>, transform_indices = @transform_2, window_bounds = array<i64: 4, 96>}, {transform_indices = @transform_3, window_bounds = array<i64: 16, 4, 32>}]} {
    %c0 = arith.constant 0 : index
    %c0_0 = arith.constant 0 : index
    %0 = vector.load %arg2[%c0, %c0_0] : memref<32x128xf32, #tpu.memory_space<vmem>>, vector<32x96xf32>
    %c0_1 = arith.constant 0 : index
    %c96 = arith.constant 96 : index
    %1 = vector.load %arg2[%c0_1, %c96] : memref<32x128xf32, #tpu.memory_space<vmem>>, vector<8x32xf32>
    %c8 = arith.constant 8 : index
    %c96_2 = arith.constant 96 : index
    %2 = vector.load %arg2[%c8, %c96_2] : memref<32x128xf32, #tpu.memory_space<vmem>>, vector<8x32xf32>
    %c16 = arith.constant 16 : index
    %c96_3 = arith.constant 96 : index
    %3 = vector.load %arg2[%c16, %c96_3] : memref<32x128xf32, #tpu.memory_space<vmem>>, vector<8x32xf32>
    %c24 = arith.constant 24 : index
    %c96_4 = arith.constant 96 : index
    %4 = vector.load %arg2[%c24, %c96_4] : memref<32x128xf32, #tpu.memory_space<vmem>>, vector<8x32xf32>
    %c0_5 = arith.constant 0 : index
    %c0_6 = arith.constant 0 : index
    %5 = vector.load %arg3[%c0_5, %c0_6] : memref<4x96xf32, #tpu.memory_space<vmem>>, vector<1x96xf32>
    %c1 = arith.constant 1 : index
    %c0_7 = arith.constant 0 : index
    %6 = vector.load %arg3[%c1, %c0_7] : memref<4x96xf32, #tpu.memory_space<vmem>>, vector<1x32xf32>
    %c2 = arith.constant 2 : index
    %c0_8 = arith.constant 0 : index
    %7 = vector.load %arg3[%c2, %c0_8] : memref<4x96xf32, #tpu.memory_space<vmem>>, vector<1x32xf32>
    %c3 = arith.constant 3 : index
    %c0_9 = arith.constant 0 : index
    %8 = vector.load %arg3[%c3, %c0_9] : memref<4x96xf32, #tpu.memory_space<vmem>>, vector<1x32xf32>
    %c0_10 = arith.constant 0 : index
    %c0_11 = arith.constant 0 : index
    %c0_12 = arith.constant 0 : index
    %9 = vector.load %arg1[%c0_10, %c0_11, %c0_12] : memref<16x4x32xf32, #tpu.memory_space<vmem>>, vector<16x1x32xf32>
    %10 = vector.shape_cast %9 : vector<16x1x32xf32> to vector<16x32xf32>
    %cst = arith.constant dense<0.000000e+00> : vector<16x96xf32>
    %11 = tpu.matmul %10, %0, %cst {dimension_numbers = #tpu.dot_dimension_numbers<[1], [0], [0], [1], [0, 0, 1, 1], [], []>} : vector<16x32xf32>, vector<32x96xf32>, vector<16x96xf32> -> vector<16x96xf32>
    %12 = vector.broadcast %5 : vector<1x96xf32> to vector<16x96xf32>
    %13 = arith.addf %11, %12 : vector<16x96xf32>
    %14 = vector.broadcast %6 : vector<1x32xf32> to vector<16x32xf32>
    %15 = arith.addf %10, %14 : vector<16x32xf32>
    %16 = vector.extract_strided_slice %13 {offsets = [0, 0], sizes = [16, 8], strides = [1, 1]} : vector<16x96xf32> to vector<16x8xf32>
    %17 = vector.extract_strided_slice %13 {offsets = [0, 32], sizes = [16, 8], strides = [1, 1]} : vector<16x96xf32> to vector<16x8xf32>
    %18 = vector.extract_strided_slice %13 {offsets = [0, 64], sizes = [16, 8], strides = [1, 1]} : vector<16x96xf32> to vector<16x8xf32>
    %cst_13 = arith.constant dense<0.000000e+00> : vector<16x16xf32>
    %19 = tpu.matmul %16, %17, %cst_13 {dimension_numbers = #tpu.dot_dimension_numbers<[1], [1], [0], [0], [0, 0, 1, 0], [], []>} : vector<16x8xf32>, vector<16x8xf32>, vector<16x16xf32> -> vector<16x16xf32>
    %cst_14 = arith.constant dense<0xFF800000> : vector<16xf32>
    %20 = vector.multi_reduction <maximumf>, %19, %cst_14 [1] : vector<16x16xf32> to vector<16xf32>
    %21 = vector.shape_cast %20 : vector<16xf32> to vector<16x1xf32>
    %22 = vector.broadcast %21 : vector<16x1xf32> to vector<16x16xf32>
    %23 = arith.subf %19, %22 : vector<16x16xf32>
    %24 = math.exp %23 : vector<16x16xf32>
    %cst_15 = arith.constant dense<0.000000e+00> : vector<16xf32>
    %25 = vector.multi_reduction <add>, %24, %cst_15 [1] : vector<16x16xf32> to vector<16xf32>
    %26 = vector.shape_cast %25 : vector<16xf32> to vector<16x1xf32>
    %cst_16 = arith.constant dense<0.000000e+00> : vector<16x8xf32>
    %27 = tpu.matmul %24, %18, %cst_16 {dimension_numbers = #tpu.dot_dimension_numbers<[1], [0], [0], [1], [0, 0, 1, 1], [], []>} : vector<16x16xf32>, vector<16x8xf32>, vector<16x8xf32> -> vector<16x8xf32>
    %28 = tpu.reciprocal %26 {approx = true} : vector<16x1xf32> -> vector<16x1xf32>
    %29 = vector.broadcast %28 : vector<16x1xf32> to vector<16x8xf32>
    %30 = arith.mulf %27, %29 : vector<16x8xf32>
    %cst_17 = arith.constant dense<0.000000e+00> : vector<16x32xf32>
    %31 = tpu.matmul %30, %1, %cst_17 {dimension_numbers = #tpu.dot_dimension_numbers<[1], [0], [0], [1], [0, 0, 1, 1], [], []>} : vector<16x8xf32>, vector<8x32xf32>, vector<16x32xf32> -> vector<16x32xf32>
    %32 = arith.addf %15, %31 : vector<16x32xf32>
    %33 = vector.extract_strided_slice %13 {offsets = [0, 8], sizes = [16, 8], strides = [1, 1]} : vector<16x96xf32> to vector<16x8xf32>
    %34 = vector.extract_strided_slice %13 {offsets = [0, 40], sizes = [16, 8], strides = [1, 1]} : vector<16x96xf32> to vector<16x8xf32>
    %35 = vector.extract_strided_slice %13 {offsets = [0, 72], sizes = [16, 8], strides = [1, 1]} : vector<16x96xf32> to vector<16x8xf32>
    %cst_18 = arith.constant dense<0.000000e+00> : vector<16x16xf32>
    %36 = tpu.matmul %33, %34, %cst_18 {dimension_numbers = #tpu.dot_dimension_numbers<[1], [1], [0], [0], [0, 0, 1, 0], [], []>} : vector<16x8xf32>, vector<16x8xf32>, vector<16x16xf32> -> vector<16x16xf32>
    %cst_19 = arith.constant dense<0xFF800000> : vector<16xf32>
    %37 = vector.multi_reduction <maximumf>, %36, %cst_19 [1] : vector<16x16xf32> to vector<16xf32>
    %38 = vector.shape_cast %37 : vector<16xf32> to vector<16x1xf32>
    %39 = vector.broadcast %38 : vector<16x1xf32> to vector<16x16xf32>
    %40 = arith.subf %36, %39 : vector<16x16xf32>
    %41 = math.exp %40 : vector<16x16xf32>
    %cst_20 = arith.constant dense<0.000000e+00> : vector<16xf32>
    %42 = vector.multi_reduction <add>, %41, %cst_20 [1] : vector<16x16xf32> to vector<16xf32>
    %43 = vector.shape_cast %42 : vector<16xf32> to vector<16x1xf32>
    %cst_21 = arith.constant dense<0.000000e+00> : vector<16x8xf32>
    %44 = tpu.matmul %41, %35, %cst_21 {dimension_numbers = #tpu.dot_dimension_numbers<[1], [0], [0], [1], [0, 0, 1, 1], [], []>} : vector<16x16xf32>, vector<16x8xf32>, vector<16x8xf32> -> vector<16x8xf32>
    %45 = tpu.reciprocal %43 {approx = true} : vector<16x1xf32> -> vector<16x1xf32>
    %46 = vector.broadcast %45 : vector<16x1xf32> to vector<16x8xf32>
    %47 = arith.mulf %44, %46 : vector<16x8xf32>
    %cst_22 = arith.constant dense<0.000000e+00> : vector<16x32xf32>
    %48 = tpu.matmul %47, %2, %cst_22 {dimension_numbers = #tpu.dot_dimension_numbers<[1], [0], [0], [1], [0, 0, 1, 1], [], []>} : vector<16x8xf32>, vector<8x32xf32>, vector<16x32xf32> -> vector<16x32xf32>
    %49 = arith.addf %32, %48 : vector<16x32xf32>
    %50 = vector.extract_strided_slice %13 {offsets = [0, 16], sizes = [16, 8], strides = [1, 1]} : vector<16x96xf32> to vector<16x8xf32>
    %51 = vector.extract_strided_slice %13 {offsets = [0, 48], sizes = [16, 8], strides = [1, 1]} : vector<16x96xf32> to vector<16x8xf32>
    %52 = vector.extract_strided_slice %13 {offsets = [0, 80], sizes = [16, 8], strides = [1, 1]} : vector<16x96xf32> to vector<16x8xf32>
    %cst_23 = arith.constant dense<0.000000e+00> : vector<16x16xf32>
    %53 = tpu.matmul %50, %51, %cst_23 {dimension_numbers = #tpu.dot_dimension_numbers<[1], [1], [0], [0], [0, 0, 1, 0], [], []>} : vector<16x8xf32>, vector<16x8xf32>, vector<16x16xf32> -> vector<16x16xf32>
    %cst_24 = arith.constant dense<0xFF800000> : vector<16xf32>
    %54 = vector.multi_reduction <maximumf>, %53, %cst_24 [1] : vector<16x16xf32> to vector<16xf32>
    %55 = vector.shape_cast %54 : vector<16xf32> to vector<16x1xf32>
    %56 = vector.broadcast %55 : vector<16x1xf32> to vector<16x16xf32>
    %57 = arith.subf %53, %56 : vector<16x16xf32>
    %58 = math.exp %57 : vector<16x16xf32>
    %cst_25 = arith.constant dense<0.000000e+00> : vector<16xf32>
    %59 = vector.multi_reduction <add>, %58, %cst_25 [1] : vector<16x16xf32> to vector<16xf32>
    %60 = vector.shape_cast %59 : vector<16xf32> to vector<16x1xf32>
    %cst_26 = arith.constant dense<0.000000e+00> : vector<16x8xf32>
    %61 = tpu.matmul %58, %52, %cst_26 {dimension_numbers = #tpu.dot_dimension_numbers<[1], [0], [0], [1], [0, 0, 1, 1], [], []>} : vector<16x16xf32>, vector<16x8xf32>, vector<16x8xf32> -> vector<16x8xf32>
    %62 = tpu.reciprocal %60 {approx = true} : vector<16x1xf32> -> vector<16x1xf32>
    %63 = vector.broadcast %62 : vector<16x1xf32> to vector<16x8xf32>
    %64 = arith.mulf %61, %63 : vector<16x8xf32>
    %cst_27 = arith.constant dense<0.000000e+00> : vector<16x32xf32>
    %65 = tpu.matmul %64, %3, %cst_27 {dimension_numbers = #tpu.dot_dimension_numbers<[1], [0], [0], [1], [0, 0, 1, 1], [], []>} : vector<16x8xf32>, vector<8x32xf32>, vector<16x32xf32> -> vector<16x32xf32>
    %66 = arith.addf %49, %65 : vector<16x32xf32>
    %67 = vector.extract_strided_slice %13 {offsets = [0, 24], sizes = [16, 8], strides = [1, 1]} : vector<16x96xf32> to vector<16x8xf32>
    %68 = vector.extract_strided_slice %13 {offsets = [0, 56], sizes = [16, 8], strides = [1, 1]} : vector<16x96xf32> to vector<16x8xf32>
    %69 = vector.extract_strided_slice %13 {offsets = [0, 88], sizes = [16, 8], strides = [1, 1]} : vector<16x96xf32> to vector<16x8xf32>
    %cst_28 = arith.constant dense<0.000000e+00> : vector<16x16xf32>
    %70 = tpu.matmul %67, %68, %cst_28 {dimension_numbers = #tpu.dot_dimension_numbers<[1], [1], [0], [0], [0, 0, 1, 0], [], []>} : vector<16x8xf32>, vector<16x8xf32>, vector<16x16xf32> -> vector<16x16xf32>
    %cst_29 = arith.constant dense<0xFF800000> : vector<16xf32>
    %71 = vector.multi_reduction <maximumf>, %70, %cst_29 [1] : vector<16x16xf32> to vector<16xf32>
    %72 = vector.shape_cast %71 : vector<16xf32> to vector<16x1xf32>
    %73 = vector.broadcast %72 : vector<16x1xf32> to vector<16x16xf32>
    %74 = arith.subf %70, %73 : vector<16x16xf32>
    %75 = math.exp %74 : vector<16x16xf32>
    %cst_30 = arith.constant dense<0.000000e+00> : vector<16xf32>
    %76 = vector.multi_reduction <add>, %75, %cst_30 [1] : vector<16x16xf32> to vector<16xf32>
    %77 = vector.shape_cast %76 : vector<16xf32> to vector<16x1xf32>
    %cst_31 = arith.constant dense<0.000000e+00> : vector<16x8xf32>
    %78 = tpu.matmul %75, %69, %cst_31 {dimension_numbers = #tpu.dot_dimension_numbers<[1], [0], [0], [1], [0, 0, 1, 1], [], []>} : vector<16x16xf32>, vector<16x8xf32>, vector<16x8xf32> -> vector<16x8xf32>
    %79 = tpu.reciprocal %77 {approx = true} : vector<16x1xf32> -> vector<16x1xf32>
    %80 = vector.broadcast %79 : vector<16x1xf32> to vector<16x8xf32>
    %81 = arith.mulf %78, %80 : vector<16x8xf32>
    %cst_32 = arith.constant dense<0.000000e+00> : vector<16x32xf32>
    %82 = tpu.matmul %81, %4, %cst_32 {dimension_numbers = #tpu.dot_dimension_numbers<[1], [0], [0], [1], [0, 0, 1, 1], [], []>} : vector<16x8xf32>, vector<8x32xf32>, vector<16x32xf32> -> vector<16x32xf32>
    %83 = arith.addf %66, %82 : vector<16x32xf32>
    %cst_33 = arith.constant dense<0.000000e+00> : vector<16xf32>
    %84 = vector.multi_reduction <add>, %83, %cst_33 [1] : vector<16x32xf32> to vector<16xf32>
    %85 = vector.shape_cast %84 : vector<16xf32> to vector<16x1xf32>
    %cst_34 = arith.constant 3.200000e+01 : f32
    %86 = vector.broadcast %cst_34 : f32 to vector<16x1xf32>
    %87 = arith.divf %85, %86 : vector<16x1xf32>
    %88 = vector.broadcast %87 : vector<16x1xf32> to vector<16x32xf32>
    %89 = arith.subf %83, %88 : vector<16x32xf32>
    %90 = arith.mulf %89, %89 : vector<16x32xf32>
    %cst_35 = arith.constant dense<0.000000e+00> : vector<16xf32>
    %91 = vector.multi_reduction <add>, %90, %cst_35 [1] : vector<16x32xf32> to vector<16xf32>
    %92 = vector.shape_cast %91 : vector<16xf32> to vector<16x1xf32>
    %cst_36 = arith.constant 3.200000e+01 : f32
    %93 = vector.broadcast %cst_36 : f32 to vector<16x1xf32>
    %94 = arith.divf %92, %93 : vector<16x1xf32>
    %95 = vector.broadcast %87 : vector<16x1xf32> to vector<16x32xf32>
    %96 = arith.subf %83, %95 : vector<16x32xf32>
    %cst_37 = arith.constant 9.99999974E-6 : f32
    %97 = vector.broadcast %cst_37 : f32 to vector<16x1xf32>
    %98 = arith.addf %94, %97 : vector<16x1xf32>
    %99 = math.rsqrt %98 : vector<16x1xf32>
    %100 = vector.broadcast %99 : vector<16x1xf32> to vector<16x32xf32>
    %101 = arith.mulf %96, %100 : vector<16x32xf32>
    %102 = vector.broadcast %7 : vector<1x32xf32> to vector<16x32xf32>
    %103 = arith.mulf %101, %102 : vector<16x32xf32>
    %104 = vector.broadcast %8 : vector<1x32xf32> to vector<16x32xf32>
    %105 = arith.addf %103, %104 : vector<16x32xf32>
    %c0_38 = arith.constant 0 : index
    %c0_39 = arith.constant 0 : index
    %c0_40 = arith.constant 0 : index
    %106 = vector.load %arg4[%c0_38, %c0_39, %c0_40] : memref<16x4x32xf32, #tpu.memory_space<vmem>>, vector<16x1x32xf32>
    %107 = vector.shape_cast %106 : vector<16x1x32xf32> to vector<16x32xf32>
    %108 = vector.shape_cast %105 : vector<16x32xf32> to vector<16x1x32xf32>
    tpu.vector_store %arg4[%c0_38, %c0_39, %c0_40], %108 {strides = array<i32>} : memref<16x4x32xf32, #tpu.memory_space<vmem>>, vector<16x1x32xf32>,
    %c0_41 = arith.constant 0 : index
    %c1_42 = arith.constant 1 : index
    %c0_43 = arith.constant 0 : index
    %109 = vector.load %arg1[%c0_41, %c1_42, %c0_43] : memref<16x4x32xf32, #tpu.memory_space<vmem>>, vector<16x1x32xf32>
    %110 = vector.shape_cast %109 : vector<16x1x32xf32> to vector<16x32xf32>
    %cst_44 = arith.constant dense<0.000000e+00> : vector<16x96xf32>
    %111 = tpu.matmul %110, %0, %cst_44 {dimension_numbers = #tpu.dot_dimension_numbers<[1], [0], [0], [1], [0, 0, 1, 1], [], []>} : vector<16x32xf32>, vector<32x96xf32>, vector<16x96xf32> -> vector<16x96xf32>
    %112 = vector.broadcast %5 : vector<1x96xf32> to vector<16x96xf32>
    %113 = arith.addf %111, %112 : vector<16x96xf32>
    %114 = vector.broadcast %6 : vector<1x32xf32> to vector<16x32xf32>
    %115 = arith.addf %110, %114 : vector<16x32xf32>
    %116 = vector.extract_strided_slice %113 {offsets = [0, 0], sizes = [16, 8], strides = [1, 1]} : vector<16x96xf32> to vector<16x8xf32>
    %117 = vector.extract_strided_slice %113 {offsets = [0, 32], sizes = [16, 8], strides = [1, 1]} : vector<16x96xf32> to vector<16x8xf32>
    %118 = vector.extract_strided_slice %113 {offsets = [0, 64], sizes = [16, 8], strides = [1, 1]} : vector<16x96xf32> to vector<16x8xf32>
    %cst_45 = arith.constant dense<0.000000e+00> : vector<16x16xf32>
    %119 = tpu.matmul %116, %117, %cst_45 {dimension_numbers = #tpu.dot_dimension_numbers<[1], [1], [0], [0], [0, 0, 1, 0], [], []>} : vector<16x8xf32>, vector<16x8xf32>, vector<16x16xf32> -> vector<16x16xf32>
    %cst_46 = arith.constant dense<0xFF800000> : vector<16xf32>
    %120 = vector.multi_reduction <maximumf>, %119, %cst_46 [1] : vector<16x16xf32> to vector<16xf32>
    %121 = vector.shape_cast %120 : vector<16xf32> to vector<16x1xf32>
    %122 = vector.broadcast %121 : vector<16x1xf32> to vector<16x16xf32>
    %123 = arith.subf %119, %122 : vector<16x16xf32>
    %124 = math.exp %123 : vector<16x16xf32>
    %cst_47 = arith.constant dense<0.000000e+00> : vector<16xf32>
    %125 = vector.multi_reduction <add>, %124, %cst_47 [1] : vector<16x16xf32> to vector<16xf32>
    %126 = vector.shape_cast %125 : vector<16xf32> to vector<16x1xf32>
    %cst_48 = arith.constant dense<0.000000e+00> : vector<16x8xf32>
    %127 = tpu.matmul %124, %118, %cst_48 {dimension_numbers = #tpu.dot_dimension_numbers<[1], [0], [0], [1], [0, 0, 1, 1], [], []>} : vector<16x16xf32>, vector<16x8xf32>, vector<16x8xf32> -> vector<16x8xf32>
    %128 = tpu.reciprocal %126 {approx = true} : vector<16x1xf32> -> vector<16x1xf32>
    %129 = vector.broadcast %128 : vector<16x1xf32> to vector<16x8xf32>
    %130 = arith.mulf %127, %129 : vector<16x8xf32>
    %cst_49 = arith.constant dense<0.000000e+00> : vector<16x32xf32>
    %131 = tpu.matmul %130, %1, %cst_49 {dimension_numbers = #tpu.dot_dimension_numbers<[1], [0], [0], [1], [0, 0, 1, 1], [], []>} : vector<16x8xf32>, vector<8x32xf32>, vector<16x32xf32> -> vector<16x32xf32>
    %132 = arith.addf %115, %131 : vector<16x32xf32>
    %133 = vector.extract_strided_slice %113 {offsets = [0, 8], sizes = [16, 8], strides = [1, 1]} : vector<16x96xf32> to vector<16x8xf32>
    %134 = vector.extract_strided_slice %113 {offsets = [0, 40], sizes = [16, 8], strides = [1, 1]} : vector<16x96xf32> to vector<16x8xf32>
    %135 = vector.extract_strided_slice %113 {offsets = [0, 72], sizes = [16, 8], strides = [1, 1]} : vector<16x96xf32> to vector<16x8xf32>
    %cst_50 = arith.constant dense<0.000000e+00> : vector<16x16xf32>
    %136 = tpu.matmul %133, %134, %cst_50 {dimension_numbers = #tpu.dot_dimension_numbers<[1], [1], [0], [0], [0, 0, 1, 0], [], []>} : vector<16x8xf32>, vector<16x8xf32>, vector<16x16xf32> -> vector<16x16xf32>
    %cst_51 = arith.constant dense<0xFF800000> : vector<16xf32>
    %137 = vector.multi_reduction <maximumf>, %136, %cst_51 [1] : vector<16x16xf32> to vector<16xf32>
    %138 = vector.shape_cast %137 : vector<16xf32> to vector<16x1xf32>
    %139 = vector.broadcast %138 : vector<16x1xf32> to vector<16x16xf32>
    %140 = arith.subf %136, %139 : vector<16x16xf32>
    %141 = math.exp %140 : vector<16x16xf32>
    %cst_52 = arith.constant dense<0.000000e+00> : vector<16xf32>
    %142 = vector.multi_reduction <add>, %141, %cst_52 [1] : vector<16x16xf32> to vector<16xf32>
    %143 = vector.shape_cast %142 : vector<16xf32> to vector<16x1xf32>
    %cst_53 = arith.constant dense<0.000000e+00> : vector<16x8xf32>
    %144 = tpu.matmul %141, %135, %cst_53 {dimension_numbers = #tpu.dot_dimension_numbers<[1], [0], [0], [1], [0, 0, 1, 1], [], []>} : vector<16x16xf32>, vector<16x8xf32>, vector<16x8xf32> -> vector<16x8xf32>
    %145 = tpu.reciprocal %143 {approx = true} : vector<16x1xf32> -> vector<16x1xf32>
    %146 = vector.broadcast %145 : vector<16x1xf32> to vector<16x8xf32>
    %147 = arith.mulf %144, %146 : vector<16x8xf32>
    %cst_54 = arith.constant dense<0.000000e+00> : vector<16x32xf32>
    %148 = tpu.matmul %147, %2, %cst_54 {dimension_numbers = #tpu.dot_dimension_numbers<[1], [0], [0], [1], [0, 0, 1, 1], [], []>} : vector<16x8xf32>, vector<8x32xf32>, vector<16x32xf32> -> vector<16x32xf32>
    %149 = arith.addf %132, %148 : vector<16x32xf32>
    %150 = vector.extract_strided_slice %113 {offsets = [0, 16], sizes = [16, 8], strides = [1, 1]} : vector<16x96xf32> to vector<16x8xf32>
    %151 = vector.extract_strided_slice %113 {offsets = [0, 48], sizes = [16, 8], strides = [1, 1]} : vector<16x96xf32> to vector<16x8xf32>
    %152 = vector.extract_strided_slice %113 {offsets = [0, 80], sizes = [16, 8], strides = [1, 1]} : vector<16x96xf32> to vector<16x8xf32>
    %cst_55 = arith.constant dense<0.000000e+00> : vector<16x16xf32>
    %153 = tpu.matmul %150, %151, %cst_55 {dimension_numbers = #tpu.dot_dimension_numbers<[1], [1], [0], [0], [0, 0, 1, 0], [], []>} : vector<16x8xf32>, vector<16x8xf32>, vector<16x16xf32> -> vector<16x16xf32>
    %cst_56 = arith.constant dense<0xFF800000> : vector<16xf32>
    %154 = vector.multi_reduction <maximumf>, %153, %cst_56 [1] : vector<16x16xf32> to vector<16xf32>
    %155 = vector.shape_cast %154 : vector<16xf32> to vector<16x1xf32>
    %156 = vector.broadcast %155 : vector<16x1xf32> to vector<16x16xf32>
    %157 = arith.subf %153, %156 : vector<16x16xf32>
    %158 = math.exp %157 : vector<16x16xf32>
    %cst_57 = arith.constant dense<0.000000e+00> : vector<16xf32>
    %159 = vector.multi_reduction <add>, %158, %cst_57 [1] : vector<16x16xf32> to vector<16xf32>
    %160 = vector.shape_cast %159 : vector<16xf32> to vector<16x1xf32>
    %cst_58 = arith.constant dense<0.000000e+00> : vector<16x8xf32>
    %161 = tpu.matmul %158, %152, %cst_58 {dimension_numbers = #tpu.dot_dimension_numbers<[1], [0], [0], [1], [0, 0, 1, 1], [], []>} : vector<16x16xf32>, vector<16x8xf32>, vector<16x8xf32> -> vector<16x8xf32>
    %162 = tpu.reciprocal %160 {approx = true} : vector<16x1xf32> -> vector<16x1xf32>
    %163 = vector.broadcast %162 : vector<16x1xf32> to vector<16x8xf32>
    %164 = arith.mulf %161, %163 : vector<16x8xf32>
    %cst_59 = arith.constant dense<0.000000e+00> : vector<16x32xf32>
    %165 = tpu.matmul %164, %3, %cst_59 {dimension_numbers = #tpu.dot_dimension_numbers<[1], [0], [0], [1], [0, 0, 1, 1], [], []>} : vector<16x8xf32>, vector<8x32xf32>, vector<16x32xf32> -> vector<16x32xf32>
    %166 = arith.addf %149, %165 : vector<16x32xf32>
    %167 = vector.extract_strided_slice %113 {offsets = [0, 24], sizes = [16, 8], strides = [1, 1]} : vector<16x96xf32> to vector<16x8xf32>
    %168 = vector.extract_strided_slice %113 {offsets = [0, 56], sizes = [16, 8], strides = [1, 1]} : vector<16x96xf32> to vector<16x8xf32>
    %169 = vector.extract_strided_slice %113 {offsets = [0, 88], sizes = [16, 8], strides = [1, 1]} : vector<16x96xf32> to vector<16x8xf32>
    %cst_60 = arith.constant dense<0.000000e+00> : vector<16x16xf32>
    %170 = tpu.matmul %167, %168, %cst_60 {dimension_numbers = #tpu.dot_dimension_numbers<[1], [1], [0], [0], [0, 0, 1, 0], [], []>} : vector<16x8xf32>, vector<16x8xf32>, vector<16x16xf32> -> vector<16x16xf32>
    %cst_61 = arith.constant dense<0xFF800000> : vector<16xf32>
    %171 = vector.multi_reduction <maximumf>, %170, %cst_61 [1] : vector<16x16xf32> to vector<16xf32>
    %172 = vector.shape_cast %171 : vector<16xf32> to vector<16x1xf32>
    %173 = vector.broadcast %172 : vector<16x1xf32> to vector<16x16xf32>
    %174 = arith.subf %170, %173 : vector<16x16xf32>
    %175 = math.exp %174 : vector<16x16xf32>
    %cst_62 = arith.constant dense<0.000000e+00> : vector<16xf32>
    %176 = vector.multi_reduction <add>, %175, %cst_62 [1] : vector<16x16xf32> to vector<16xf32>
    %177 = vector.shape_cast %176 : vector<16xf32> to vector<16x1xf32>
    %cst_63 = arith.constant dense<0.000000e+00> : vector<16x8xf32>
    %178 = tpu.matmul %175, %169, %cst_63 {dimension_numbers = #tpu.dot_dimension_numbers<[1], [0], [0], [1], [0, 0, 1, 1], [], []>} : vector<16x16xf32>, vector<16x8xf32>, vector<16x8xf32> -> vector<16x8xf32>
    %179 = tpu.reciprocal %177 {approx = true} : vector<16x1xf32> -> vector<16x1xf32>
    %180 = vector.broadcast %179 : vector<16x1xf32> to vector<16x8xf32>
    %181 = arith.mulf %178, %180 : vector<16x8xf32>
    %cst_64 = arith.constant dense<0.000000e+00> : vector<16x32xf32>
    %182 = tpu.matmul %181, %4, %cst_64 {dimension_numbers = #tpu.dot_dimension_numbers<[1], [0], [0], [1], [0, 0, 1, 1], [], []>} : vector<16x8xf32>, vector<8x32xf32>, vector<16x32xf32> -> vector<16x32xf32>
    %183 = arith.addf %166, %182 : vector<16x32xf32>
    %cst_65 = arith.constant dense<0.000000e+00> : vector<16xf32>
    %184 = vector.multi_reduction <add>, %183, %cst_65 [1] : vector<16x32xf32> to vector<16xf32>
    %185 = vector.shape_cast %184 : vector<16xf32> to vector<16x1xf32>
    %cst_66 = arith.constant 3.200000e+01 : f32
    %186 = vector.broadcast %cst_66 : f32 to vector<16x1xf32>
    %187 = arith.divf %185, %186 : vector<16x1xf32>
    %188 = vector.broadcast %187 : vector<16x1xf32> to vector<16x32xf32>
    %189 = arith.subf %183, %188 : vector<16x32xf32>
    %190 = arith.mulf %189, %189 : vector<16x32xf32>
    %cst_67 = arith.constant dense<0.000000e+00> : vector<16xf32>
    %191 = vector.multi_reduction <add>, %190, %cst_67 [1] : vector<16x32xf32> to vector<16xf32>
    %192 = vector.shape_cast %191 : vector<16xf32> to vector<16x1xf32>
    %cst_68 = arith.constant 3.200000e+01 : f32
    %193 = vector.broadcast %cst_68 : f32 to vector<16x1xf32>
    %194 = arith.divf %192, %193 : vector<16x1xf32>
    %195 = vector.broadcast %187 : vector<16x1xf32> to vector<16x32xf32>
    %196 = arith.subf %183, %195 : vector<16x32xf32>
    %cst_69 = arith.constant 9.99999974E-6 : f32
    %197 = vector.broadcast %cst_69 : f32 to vector<16x1xf32>
    %198 = arith.addf %194, %197 : vector<16x1xf32>
    %199 = math.rsqrt %198 : vector<16x1xf32>
    %200 = vector.broadcast %199 : vector<16x1xf32> to vector<16x32xf32>
    %201 = arith.mulf %196, %200 : vector<16x32xf32>
    %202 = vector.broadcast %7 : vector<1x32xf32> to vector<16x32xf32>
    %203 = arith.mulf %201, %202 : vector<16x32xf32>
    %204 = vector.broadcast %8 : vector<1x32xf32> to vector<16x32xf32>
    %205 = arith.addf %203, %204 : vector<16x32xf32>
    %c0_70 = arith.constant 0 : index
    %c1_71 = arith.constant 1 : index
    %c0_72 = arith.constant 0 : index
    %206 = vector.load %arg4[%c0_70, %c1_71, %c0_72] : memref<16x4x32xf32, #tpu.memory_space<vmem>>, vector<16x1x32xf32>
    %207 = vector.shape_cast %206 : vector<16x1x32xf32> to vector<16x32xf32>
    %208 = vector.shape_cast %205 : vector<16x32xf32> to vector<16x1x32xf32>
    tpu.vector_store %arg4[%c0_70, %c1_71, %c0_72], %208 {strides = array<i32>} : memref<16x4x32xf32, #tpu.memory_space<vmem>>, vector<16x1x32xf32>,
    %c0_73 = arith.constant 0 : index
    %c2_74 = arith.constant 2 : index
    %c0_75 = arith.constant 0 : index
    %209 = vector.load %arg1[%c0_73, %c2_74, %c0_75] : memref<16x4x32xf32, #tpu.memory_space<vmem>>, vector<16x1x32xf32>
    %210 = vector.shape_cast %209 : vector<16x1x32xf32> to vector<16x32xf32>
    %cst_76 = arith.constant dense<0.000000e+00> : vector<16x96xf32>
    %211 = tpu.matmul %210, %0, %cst_76 {dimension_numbers = #tpu.dot_dimension_numbers<[1], [0], [0], [1], [0, 0, 1, 1], [], []>} : vector<16x32xf32>, vector<32x96xf32>, vector<16x96xf32> -> vector<16x96xf32>
    %212 = vector.broadcast %5 : vector<1x96xf32> to vector<16x96xf32>
    %213 = arith.addf %211, %212 : vector<16x96xf32>
    %214 = vector.broadcast %6 : vector<1x32xf32> to vector<16x32xf32>
    %215 = arith.addf %210, %214 : vector<16x32xf32>
    %216 = vector.extract_strided_slice %213 {offsets = [0, 0], sizes = [16, 8], strides = [1, 1]} : vector<16x96xf32> to vector<16x8xf32>
    %217 = vector.extract_strided_slice %213 {offsets = [0, 32], sizes = [16, 8], strides = [1, 1]} : vector<16x96xf32> to vector<16x8xf32>
    %218 = vector.extract_strided_slice %213 {offsets = [0, 64], sizes = [16, 8], strides = [1, 1]} : vector<16x96xf32> to vector<16x8xf32>
    %cst_77 = arith.constant dense<0.000000e+00> : vector<16x16xf32>
    %219 = tpu.matmul %216, %217, %cst_77 {dimension_numbers = #tpu.dot_dimension_numbers<[1], [1], [0], [0], [0, 0, 1, 0], [], []>} : vector<16x8xf32>, vector<16x8xf32>, vector<16x16xf32> -> vector<16x16xf32>
    %cst_78 = arith.constant dense<0xFF800000> : vector<16xf32>
    %220 = vector.multi_reduction <maximumf>, %219, %cst_78 [1] : vector<16x16xf32> to vector<16xf32>
    %221 = vector.shape_cast %220 : vector<16xf32> to vector<16x1xf32>
    %222 = vector.broadcast %221 : vector<16x1xf32> to vector<16x16xf32>
    %223 = arith.subf %219, %222 : vector<16x16xf32>
    %224 = math.exp %223 : vector<16x16xf32>
    %cst_79 = arith.constant dense<0.000000e+00> : vector<16xf32>
    %225 = vector.multi_reduction <add>, %224, %cst_79 [1] : vector<16x16xf32> to vector<16xf32>
    %226 = vector.shape_cast %225 : vector<16xf32> to vector<16x1xf32>
    %cst_80 = arith.constant dense<0.000000e+00> : vector<16x8xf32>
    %227 = tpu.matmul %224, %218, %cst_80 {dimension_numbers = #tpu.dot_dimension_numbers<[1], [0], [0], [1], [0, 0, 1, 1], [], []>} : vector<16x16xf32>, vector<16x8xf32>, vector<16x8xf32> -> vector<16x8xf32>
    %228 = tpu.reciprocal %226 {approx = true} : vector<16x1xf32> -> vector<16x1xf32>
    %229 = vector.broadcast %228 : vector<16x1xf32> to vector<16x8xf32>
    %230 = arith.mulf %227, %229 : vector<16x8xf32>
    %cst_81 = arith.constant dense<0.000000e+00> : vector<16x32xf32>
    %231 = tpu.matmul %230, %1, %cst_81 {dimension_numbers = #tpu.dot_dimension_numbers<[1], [0], [0], [1], [0, 0, 1, 1], [], []>} : vector<16x8xf32>, vector<8x32xf32>, vector<16x32xf32> -> vector<16x32xf32>
    %232 = arith.addf %215, %231 : vector<16x32xf32>
    %233 = vector.extract_strided_slice %213 {offsets = [0, 8], sizes = [16, 8], strides = [1, 1]} : vector<16x96xf32> to vector<16x8xf32>
    %234 = vector.extract_strided_slice %213 {offsets = [0, 40], sizes = [16, 8], strides = [1, 1]} : vector<16x96xf32> to vector<16x8xf32>
    %235 = vector.extract_strided_slice %213 {offsets = [0, 72], sizes = [16, 8], strides = [1, 1]} : vector<16x96xf32> to vector<16x8xf32>
    %cst_82 = arith.constant dense<0.000000e+00> : vector<16x16xf32>
    %236 = tpu.matmul %233, %234, %cst_82 {dimension_numbers = #tpu.dot_dimension_numbers<[1], [1], [0], [0], [0, 0, 1, 0], [], []>} : vector<16x8xf32>, vector<16x8xf32>, vector<16x16xf32> -> vector<16x16xf32>
    %cst_83 = arith.constant dense<0xFF800000> : vector<16xf32>
    %237 = vector.multi_reduction <maximumf>, %236, %cst_83 [1] : vector<16x16xf32> to vector<16xf32>
    %238 = vector.shape_cast %237 : vector<16xf32> to vector<16x1xf32>
    %239 = vector.broadcast %238 : vector<16x1xf32> to vector<16x16xf32>
    %240 = arith.subf %236, %239 : vector<16x16xf32>
    %241 = math.exp %240 : vector<16x16xf32>
    %cst_84 = arith.constant dense<0.000000e+00> : vector<16xf32>
    %242 = vector.multi_reduction <add>, %241, %cst_84 [1] : vector<16x16xf32> to vector<16xf32>
    %243 = vector.shape_cast %242 : vector<16xf32> to vector<16x1xf32>
    %cst_85 = arith.constant dense<0.000000e+00> : vector<16x8xf32>
    %244 = tpu.matmul %241, %235, %cst_85 {dimension_numbers = #tpu.dot_dimension_numbers<[1], [0], [0], [1], [0, 0, 1, 1], [], []>} : vector<16x16xf32>, vector<16x8xf32>, vector<16x8xf32> -> vector<16x8xf32>
    %245 = tpu.reciprocal %243 {approx = true} : vector<16x1xf32> -> vector<16x1xf32>
    %246 = vector.broadcast %245 : vector<16x1xf32> to vector<16x8xf32>
    %247 = arith.mulf %244, %246 : vector<16x8xf32>
    %cst_86 = arith.constant dense<0.000000e+00> : vector<16x32xf32>
    %248 = tpu.matmul %247, %2, %cst_86 {dimension_numbers = #tpu.dot_dimension_numbers<[1], [0], [0], [1], [0, 0, 1, 1], [], []>} : vector<16x8xf32>, vector<8x32xf32>, vector<16x32xf32> -> vector<16x32xf32>
    %249 = arith.addf %232, %248 : vector<16x32xf32>
    %250 = vector.extract_strided_slice %213 {offsets = [0, 16], sizes = [16, 8], strides = [1, 1]} : vector<16x96xf32> to vector<16x8xf32>
    %251 = vector.extract_strided_slice %213 {offsets = [0, 48], sizes = [16, 8], strides = [1, 1]} : vector<16x96xf32> to vector<16x8xf32>
    %252 = vector.extract_strided_slice %213 {offsets = [0, 80], sizes = [16, 8], strides = [1, 1]} : vector<16x96xf32> to vector<16x8xf32>
    %cst_87 = arith.constant dense<0.000000e+00> : vector<16x16xf32>
    %253 = tpu.matmul %250, %251, %cst_87 {dimension_numbers = #tpu.dot_dimension_numbers<[1], [1], [0], [0], [0, 0, 1, 0], [], []>} : vector<16x8xf32>, vector<16x8xf32>, vector<16x16xf32> -> vector<16x16xf32>
    %cst_88 = arith.constant dense<0xFF800000> : vector<16xf32>
    %254 = vector.multi_reduction <maximumf>, %253, %cst_88 [1] : vector<16x16xf32> to vector<16xf32>
    %255 = vector.shape_cast %254 : vector<16xf32> to vector<16x1xf32>
    %256 = vector.broadcast %255 : vector<16x1xf32> to vector<16x16xf32>
    %257 = arith.subf %253, %256 : vector<16x16xf32>
    %258 = math.exp %257 : vector<16x16xf32>
    %cst_89 = arith.constant dense<0.000000e+00> : vector<16xf32>
    %259 = vector.multi_reduction <add>, %258, %cst_89 [1] : vector<16x16xf32> to vector<16xf32>
    %260 = vector.shape_cast %259 : vector<16xf32> to vector<16x1xf32>
    %cst_90 = arith.constant dense<0.000000e+00> : vector<16x8xf32>
    %261 = tpu.matmul %258, %252, %cst_90 {dimension_numbers = #tpu.dot_dimension_numbers<[1], [0], [0], [1], [0, 0, 1, 1], [], []>} : vector<16x16xf32>, vector<16x8xf32>, vector<16x8xf32> -> vector<16x8xf32>
    %262 = tpu.reciprocal %260 {approx = true} : vector<16x1xf32> -> vector<16x1xf32>
    %263 = vector.broadcast %262 : vector<16x1xf32> to vector<16x8xf32>
    %264 = arith.mulf %261, %263 : vector<16x8xf32>
    %cst_91 = arith.constant dense<0.000000e+00> : vector<16x32xf32>
    %265 = tpu.matmul %264, %3, %cst_91 {dimension_numbers = #tpu.dot_dimension_numbers<[1], [0], [0], [1], [0, 0, 1, 1], [], []>} : vector<16x8xf32>, vector<8x32xf32>, vector<16x32xf32> -> vector<16x32xf32>
    %266 = arith.addf %249, %265 : vector<16x32xf32>
    %267 = vector.extract_strided_slice %213 {offsets = [0, 24], sizes = [16, 8], strides = [1, 1]} : vector<16x96xf32> to vector<16x8xf32>
    %268 = vector.extract_strided_slice %213 {offsets = [0, 56], sizes = [16, 8], strides = [1, 1]} : vector<16x96xf32> to vector<16x8xf32>
    %269 = vector.extract_strided_slice %213 {offsets = [0, 88], sizes = [16, 8], strides = [1, 1]} : vector<16x96xf32> to vector<16x8xf32>
    %cst_92 = arith.constant dense<0.000000e+00> : vector<16x16xf32>
    %270 = tpu.matmul %267, %268, %cst_92 {dimension_numbers = #tpu.dot_dimension_numbers<[1], [1], [0], [0], [0, 0, 1, 0], [], []>} : vector<16x8xf32>, vector<16x8xf32>, vector<16x16xf32> -> vector<16x16xf32>
    %cst_93 = arith.constant dense<0xFF800000> : vector<16xf32>
    %271 = vector.multi_reduction <maximumf>, %270, %cst_93 [1] : vector<16x16xf32> to vector<16xf32>
    %272 = vector.shape_cast %271 : vector<16xf32> to vector<16x1xf32>
    %273 = vector.broadcast %272 : vector<16x1xf32> to vector<16x16xf32>
    %274 = arith.subf %270, %273 : vector<16x16xf32>
    %275 = math.exp %274 : vector<16x16xf32>
    %cst_94 = arith.constant dense<0.000000e+00> : vector<16xf32>
    %276 = vector.multi_reduction <add>, %275, %cst_94 [1] : vector<16x16xf32> to vector<16xf32>
    %277 = vector.shape_cast %276 : vector<16xf32> to vector<16x1xf32>
    %cst_95 = arith.constant dense<0.000000e+00> : vector<16x8xf32>
    %278 = tpu.matmul %275, %269, %cst_95 {dimension_numbers = #tpu.dot_dimension_numbers<[1], [0], [0], [1], [0, 0, 1, 1], [], []>} : vector<16x16xf32>, vector<16x8xf32>, vector<16x8xf32> -> vector<16x8xf32>
    %279 = tpu.reciprocal %277 {approx = true} : vector<16x1xf32> -> vector<16x1xf32>
    %280 = vector.broadcast %279 : vector<16x1xf32> to vector<16x8xf32>
    %281 = arith.mulf %278, %280 : vector<16x8xf32>
    %cst_96 = arith.constant dense<0.000000e+00> : vector<16x32xf32>
    %282 = tpu.matmul %281, %4, %cst_96 {dimension_numbers = #tpu.dot_dimension_numbers<[1], [0], [0], [1], [0, 0, 1, 1], [], []>} : vector<16x8xf32>, vector<8x32xf32>, vector<16x32xf32> -> vector<16x32xf32>
    %283 = arith.addf %266, %282 : vector<16x32xf32>
    %cst_97 = arith.constant dense<0.000000e+00> : vector<16xf32>
    %284 = vector.multi_reduction <add>, %283, %cst_97 [1] : vector<16x32xf32> to vector<16xf32>
    %285 = vector.shape_cast %284 : vector<16xf32> to vector<16x1xf32>
    %cst_98 = arith.constant 3.200000e+01 : f32
    %286 = vector.broadcast %cst_98 : f32 to vector<16x1xf32>
    %287 = arith.divf %285, %286 : vector<16x1xf32>
    %288 = vector.broadcast %287 : vector<16x1xf32> to vector<16x32xf32>
    %289 = arith.subf %283, %288 : vector<16x32xf32>
    %290 = arith.mulf %289, %289 : vector<16x32xf32>
    %cst_99 = arith.constant dense<0.000000e+00> : vector<16xf32>
    %291 = vector.multi_reduction <add>, %290, %cst_99 [1] : vector<16x32xf32> to vector<16xf32>
    %292 = vector.shape_cast %291 : vector<16xf32> to vector<16x1xf32>
    %cst_100 = arith.constant 3.200000e+01 : f32
    %293 = vector.broadcast %cst_100 : f32 to vector<16x1xf32>
    %294 = arith.divf %292, %293 : vector<16x1xf32>
    %295 = vector.broadcast %287 : vector<16x1xf32> to vector<16x32xf32>
    %296 = arith.subf %283, %295 : vector<16x32xf32>
    %cst_101 = arith.constant 9.99999974E-6 : f32
    %297 = vector.broadcast %cst_101 : f32 to vector<16x1xf32>
    %298 = arith.addf %294, %297 : vector<16x1xf32>
    %299 = math.rsqrt %298 : vector<16x1xf32>
    %300 = vector.broadcast %299 : vector<16x1xf32> to vector<16x32xf32>
    %301 = arith.mulf %296, %300 : vector<16x32xf32>
    %302 = vector.broadcast %7 : vector<1x32xf32> to vector<16x32xf32>
    %303 = arith.mulf %301, %302 : vector<16x32xf32>
    %304 = vector.broadcast %8 : vector<1x32xf32> to vector<16x32xf32>
    %305 = arith.addf %303, %304 : vector<16x32xf32>
    %c0_102 = arith.constant 0 : index
    %c2_103 = arith.constant 2 : index
    %c0_104 = arith.constant 0 : index
    %306 = vector.load %arg4[%c0_102, %c2_103, %c0_104] : memref<16x4x32xf32, #tpu.memory_space<vmem>>, vector<16x1x32xf32>
    %307 = vector.shape_cast %306 : vector<16x1x32xf32> to vector<16x32xf32>
    %308 = vector.shape_cast %305 : vector<16x32xf32> to vector<16x1x32xf32>
    tpu.vector_store %arg4[%c0_102, %c2_103, %c0_104], %308 {strides = array<i32>} : memref<16x4x32xf32, #tpu.memory_space<vmem>>, vector<16x1x32xf32>,
    %c0_105 = arith.constant 0 : index
    %c3_106 = arith.constant 3 : index
    %c0_107 = arith.constant 0 : index
    %309 = vector.load %arg1[%c0_105, %c3_106, %c0_107] : memref<16x4x32xf32, #tpu.memory_space<vmem>>, vector<16x1x32xf32>
    %310 = vector.shape_cast %309 : vector<16x1x32xf32> to vector<16x32xf32>
    %cst_108 = arith.constant dense<0.000000e+00> : vector<16x96xf32>
    %311 = tpu.matmul %310, %0, %cst_108 {dimension_numbers = #tpu.dot_dimension_numbers<[1], [0], [0], [1], [0, 0, 1, 1], [], []>} : vector<16x32xf32>, vector<32x96xf32>, vector<16x96xf32> -> vector<16x96xf32>
    %312 = vector.broadcast %5 : vector<1x96xf32> to vector<16x96xf32>
    %313 = arith.addf %311, %312 : vector<16x96xf32>
    %314 = vector.broadcast %6 : vector<1x32xf32> to vector<16x32xf32>
    %315 = arith.addf %310, %314 : vector<16x32xf32>
    %316 = vector.extract_strided_slice %313 {offsets = [0, 0], sizes = [16, 8], strides = [1, 1]} : vector<16x96xf32> to vector<16x8xf32>
    %317 = vector.extract_strided_slice %313 {offsets = [0, 32], sizes = [16, 8], strides = [1, 1]} : vector<16x96xf32> to vector<16x8xf32>
    %318 = vector.extract_strided_slice %313 {offsets = [0, 64], sizes = [16, 8], strides = [1, 1]} : vector<16x96xf32> to vector<16x8xf32>
    %cst_109 = arith.constant dense<0.000000e+00> : vector<16x16xf32>
    %319 = tpu.matmul %316, %317, %cst_109 {dimension_numbers = #tpu.dot_dimension_numbers<[1], [1], [0], [0], [0, 0, 1, 0], [], []>} : vector<16x8xf32>, vector<16x8xf32>, vector<16x16xf32> -> vector<16x16xf32>
    %cst_110 = arith.constant dense<0xFF800000> : vector<16xf32>
    %320 = vector.multi_reduction <maximumf>, %319, %cst_110 [1] : vector<16x16xf32> to vector<16xf32>
    %321 = vector.shape_cast %320 : vector<16xf32> to vector<16x1xf32>
    %322 = vector.broadcast %321 : vector<16x1xf32> to vector<16x16xf32>
    %323 = arith.subf %319, %322 : vector<16x16xf32>
    %324 = math.exp %323 : vector<16x16xf32>
    %cst_111 = arith.constant dense<0.000000e+00> : vector<16xf32>
    %325 = vector.multi_reduction <add>, %324, %cst_111 [1] : vector<16x16xf32> to vector<16xf32>
    %326 = vector.shape_cast %325 : vector<16xf32> to vector<16x1xf32>
    %cst_112 = arith.constant dense<0.000000e+00> : vector<16x8xf32>
    %327 = tpu.matmul %324, %318, %cst_112 {dimension_numbers = #tpu.dot_dimension_numbers<[1], [0], [0], [1], [0, 0, 1, 1], [], []>} : vector<16x16xf32>, vector<16x8xf32>, vector<16x8xf32> -> vector<16x8xf32>
    %328 = tpu.reciprocal %326 {approx = true} : vector<16x1xf32> -> vector<16x1xf32>
    %329 = vector.broadcast %328 : vector<16x1xf32> to vector<16x8xf32>
    %330 = arith.mulf %327, %329 : vector<16x8xf32>
    %cst_113 = arith.constant dense<0.000000e+00> : vector<16x32xf32>
    %331 = tpu.matmul %330, %1, %cst_113 {dimension_numbers = #tpu.dot_dimension_numbers<[1], [0], [0], [1], [0, 0, 1, 1], [], []>} : vector<16x8xf32>, vector<8x32xf32>, vector<16x32xf32> -> vector<16x32xf32>
    %332 = arith.addf %315, %331 : vector<16x32xf32>
    %333 = vector.extract_strided_slice %313 {offsets = [0, 8], sizes = [16, 8], strides = [1, 1]} : vector<16x96xf32> to vector<16x8xf32>
    %334 = vector.extract_strided_slice %313 {offsets = [0, 40], sizes = [16, 8], strides = [1, 1]} : vector<16x96xf32> to vector<16x8xf32>
    %335 = vector.extract_strided_slice %313 {offsets = [0, 72], sizes = [16, 8], strides = [1, 1]} : vector<16x96xf32> to vector<16x8xf32>
    %cst_114 = arith.constant dense<0.000000e+00> : vector<16x16xf32>
    %336 = tpu.matmul %333, %334, %cst_114 {dimension_numbers = #tpu.dot_dimension_numbers<[1], [1], [0], [0], [0, 0, 1, 0], [], []>} : vector<16x8xf32>, vector<16x8xf32>, vector<16x16xf32> -> vector<16x16xf32>
    %cst_115 = arith.constant dense<0xFF800000> : vector<16xf32>
    %337 = vector.multi_reduction <maximumf>, %336, %cst_115 [1] : vector<16x16xf32> to vector<16xf32>
    %338 = vector.shape_cast %337 : vector<16xf32> to vector<16x1xf32>
    %339 = vector.broadcast %338 : vector<16x1xf32> to vector<16x16xf32>
    %340 = arith.subf %336, %339 : vector<16x16xf32>
    %341 = math.exp %340 : vector<16x16xf32>
    %cst_116 = arith.constant dense<0.000000e+00> : vector<16xf32>
    %342 = vector.multi_reduction <add>, %341, %cst_116 [1] : vector<16x16xf32> to vector<16xf32>
    %343 = vector.shape_cast %342 : vector<16xf32> to vector<16x1xf32>
    %cst_117 = arith.constant dense<0.000000e+00> : vector<16x8xf32>
    %344 = tpu.matmul %341, %335, %cst_117 {dimension_numbers = #tpu.dot_dimension_numbers<[1], [0], [0], [1], [0, 0, 1, 1], [], []>} : vector<16x16xf32>, vector<16x8xf32>, vector<16x8xf32> -> vector<16x8xf32>
    %345 = tpu.reciprocal %343 {approx = true} : vector<16x1xf32> -> vector<16x1xf32>
    %346 = vector.broadcast %345 : vector<16x1xf32> to vector<16x8xf32>
    %347 = arith.mulf %344, %346 : vector<16x8xf32>
    %cst_118 = arith.constant dense<0.000000e+00> : vector<16x32xf32>
    %348 = tpu.matmul %347, %2, %cst_118 {dimension_numbers = #tpu.dot_dimension_numbers<[1], [0], [0], [1], [0, 0, 1, 1], [], []>} : vector<16x8xf32>, vector<8x32xf32>, vector<16x32xf32> -> vector<16x32xf32>
    %349 = arith.addf %332, %348 : vector<16x32xf32>
    %350 = vector.extract_strided_slice %313 {offsets = [0, 16], sizes = [16, 8], strides = [1, 1]} : vector<16x96xf32> to vector<16x8xf32>
    %351 = vector.extract_strided_slice %313 {offsets = [0, 48], sizes = [16, 8], strides = [1, 1]} : vector<16x96xf32> to vector<16x8xf32>
    %352 = vector.extract_strided_slice %313 {offsets = [0, 80], sizes = [16, 8], strides = [1, 1]} : vector<16x96xf32> to vector<16x8xf32>
    %cst_119 = arith.constant dense<0.000000e+00> : vector<16x16xf32>
    %353 = tpu.matmul %350, %351, %cst_119 {dimension_numbers = #tpu.dot_dimension_numbers<[1], [1], [0], [0], [0, 0, 1, 0], [], []>} : vector<16x8xf32>, vector<16x8xf32>, vector<16x16xf32> -> vector<16x16xf32>
    %cst_120 = arith.constant dense<0xFF800000> : vector<16xf32>
    %354 = vector.multi_reduction <maximumf>, %353, %cst_120 [1] : vector<16x16xf32> to vector<16xf32>
    %355 = vector.shape_cast %354 : vector<16xf32> to vector<16x1xf32>
    %356 = vector.broadcast %355 : vector<16x1xf32> to vector<16x16xf32>
    %357 = arith.subf %353, %356 : vector<16x16xf32>
    %358 = math.exp %357 : vector<16x16xf32>
    %cst_121 = arith.constant dense<0.000000e+00> : vector<16xf32>
    %359 = vector.multi_reduction <add>, %358, %cst_121 [1] : vector<16x16xf32> to vector<16xf32>
    %360 = vector.shape_cast %359 : vector<16xf32> to vector<16x1xf32>
    %cst_122 = arith.constant dense<0.000000e+00> : vector<16x8xf32>
    %361 = tpu.matmul %358, %352, %cst_122 {dimension_numbers = #tpu.dot_dimension_numbers<[1], [0], [0], [1], [0, 0, 1, 1], [], []>} : vector<16x16xf32>, vector<16x8xf32>, vector<16x8xf32> -> vector<16x8xf32>
    %362 = tpu.reciprocal %360 {approx = true} : vector<16x1xf32> -> vector<16x1xf32>
    %363 = vector.broadcast %362 : vector<16x1xf32> to vector<16x8xf32>
    %364 = arith.mulf %361, %363 : vector<16x8xf32>
    %cst_123 = arith.constant dense<0.000000e+00> : vector<16x32xf32>
    %365 = tpu.matmul %364, %3, %cst_123 {dimension_numbers = #tpu.dot_dimension_numbers<[1], [0], [0], [1], [0, 0, 1, 1], [], []>} : vector<16x8xf32>, vector<8x32xf32>, vector<16x32xf32> -> vector<16x32xf32>
    %366 = arith.addf %349, %365 : vector<16x32xf32>
    %367 = vector.extract_strided_slice %313 {offsets = [0, 24], sizes = [16, 8], strides = [1, 1]} : vector<16x96xf32> to vector<16x8xf32>
    %368 = vector.extract_strided_slice %313 {offsets = [0, 56], sizes = [16, 8], strides = [1, 1]} : vector<16x96xf32> to vector<16x8xf32>
    %369 = vector.extract_strided_slice %313 {offsets = [0, 88], sizes = [16, 8], strides = [1, 1]} : vector<16x96xf32> to vector<16x8xf32>
    %cst_124 = arith.constant dense<0.000000e+00> : vector<16x16xf32>
    %370 = tpu.matmul %367, %368, %cst_124 {dimension_numbers = #tpu.dot_dimension_numbers<[1], [1], [0], [0], [0, 0, 1, 0], [], []>} : vector<16x8xf32>, vector<16x8xf32>, vector<16x16xf32> -> vector<16x16xf32>
    %cst_125 = arith.constant dense<0xFF800000> : vector<16xf32>
    %371 = vector.multi_reduction <maximumf>, %370, %cst_125 [1] : vector<16x16xf32> to vector<16xf32>
    %372 = vector.shape_cast %371 : vector<16xf32> to vector<16x1xf32>
    %373 = vector.broadcast %372 : vector<16x1xf32> to vector<16x16xf32>
    %374 = arith.subf %370, %373 : vector<16x16xf32>
    %375 = math.exp %374 : vector<16x16xf32>
    %cst_126 = arith.constant dense<0.000000e+00> : vector<16xf32>
    %376 = vector.multi_reduction <add>, %375, %cst_126 [1] : vector<16x16xf32> to vector<16xf32>
    %377 = vector.shape_cast %376 : vector<16xf32> to vector<16x1xf32>
    %cst_127 = arith.constant dense<0.000000e+00> : vector<16x8xf32>
    %378 = tpu.matmul %375, %369, %cst_127 {dimension_numbers = #tpu.dot_dimension_numbers<[1], [0], [0], [1], [0, 0, 1, 1], [], []>} : vector<16x16xf32>, vector<16x8xf32>, vector<16x8xf32> -> vector<16x8xf32>
    %379 = tpu.reciprocal %377 {approx = true} : vector<16x1xf32> -> vector<16x1xf32>
    %380 = vector.broadcast %379 : vector<16x1xf32> to vector<16x8xf32>
    %381 = arith.mulf %378, %380 : vector<16x8xf32>
    %cst_128 = arith.constant dense<0.000000e+00> : vector<16x32xf32>
    %382 = tpu.matmul %381, %4, %cst_128 {dimension_numbers = #tpu.dot_dimension_numbers<[1], [0], [0], [1], [0, 0, 1, 1], [], []>} : vector<16x8xf32>, vector<8x32xf32>, vector<16x32xf32> -> vector<16x32xf32>
    %383 = arith.addf %366, %382 : vector<16x32xf32>
    %cst_129 = arith.constant dense<0.000000e+00> : vector<16xf32>
    %384 = vector.multi_reduction <add>, %383, %cst_129 [1] : vector<16x32xf32> to vector<16xf32>
    %385 = vector.shape_cast %384 : vector<16xf32> to vector<16x1xf32>
    %cst_130 = arith.constant 3.200000e+01 : f32
    %386 = vector.broadcast %cst_130 : f32 to vector<16x1xf32>
    %387 = arith.divf %385, %386 : vector<16x1xf32>
    %388 = vector.broadcast %387 : vector<16x1xf32> to vector<16x32xf32>
    %389 = arith.subf %383, %388 : vector<16x32xf32>
    %390 = arith.mulf %389, %389 : vector<16x32xf32>
    %cst_131 = arith.constant dense<0.000000e+00> : vector<16xf32>
    %391 = vector.multi_reduction <add>, %390, %cst_131 [1] : vector<16x32xf32> to vector<16xf32>
    %392 = vector.shape_cast %391 : vector<16xf32> to vector<16x1xf32>
    %cst_132 = arith.constant 3.200000e+01 : f32
    %393 = vector.broadcast %cst_132 : f32 to vector<16x1xf32>
    %394 = arith.divf %392, %393 : vector<16x1xf32>
    %395 = vector.broadcast %387 : vector<16x1xf32> to vector<16x32xf32>
    %396 = arith.subf %383, %395 : vector<16x32xf32>
    %cst_133 = arith.constant 9.99999974E-6 : f32
    %397 = vector.broadcast %cst_133 : f32 to vector<16x1xf32>
    %398 = arith.addf %394, %397 : vector<16x1xf32>
    %399 = math.rsqrt %398 : vector<16x1xf32>
    %400 = vector.broadcast %399 : vector<16x1xf32> to vector<16x32xf32>
    %401 = arith.mulf %396, %400 : vector<16x32xf32>
    %402 = vector.broadcast %7 : vector<1x32xf32> to vector<16x32xf32>
    %403 = arith.mulf %401, %402 : vector<16x32xf32>
    %404 = vector.broadcast %8 : vector<1x32xf32> to vector<16x32xf32>
    %405 = arith.addf %403, %404 : vector<16x32xf32>
    %c0_134 = arith.constant 0 : index
    %c3_135 = arith.constant 3 : index
    %c0_136 = arith.constant 0 : index
    %406 = vector.load %arg4[%c0_134, %c3_135, %c0_136] : memref<16x4x32xf32, #tpu.memory_space<vmem>>, vector<16x1x32xf32>
    %407 = vector.shape_cast %406 : vector<16x1x32xf32> to vector<16x32xf32>
    %408 = vector.shape_cast %405 : vector<16x32xf32> to vector<16x1x32xf32>
    tpu.vector_store %arg4[%c0_134, %c3_135, %c0_136], %408 {strides = array<i32>} : memref<16x4x32xf32, #tpu.memory_space<vmem>>, vector<16x1x32xf32>,
    return
  }
  func.func @transform_0(%arg0: i32) -> (i32, i32, i32) {
    %c0_i32 = arith.constant 0 : i32
    %c0_i32_0 = arith.constant 0 : i32
    %c0_i32_1 = arith.constant 0 : i32
    return %c0_i32, %arg0, %c0_i32_0 : i32, i32, i32
  }
  func.func @transform_1(%arg0: i32) -> (i32, i32) {
    %c0_i32 = arith.constant 0 : i32
    %c0_i32_0 = arith.constant 0 : i32
    %c0_i32_1 = arith.constant 0 : i32
    return %c0_i32, %c0_i32_0 : i32, i32
  }
  func.func @transform_2(%arg0: i32) -> (i32, i32) {
    %c0_i32 = arith.constant 0 : i32
    %c0_i32_0 = arith.constant 0 : i32
    %c0_i32_1 = arith.constant 0 : i32
    return %c0_i32, %c0_i32_0 : i32, i32
  }
  func.func @transform_3(%arg0: i32) -> (i32, i32, i32) {
    %c0_i32 = arith.constant 0 : i32
    %c0_i32_0 = arith.constant 0 : i32
    %c0_i32_1 = arith.constant 0 : i32
    return %c0_i32, %arg0, %c0_i32_0 : i32, i32, i32
  }
}

</mosaic_0001>

<bundles_post_ra>
// kernel: self_attention_forward.1
= control target key start
LH: loop header
LB: loop body
LE: loop exit
PB: predicated region body
PF: predicated region fallthrough
CT: control target
= control target key end

     0   :  { %8 = vsyncpa [#allocation3], 0  ;;  %s10284_s0 = inlined_call_operand.hbm [shape: f32[16,4,32], index: 0, kind: input, shape index: {}]   ;;  %s10285_s1 = inlined_call_operand.hbm [shape: f32[32,128], index: 1, kind: input, shape index: {}]   ;;  %s10286_s2 = inlined_call_operand.hbm [shape: f32[4,96], index: 2, kind: input, shape index: {}]   ;;  %s10287_s3 = inlined_call_operand.hbm [shape: f32[16,4,32], index: 3, kind: output, shape index: {}]  }
   0x1   :  { %9 = vsyncpa [#allocation6], 0 }
   0x2   :  { %10 = vsyncpa [#allocation4], 0  ;;  %s8065_s12 = smov [#allocation5]  }
   0x3   :  { %s28_s13 = sshll.u32 %s8065_s12, 4  ;;  %s29_s13 = int_to_ptr.vmem [resolvable:$true] %s28_s13 }
   0x4   :  { %s7987_s14 = scalar_lea.vmem %s29_s13, 512  ;;  %p7992_p1 = scmp.lt.s32.totalorder %s29_s13, %s29_s13 }
   0x5   :  { %p7988_p0 = scmp.ne.s32.totalorder %s29_s13, %s7987_s14  ;;  %p7993_p2 = scmp.lt.s32.totalorder %s7987_s14, %s7987_s14 }
   0x7   :  { %p7994_p3 = por %p7993_p2, %p7992_p1 }
   0x9   :  { %p7995_p4 = pnand %p7994_p3, %p7988_p0 }
   0xb   :  { %7998 = shalt.err (!%p7995_p4)
}
   0xc   :  { %s8066_s15 = smov 128   ;;  %s8067_s16 = smov 8  }
   0xd   :  { %34 = dma.hbm_to_vmem [thread:$0]  %s10285_s1, 512, %s29_s13, [#allocation6], %s8066_s15, %s8066_s15, %s8067_s16  }
   0xe   :  { %s8068_s19 = smov [#allocation2]  }
   0xf   :  { %s16_s20 = sshll.u32 %s8068_s19, 4  ;;  %s17_s20 = int_to_ptr.vmem [resolvable:$true] %s16_s20 }
  0x10   :  { %s8007_s21 = scalar_lea.vmem %s17_s20, 1024  ;;  %p8012_p6 = scmp.lt.s32.totalorder %s17_s20, %s17_s20 }
  0x11   :  { %p8008_p5 = scmp.ne.s32.totalorder %s17_s20, %s8007_s21  ;;  %p8013_p7 = scmp.lt.s32.totalorder %s8007_s21, %s8007_s21 }
  0x13   :  { %p8014_p8 = por %p8013_p7, %p8012_p6 }
  0x15   :  { %p8015_p9 = pnand %p8014_p8, %p8008_p5 }
  0x17   :  { %8018 = shalt.err (!%p8015_p9)
}
  0x18   :  { %s8069_s22 = smov 64   ;;  %s8070_s23 = smov 4  }
  0x19   :  { %22 = dma.hbm_to_vmem [thread:$0]  %s10284_s0, 1024, %s17_s20, [#allocation3], %s8069_s22, %s8069_s22, %s8070_s23  }
  0x1a   :  { %s8071_s1 = smov [#allocation7]  }
  0x1b   :  { %s41_s26 = sshll.u32 %s8071_s1, 4  ;;  %s42_s26 = int_to_ptr.vmem [resolvable:$true] %s41_s26 }
  0x1c   :  { %s8027_s27 = scalar_lea.vmem %s42_s26, 64  ;;  %p8032_p11 = scmp.lt.s32.totalorder %s42_s26, %s42_s26 }
  0x1d   :  { %p8028_p10 = scmp.ne.s32.totalorder %s42_s26, %s8027_s27  ;;  %p8033_p12 = scmp.lt.s32.totalorder %s8027_s27, %s8027_s27 }
  0x1f   :  { %p8034_p13 = por %p8033_p12, %p8032_p11 }
  0x21   :  { %p8035_p0 = pnand %p8034_p13, %p8028_p10 }
  0x23   :  { %8038 = shalt.err (!%p8035_p0)
}
  0x24   :  { %44 = dma.hbm_to_vmem [thread:$0]  %s10286_s2, 64, %s42_s26, [#allocation6]  }
  0x25   :  { %8059 = dma.done.wait [#allocation3], 1024  }
  0x26   :  { %8060 = vsyncadd [#allocation3], 4294966272 }
  0x27   :  { %8061 = dma.done.wait [#allocation6], 576  }
  0x28   :  { %8062 = vsyncadd [#allocation6], 4294966720  ;;  %v8116_v0 = vld [vmem:[#allocation5 + $0x18] sm:$0xff]  ;;  %v8118_v1 = vld [vmem:[#allocation5 + $0x10] sm:$0xff]  ;;  %vm102_vm0 = vcmask 1041409   ;;  %vm105_vm1 = vcmask 1042434  }
  0x29   :  { %vm108_vm2 = vcmask 1043459   ;;  %7431 = vmatprep.subr.mxu0 %v8116_v0  ;;  %v8121_v2 = vld [vmem:[#allocation5 + $0x8] sm:$0xff]  ;;  %v8123_v3 = vld [vmem:[#allocation2] sm:$0x1]  ;;  %vm111_vm3 = vcmask 1044484   ;;  %vm114_vm4 = vcmask 1045509  }
  0x2a   :  { %vm117_vm5 = vcmask 1046534   ;;  %7432 = vmatpush3.msra.mxu0 %v8116_v0  ;;  %v8126_v4 = vld [vmem:[#allocation2 + $0x4] sm:$0x1]  ;;  %v8128_v5 = vld [vmem:[#allocation2 + $0x8] sm:$0x1]  ;;  %vm120_vm6 = vcmask 1047559  }
  0x2b   :  { %v8130_v6 = vld [vmem:[#allocation2 + $0xc] sm:$0x1]  ;;  %7433 = vmatprep.subr.mxu0 %v8118_v1  ;;  %v8133_v7 = vld [vmem:[#allocation2 + $0x10] sm:$0x1]  ;;  %v8135_v8 = vld [vmem:[#allocation2 + $0x14] sm:$0x1] }
  0x2c   :  { %v8137_v9 = vld [vmem:[#allocation2 + $0x18] sm:$0x1]  ;;  %7434 = vmatpush3.msra.mxu0 %v8118_v1  ;;  %v8140_v10 = vld [vmem:[#allocation5] sm:$0xff]  ;;  %v8142_v11 = vld [vmem:[#allocation2 + $0x1c] sm:$0x1]  ;;  %v101_v12 = vrot.slane %v8126_v4, 7 }
  0x2d   :  { %v104_v13 = vrot.slane %v8128_v5, 6  ;;  %v107_v14 = vrot.slane %v8130_v6, 5  ;;  %7435 = vmatprep.subr.mxu0 %v8121_v2  ;;  %v110_v15 = vrot.slane %v8133_v7, 4  ;;  %v113_v16 = vrot.slane %v8135_v8, 3  ;;  %v8155_v20 = vld [vmem:[#allocation2 + $0x24] sm:$0x1] }
  0x2e   :  { %v116_v17 = vrot.slane %v8137_v9, 2  ;;  %v119_v18 = vrot.slane %v8142_v11, 1  ;;  %7436 = vmatpush3.msra.mxu0 %v8121_v2  ;;  %v103_v19 = vsel %vm102_vm0, %v101_v12, %v8123_v3  ;;  %v8157_v21 = vld [vmem:[#allocation2 + $0x28] sm:$0x1]  ;;  %v8159_v22 = vld [vmem:[#allocation2 + $0x2c] sm:$0x1] }
  0x2f   :  { %7437 = vmatprep.subr.mxu0 %v8140_v10  ;;  %v106_v23 = vsel %vm105_vm1, %v104_v13, %v103_v19  ;;  %v8163_v24 = vld [vmem:[#allocation2 + $0x20] sm:$0x1]  ;;  %v8165_v25 = vld [vmem:[#allocation2 + $0x30] sm:$0x1]  ;;  %v8167_v26 = vld [vmem:[#allocation2 + $0x34] sm:$0x1] }
  0x30   :  { %7438 = vmatpush3.msra.mxu0 %v8140_v10  ;;  %v109_v27 = vsel %vm108_vm2, %v107_v14, %v106_v23  ;;  %v8171_v28 = vld [vmem:[#allocation2 + $0x38] sm:$0x1]  ;;  %v122_v29 = vrot.slane %v8155_v20, 7  ;;  %v124_v30 = vrot.slane %v8157_v21, 6  ;;  %v126_v31 = vrot.slane %v8159_v22, 5  ;;  %s8072_s0 = smov 96  }
  0x31   :  { %v112_v32 = vsel %vm111_vm3, %v110_v15, %v109_v27  ;;  %v8177_v33 = vld [vmem:[#allocation2 + $0x3c] sm:$0x1]  ;;  %v128_v34 = vrot.slane %v8165_v25, 4  ;;  %vm136_vm7 = vcmask 261120   ;;  %v130_v37 = vrot.slane %v8167_v26, 3  ;;  %s8073_s2 = smov 88  }
  0x32   :  { %v115_v35 = vsel %vm114_vm4, %v113_v16, %v112_v32  ;;  %v123_v36 = vsel %vm102_vm0, %v122_v29, %v8163_v24  ;;  %v132_v40 = vrot.slane %v8171_v28, 2  ;;  %v134_v43 = vrot.slane %v8177_v33, 1  ;;  %v8196_v48 = vld [vmem:[#allocation7] ss:$0 sm:$0xff]  ;;  %s8074_s30 = smov 120   ;;  %s8075_s4 = smov 80  }
  0x33   :  { %v118_v38 = vsel %vm117_vm5, %v116_v17, %v115_v35  ;;  %v125_v39 = vsel %vm105_vm1, %v124_v30, %v123_v36  ;;  %vm242_vm8 = vcmask 64512   ;;  %s8076_s5 = smov 112   ;;  %vm326_vm9 = vcmask 130048   ;;  %s8077_s6 = smov 56  }
  0x34   :  { %v121_v41 = vsel %vm120_vm6, %v119_v18, %v118_v38  ;;  %v127_v42 = vsel %vm108_vm2, %v126_v31, %v125_v39  ;;  %s8078_s7 = smov 32   ;;  %s8079_s8 = smov 72   ;;  %vm1833_vm10 = vcmask 253952  }
  0x35   :  { %7439 = vmatprep.mubr.msk.f32.mxu0 %vm136_vm7, %v121_v41  ;;  %v129_v44 = vsel %vm111_vm3, %v128_v34, %v127_v42  ;;  %s8080_s9 = smov 104   ;;  %s8081_s10 = smov 48  }
  0x36   :  { %v131_v45 = vsel %vm114_vm4, %v130_v37, %v129_v44  ;;  %s8082_s11 = smov 40   ;;  %s8083_s12 = smov [#allocation8]  }
  0x37   :  { %v133_v46 = vsel %vm117_vm5, %v132_v40, %v131_v45  ;;  %s7078_s13 = sshll.u32 %s8083_s12, 4  ;;  %s7079_s13 = int_to_ptr.vmem [resolvable:$true] %s7078_s13 }
  0x38   :  { %v135_v47 = vsel %vm120_vm6, %v134_v43, %v133_v46  ;;  %s8039_s14 = scalar_lea.vmem %s7079_s13, 1024  ;;  %p8044_p2 = scmp.lt.s32.totalorder %s7079_s13, %s7079_s13 }
  0x39   :  { %7440 = vmatmul.mubr.msk.f32.vlgmr.msra.gmra.mxu0 %vm136_vm7, %v135_v47  ;;  %p8040_p1 = scmp.ne.s32.totalorder %s7079_s13, %s8039_s14  ;;  %p8045_p3 = scmp.lt.s32.totalorder %s8039_s14, %s8039_s14 }
  0x3b   :  { %p8046_p4 = por %p8045_p3, %p8044_p2 }
  0x3d   :  { %p8047_p5 = pnand %p8046_p4, %p8040_p1 }
  0xf9   :  { %v7441_v49 = vpop.f32.mrf.mxu0 }
  0xfa   :  { %v8199_v50 = vadd.f32 %v7441_v49, %v8196_v48 }
  0xfb   :  { %v207_v51 = vpop.f32.mrf.mxu0 }
  0xfc   :  { %v8202_v52 = vadd.f32 %v8196_v48, %v207_v51  ;;  %240 = vrot.lane.b32.xlu0 %v8199_v50, %s8072_s0 }
  0xfe   :  { %7446 = vmatprep.mubr.msk.f32.mxu1 %vm242_vm8, %v8202_v52 }
 0x100   :  { %238 = vrot.lane.b32.xlu0 %v8202_v52, %s8072_s0 }
 0x104   :  { %347 = vrot.lane.b32.xlu0 %v8199_v50, %s8069_s22 }
 0x108   :  { %575 = vrot.lane.b32.xlu0 %v8199_v50, %s8073_s2 }
 0x10c   :  { %573 = vrot.lane.b32.xlu0 %v8202_v52, %s8073_s2 }
 0x110   :  { %569 = vrot.lane.b32.xlu0 %v8202_v52, %s8074_s30 }
 0x114   :  { %571 = vrot.lane.b32.xlu0 %v8199_v50, %s8074_s30 }
 0x118   :  { %906 = vrot.lane.b32.xlu0 %v8202_v52, %s8075_s4 }
 0x11c   :  { %904 = vrot.lane.b32.xlu0 %v8199_v50, %s8076_s5 }
 0x16e   :  { %v241_v53 = vpop.permute.xlu0 %240 }
 0x16f   :  { %7442 = vmatprep.subr.msk.mxu1 %vm242_vm8, %v241_v53 }
 0x170   :  { %7443 = vmatpush3.xpose.msk.msra.mxu1 %vm242_vm8, %v241_v53 }
 0x172   :  { %v239_v54 = vpop.permute.xlu0 %238 }
 0x173   :  { %7444 = vmatprep.subr.msk.mxu1 %vm242_vm8, %v239_v54 }
 0x174   :  { %7445 = vmatpush3.xpose.msk.msra.mxu1 %vm242_vm8, %v239_v54 }
 0x176   :  { %v348_v55 = vpop.permute.xlu0 %347 }
 0x177   :  { %7447 = vmatmul.mubr.msk.f32.vlgmr.msra.gmra.mxu1 %vm242_vm8, %v8199_v50  ;;  %7449 = vmatprep.subr.mxu0 %v348_v55 }
 0x178   :  { %7450 = vmatpush3.msra.mxu0 %v348_v55 }
 0x17a   :  { %v576_v15 = vpop.permute.xlu0 %575 }
 0x17e   :  { %v574_v16 = vpop.permute.xlu0 %573 }
 0x182   :  { %v570_v19 = vpop.permute.xlu0 %569 }
 0x186   :  { %v572_v30 = vpop.permute.xlu0 %571 }
 0x18a   :  { %v907_v32 = vpop.permute.xlu0 %906 }
 0x18e   :  { %v905_v34 = vpop.permute.xlu0 %904 }
 0x237   :  { %v7448_v56 = vpop.f32.mrf.mxu1 }
 0x238   :  { %v330_v57 = vsel %vm326_vm9, %v7448_v56, -inf }
 0x239   :  { %331 = vmax.xlane.f32.xlu1 %v330_v57  ;;  %v317_v58 = vpop.f32.mrf.mxu1 }
 0x23a   :  { %v327_v59 = vsel %vm326_vm9, %v317_v58, -inf }
 0x23d   :  { %328 = vmax.xlane.f32.xlu1 %v327_v59 }
 0x24e   :  { %345 = vrot.lane.b32.xlu1 %v8202_v52, %s8069_s22 }
 0x252   :  { %908 = vrot.lane.b32.xlu1 %v8199_v50, %s8075_s4 }
 0x256   :  { %902 = vrot.lane.b32.xlu1 %v8202_v52, %s8076_s5 }
 0x2c2   :  { %v332_v60 = vpop.xlane.xlu1 %331 }
 0x2c3   :  { %v334_v61 = vsub.f32 %v7448_v56, %v332_v60 }
 0x2c5   :  { %v337_v62 = vmul.f32 1.442695, %v334_v61 }
 0x2c6   :  { %v329_v63 = vpop.xlane.xlu1 %328 }
 0x2c7   :  { %7798 = vpow2.f32 %v337_v62  ;;  %v333_v12 = vsub.f32 %v317_v58, %v329_v63 }
 0x2c9   :  { %v335_v13 = vmul.f32 1.442695, %v333_v12 }
 0x2ca   :  { %v346_v14 = vpop.permute.xlu1 %345 }
 0x2cb   :  { %7800 = vpow2.f32 %v335_v13  ;;  %7451 = vmatprep.subr.mxu0 %v346_v14 }
 0x2cc   :  { %7452 = vmatpush3.msra.mxu0 %v346_v14 }
 0x2cd   :  { %7461 = vmatprep.subr.msk.mxu0 %vm242_vm8, %v576_v15 }
 0x2ce   :  { %v909_v29 = vpop.permute.xlu1 %908 }
 0x2d2   :  { %v903_v31 = vpop.permute.xlu1 %902 }
 0x2d4   :  { %v7799_v17 = vpop.eup %7798 }
 0x2d5   :  { %v342_v18 = vsel %vm326_vm9, %v7799_v17, 0.0 }
 0x2d6   :  { %343 = vadd.xlane.f32.xlu0 %v342_v18 }
 0x2d8   :  { %v7801_v23 = vpop.eup %7800 }
 0x2d9   :  { %7453 = vmatprep.mubr.msk.f32.mxu0 %vm326_vm9, %v7801_v23  ;;  %v339_v27 = vsel %vm326_vm9, %v7801_v23, 0.0 }
 0x2da   :  { %340 = vadd.xlane.f32.xlu1 %v339_v27  ;;  %7454 = vmatmul.mubr.msk.f32.vlgmr.msra.gmra.mxu0 %vm326_vm9, %v7799_v17 }
 0x2db   :  { %7462 = vmatpush3.xpose.msk.msra.mxu0 %vm242_vm8, %v576_v15  ;;  %7465 = vmatprep.mubr.msk.f32.mxu0 %vm242_vm8, %v570_v19 }
 0x2dc   :  { %7463 = vmatprep.subr.msk.mxu0 %vm242_vm8, %v574_v16 }
 0x2df   :  { %7464 = vmatpush3.xpose.msk.msra.mxu0 %vm242_vm8, %v574_v16 }
 0x2e0   :  { %7480 = vmatprep.subr.msk.mxu0 %vm242_vm8, %v909_v29 }
 0x2e2   :  { %7466 = vmatmul.mubr.msk.f32.vlgmr.msra.gmra.mxu0 %vm242_vm8, %v572_v30  ;;  %v1851_v30 = vld [vmem:[#allocation2 + $0x5] sm:$0x1] }
 0x2e3   :  { %7481 = vmatpush3.xpose.msk.msra.mxu0 %vm242_vm8, %v909_v29  ;;  %7484 = vmatprep.mubr.msk.f32.mxu0 %vm242_vm8, %v903_v31  ;;  %v1850_v29 = vld [vmem:[#allocation2 + $0x1] sm:$0x1]  ;;  %v1852_v31 = vld [vmem:[#allocation2 + $0x9] sm:$0x1] }
 0x2e4   :  { %7482 = vmatprep.subr.msk.mxu0 %vm242_vm8, %v907_v32 }
 0x2e7   :  { %7483 = vmatpush3.xpose.msk.msra.mxu0 %vm242_vm8, %v907_v32  ;;  %v1853_v32 = vld [vmem:[#allocation2 + $0xd] sm:$0x1] }
 0x2ea   :  { %7485 = vmatmul.mubr.msk.f32.vlgmr.msra.gmra.mxu0 %vm242_vm8, %v905_v34  ;;  %v1854_v34 = vld [vmem:[#allocation2 + $0x11] sm:$0x1] }
 0x35f   :  { %v344_v49 = vpop.xlane.xlu0 %343 }
 0x363   :  { %v341_v35 = vpop.xlane.xlu1 %340 }
 0x364   :  { %7802 = vrcp.f32 %v341_v35  ;;  %v1855_v35 = vld [vmem:[#allocation2 + $0x15] sm:$0x1] }
 0x365   :  { %7804 = vrcp.f32 %v344_v49  ;;  %v8313_v49 = vld [vmem:[#allocation2 + $0x29] sm:$0x1] }
 0x371   :  { %v7803_v37 = vpop.eup %7802 }
 0x372   :  { %v7805_v59 = vpop.eup %7804 }
 0x39a   :  { %v7455_v36 = vpop.f32.mrf.mxu0 }
 0x39b   :  { %v435_v61 = vmul.f32 %v7805_v59, %v7455_v36  ;;  %v1882_v36 = vrot.slane %v1851_v30, 7 }
 0x39c   :  { %v423_v38 = vpop.f32.mrf.mxu0 }
 0x39d   :  { %v434_v39 = vmul.f32 %v7803_v37, %v423_v38  ;;  %v1884_v37 = vrot.slane %v1852_v31, 6  ;;  %v1857_v38 = vld [vmem:[#allocation2 + $0x1d] sm:$0x1] }
 0x39f   :  { %7458 = vmatprep.mubr.msk.f32.mxu1 %vm242_vm8, %v434_v39  ;;  %v1888_v39 = vrot.slane %v1854_v34, 4 }
 0x3a2   :  { %v7467_v40 = vpop.f32.mrf.mxu0 }
 0x3a3   :  { %v663_v41 = vsel %vm326_vm9, %v7467_v40, -inf }
 0x3a4   :  { %664 = vmax.xlane.f32.xlu1 %v663_v41  ;;  %v651_v42 = vpop.f32.mrf.mxu0 }
 0x3a5   :  { %v660_v43 = vsel %vm326_vm9, %v651_v42, -inf }
 0x3a6   :  { %661 = vmax.xlane.f32.xlu0 %v660_v43  ;;  %v1890_v43 = vrot.slane %v1855_v35, 3 }
 0x3aa   :  { %v8273_v44 = vpop.f32.mrf.mxu0 }
 0x3ab   :  { %v996_v45 = vsel %vm326_vm9, %v8273_v44, -inf }
 0x3ac   :  { %v8277_v46 = vpop.f32.mrf.mxu0 }
 0x3ad   :  { %v993_v47 = vsel %vm326_vm9, %v8277_v46, -inf }
 0x3b5   :  { %680 = vrot.lane.b32.xlu1 %v8199_v50, %s8077_s6 }
 0x3b9   :  { %678 = vrot.lane.b32.xlu1 %v8202_v52, %s8077_s6 }
 0x3bc   :  { %437 = vrot.lane.b32.xlu0 %v8140_v10, %s8078_s7 }
 0x3bd   :  { %1239 = vrot.lane.b32.xlu1 %v8202_v52, %s8079_s8 }
 0x3c0   :  { %1241 = vrot.lane.b32.xlu0 %v8199_v50, %s8079_s8 }
 0x3c1   :  { %1237 = vrot.lane.b32.xlu1 %v8199_v50, %s8080_s9 }
 0x3c4   :  { %1235 = vrot.lane.b32.xlu0 %v8202_v52, %s8080_s9 }
 0x3c5   :  { %770 = vrot.lane.b32.xlu1 %v8121_v2, %s8078_s7 }
 0x3e3   :  { %997 = vmax.xlane.f32.xlu0 %v996_v45 }
 0x3e7   :  { %994 = vmax.xlane.f32.xlu0 %v993_v47  ;;  %v1859_v47 = vld [vmem:[#allocation2 + $0x25] sm:$0x1] }
 0x3e8   :  { %v1896_v59 = vrot.slane %v1859_v47, 7 }
 0x42d   :  { %v665_v51 = vpop.xlane.xlu1 %664 }
 0x42e   :  { %v667_v53 = vsub.f32 %v7467_v40, %v665_v51  ;;  %v1858_v40 = vld [vmem:[#allocation2 + $0x21] sm:$0x1] }
 0x42f   :  { %v662_v54 = vpop.xlane.xlu0 %661 }
 0x430   :  { %v670_v55 = vmul.f32 1.442695, %v667_v53  ;;  %v666_v56 = vsub.f32 %v651_v42, %v662_v54  ;;  %v1883_v42 = vsel %vm102_vm0, %v1882_v36, %v1850_v29  ;;  %v8316_v53 = vld [vmem:[#allocation2 + $0x2d] sm:$0x1]  ;;  %v8318_v54 = vld [vmem:[#allocation2 + $0x31] sm:$0x1] }
 0x431   :  { %v681_v57 = vpop.permute.xlu1 %680  ;;  %v1885_v51 = vsel %vm105_vm1, %v1884_v37, %v1883_v42  ;;  %v8351_v42 = vld [vmem:[#allocation7 + $0x1] ss:$0 sm:$0xff] }
 0x432   :  { %7806 = vpow2.f32 %v670_v55  ;;  %v668_v58 = vmul.f32 1.442695, %v666_v56  ;;  %v8320_v55 = vld [vmem:[#allocation2 + $0x35] sm:$0x1]  ;;  %v222_v47 = vadd.f32 %v8351_v42, %v8128_v5  ;;  %v229_v5 = vadd.f32 %v8351_v42, %v8155_v20 }
 0x433   :  { %v8281_v60 = vpop.permute.xlu0 %437  ;;  %v235_v20 = vadd.f32 %v8351_v42, %v8177_v33 }
 0x434   :  { %7808 = vpow2.f32 %v668_v58  ;;  %7456 = vmatprep.subr.mxu1 %v8281_v60  ;;  %v8323_v58 = vld [vmem:[#allocation2 + $0x39] sm:$0x1] }
 0x435   :  { %7457 = vmatpush3.msra.mxu1 %v8281_v60  ;;  %v679_v62 = vpop.permute.xlu1 %678  ;;  %v1906_v30 = vrot.slane %v8323_v58, 2 }
 0x436   :  { %7459 = vmatmul.mubr.msk.f32.vlgmr.msra.gmra.mxu1 %vm242_vm8, %v435_v61  ;;  %7468 = vmatprep.subr.mxu1 %v681_v57  ;;  %v1898_v61 = vrot.slane %v8313_v49, 6 }
 0x437   :  { %v1242_v63 = vpop.permute.xlu0 %1241  ;;  %7469 = vmatpush3.msra.mxu1 %v681_v57  ;;  %v1894_v57 = vrot.slane %v1857_v38, 1 }
 0x438   :  { %7470 = vmatprep.subr.mxu1 %v679_v62  ;;  %7499 = vmatprep.subr.msk.mxu0 %vm242_vm8, %v1242_v63 }
 0x439   :  { %7471 = vmatpush3.msra.mxu1 %v679_v62  ;;  %7500 = vmatpush3.xpose.msk.msra.mxu0 %vm242_vm8, %v1242_v63  ;;  %v1240_v12 = vpop.permute.xlu1 %1239  ;;  %v8327_v63 = vld [vmem:[#allocation2 + $0x3d] sm:$0x1] }
 0x43a   :  { %7501 = vmatprep.subr.msk.mxu0 %vm242_vm8, %v1240_v12  ;;  %v1908_v34 = vrot.slane %v8327_v63, 1 }
 0x43b   :  { %v1236_v13 = vpop.permute.xlu0 %1235 }
 0x43c   :  { %7503 = vmatprep.mubr.msk.f32.mxu0 %vm242_vm8, %v1236_v13  ;;  %v1902_v13 = vrot.slane %v8318_v54, 4 }
 0x43d   :  { %7502 = vmatpush3.xpose.msk.msra.mxu0 %vm242_vm8, %v1240_v12  ;;  %v1238_v14 = vpop.permute.xlu1 %1237  ;;  %v1900_v12 = vrot.slane %v8316_v53, 5 }
 0x43e   :  { %7518 = vmatprep.subr.mxu0 %v8116_v0 }
 0x43f   :  { %v7807_v15 = vpop.eup %7806 }
 0x440   :  { %7504 = vmatmul.mubr.msk.f32.vlgmr.msra.gmra.mxu0 %vm242_vm8, %v1238_v14  ;;  %v675_v16 = vsel %vm326_vm9, %v7807_v15, 0.0 }
 0x441   :  { %v7809_v17 = vpop.eup %7808  ;;  %676 = vadd.xlane.f32.xlu1 %v675_v16  ;;  %v8294_v18 = vpop.permute.xlu1 %770  ;;  %7519 = vmatpush3.msra.mxu0 %v8116_v0  ;;  %v1897_v16 = vsel %vm102_vm0, %v1896_v59, %v1858_v40 }
 0x442   :  { %7472 = vmatprep.mubr.msk.f32.mxu1 %vm326_vm9, %v7809_v17  ;;  %v672_v19 = vsel %vm326_vm9, %v7809_v17, 0.0  ;;  %7475 = vmatprep.subr.mxu1 %v8294_v18  ;;  %v1904_v17 = vrot.slane %v8320_v55, 3  ;;  %v1899_v29 = vsel %vm105_vm1, %v1898_v61, %v1897_v16 }
 0x443   :  { %673 = vadd.xlane.f32.xlu0 %v672_v19  ;;  %7473 = vmatmul.mubr.msk.f32.vlgmr.msra.gmra.mxu1 %vm326_vm9, %v7807_v15 }
 0x444   :  { %7476 = vmatpush3.msra.mxu1 %v8294_v18  ;;  %7520 = vmatprep.subr.mxu0 %v8118_v1 }
 0x445   :  { %7521 = vmatpush3.msra.mxu0 %v8118_v1 }
 0x446   :  { %7522 = vmatprep.subr.mxu0 %v8121_v2 }
 0x447   :  { %7523 = vmatpush3.msra.mxu0 %v8121_v2  ;;  %v1856_v2 = vld [vmem:[#allocation2 + $0x19] sm:$0x1] }
 0x448   :  { %7524 = vmatprep.subr.mxu0 %v8140_v10  ;;  %v1892_v45 = vrot.slane %v1856_v2, 2 }
 0x449   :  { %7525 = vmatpush3.msra.mxu0 %v8140_v10  ;;  %v1886_v10 = vrot.slane %v1853_v32, 5  ;;  %v1901_v32 = vsel %vm108_vm2, %v1900_v12, %v1899_v29 }
 0x44a   :  { %v1903_v35 = vsel %vm111_vm3, %v1902_v13, %v1901_v32 }
 0x44b   :  { %v1887_v56 = vsel %vm108_vm2, %v1886_v10, %v1885_v51  ;;  %v1905_v2 = vsel %vm114_vm4, %v1904_v17, %v1903_v35  ;;  %v223_v51 = vadd.f32 %v8351_v42, %v8130_v6  ;;  %v230_v6 = vadd.f32 %v8351_v42, %v8157_v21 }
 0x44c   :  { %v1889_v62 = vsel %vm111_vm3, %v1888_v39, %v1887_v56  ;;  %v1907_v36 = vsel %vm117_vm5, %v1906_v30, %v1905_v2 }
 0x44d   :  { %v1891_v15 = vsel %vm114_vm4, %v1890_v43, %v1889_v62  ;;  %v1909_v37 = vsel %vm120_vm6, %v1908_v34, %v1907_v36  ;;  %v220_v43 = vadd.f32 %v8351_v42, %v8123_v3  ;;  %v227_v3 = vadd.f32 %v8351_v42, %v8142_v11 }
 0x44e   :  { %v1893_v19 = vsel %vm117_vm5, %v1892_v45, %v1891_v15  ;;  %v221_v45 = vadd.f32 %v8351_v42, %v8126_v4  ;;  %v228_v4 = vadd.f32 %v8351_v42, %v8163_v24  ;;  %v234_v11 = vadd.f32 %v8351_v42, %v8171_v28 }
 0x44f   :  { %v1895_v31 = vsel %vm120_vm6, %v1894_v57, %v1893_v19 }
 0x450   :  { %7526 = vmatprep.mubr.msk.f32.mxu0 %vm136_vm7, %v1895_v31 }
 0x451   :  { %7527 = vmatmul.mubr.msk.f32.vlgmr.msra.gmra.mxu0 %vm136_vm7, %v1909_v37 }
 0x452   :  { %1011 = vrot.lane.b32.xlu1 %v8202_v52, %s8081_s10 }
 0x459   :  { %1013 = vrot.lane.b32.xlu0 %v8199_v50, %s8081_s10 }
 0x46c   :  { %v998_v23 = vpop.xlane.xlu0 %997 }
 0x46d   :  { %v1000_v38 = vsub.f32 %v8273_v44, %v998_v23  ;;  %v224_v44 = vadd.f32 %v8351_v42, %v8133_v7  ;;  %v226_v23 = vadd.f32 %v8351_v42, %v8137_v9  ;;  %v231_v7 = vadd.f32 %v8351_v42, %v8159_v22 }
 0x46e   :  { %v233_v9 = vadd.f32 %v8351_v42, %v8167_v26 }
 0x46f   :  { %v1003_v39 = vmul.f32 1.442695, %v1000_v38 }
 0x470   :  { %v995_v27 = vpop.xlane.xlu0 %994 }
 0x471   :  { %v999_v10 = vsub.f32 %v8277_v46, %v995_v27  ;;  %v225_v46 = vadd.f32 %v8351_v42, %v8135_v8  ;;  %7810 = vpow2.f32 %v1003_v39  ;;  %v232_v8 = vadd.f32 %v8351_v42, %v8165_v25 }
 0x473   :  { %v1001_v40 = vmul.f32 1.442695, %v999_v10 }
 0x475   :  { %7812 = vpow2.f32 %v1001_v40 }
 0x4ca   :  { %v677_v56 = vpop.xlane.xlu1 %676 }
 0x4cb   :  { %7814 = vrcp.f32 %v677_v56 }
 0x4cc   :  { %v674_v41 = vpop.xlane.xlu0 %673 }
 0x4cd   :  { %7816 = vrcp.f32 %v674_v41 }
 0x4d0   :  { %v8331_v14 = vpop.permute.xlu0 %1013 }
 0x4d1   :  { %7487 = vmatprep.subr.mxu1 %v8331_v14 }
 0x4f6   :  { %v7460_v24 = vpop.f32.mrf.mxu1 }
 0x4f7   :  { %v530_v27 = vrot.slane %v7460_v24, 1  ;;  %v531_v21 = vrot.slane %v7460_v24, 2  ;;  %v532_v57 = vrot.slane %v7460_v24, 3  ;;  %v533_v59 = vrot.slane %v7460_v24, 4 }
 0x4f8   :  { %v534_v22 = vrot.slane %v7460_v24, 5  ;;  %v8385_v61 = vadd.f32 %v7460_v24, %v228_v4  ;;  %v512_v25 = vpop.f32.mrf.mxu1  ;;  %v535_v62 = vrot.slane %v7460_v24, 6  ;;  %v536_v12 = vrot.slane %v7460_v24, 7 }
 0x4f9   :  { %v8387_v13 = vadd.f32 %v530_v27, %v229_v5  ;;  %v8389_v26 = vadd.f32 %v531_v21, %v230_v6  ;;  %v8391_v28 = vadd.f32 %v532_v57, %v231_v7  ;;  %v8393_v15 = vadd.f32 %v533_v59, %v232_v8  ;;  %v1012_v8 = vpop.permute.xlu1 %1011 }
 0x4fa   :  { %v523_v33 = vrot.slane %v512_v25, 1  ;;  %v524_v41 = vrot.slane %v512_v25, 2  ;;  %v525_v16 = vrot.slane %v512_v25, 3  ;;  %v526_v17 = vrot.slane %v512_v25, 4 }
 0x4fb   :  { %v527_v19 = vrot.slane %v512_v25, 5  ;;  %v8395_v29 = vadd.f32 %v512_v25, %v220_v43  ;;  %v528_v30 = vrot.slane %v512_v25, 6  ;;  %v529_v31 = vrot.slane %v512_v25, 7  ;;  %v7811_v43 = vpop.eup %7810 }
 0x4fc   :  { %v8397_v32 = vadd.f32 %v523_v33, %v221_v45  ;;  %v8399_v34 = vadd.f32 %v524_v41, %v222_v47  ;;  %v8401_v35 = vadd.f32 %v525_v16, %v223_v51  ;;  %v8403_v2 = vadd.f32 %v526_v17, %v224_v44  ;;  %v7813_v47 = vpop.eup %7812 }
 0x4fd   :  { %v8405_v36 = vadd.f32 %v527_v19, %v225_v46  ;;  %v8407_v37 = vadd.f32 %v528_v30, %v226_v23  ;;  %v8409_v38 = vadd.f32 %v529_v31, %v227_v3  ;;  %v8411_v10 = vadd.f32 %v534_v22, %v233_v9  ;;  %v7815_v56 = vpop.eup %7814 }
 0x4fe   :  { %v8413_v39 = vadd.f32 %v535_v62, %v234_v11  ;;  %v8415_v40 = vadd.f32 %v536_v12, %v235_v20  ;;  %v7817_v46 = vpop.eup %7816  ;;  %v1008_v7 = vsel %vm326_vm9, %v7811_v43, 0.0  ;;  %v1005_v9 = vsel %vm326_vm9, %v7813_v47, 0.0 }
 0x500   :  { %v7505_v45 = vpop.f32.mrf.mxu0 }
 0x501   :  { %v1329_v51 = vsel %vm326_vm9, %v7505_v45, -inf }
 0x502   :  { %1330 = vmax.xlane.f32.xlu1 %v1329_v51  ;;  %v1317_v44 = vpop.f32.mrf.mxu0 }
 0x503   :  { %v7474_v4 = vpop.f32.mrf.mxu1  ;;  %v1326_v23 = vsel %vm326_vm9, %v1317_v44, -inf }
 0x504   :  { %1327 = vmax.xlane.f32.xlu0 %v1326_v23  ;;  %v768_v6 = vmul.f32 %v7815_v56, %v7474_v4 }
 0x505   :  { %v756_v3 = vpop.f32.mrf.mxu1 }
 0x506   :  { %v767_v5 = vmul.f32 %v7817_v46, %v756_v3 }
 0x508   :  { %7477 = vmatprep.mubr.msk.f32.mxu1 %vm242_vm8, %v767_v5  ;;  %1009 = vadd.xlane.f32.xlu0 %v1008_v7 }
 0x509   :  { %7478 = vmatmul.mubr.msk.f32.vlgmr.msra.gmra.mxu1 %vm242_vm8, %v768_v6 }
 0x50a   :  { %7488 = vmatpush3.msra.mxu1 %v8331_v14  ;;  %7491 = vmatprep.mubr.msk.f32.mxu1 %vm326_vm9, %v7813_v47 }
 0x50b   :  { %7489 = vmatprep.subr.mxu1 %v1012_v8 }
 0x50c   :  { %7490 = vmatpush3.msra.mxu1 %v1012_v8 }
 0x50d   :  { %7492 = vmatmul.mubr.msk.f32.vlgmr.msra.gmra.mxu1 %vm326_vm9, %v7811_v43 }
 0x511   :  { %v7528_v62 = vpop.f32.mrf.mxu0 }
 0x512   :  { %v8439_v12 = vadd.f32 %v7528_v62, %v8196_v48 }
 0x513   :  { %1346 = vrot.lane.b32.xlu1 %v8199_v50, %s8082_s11  ;;  %v1980_v33 = vpop.f32.mrf.mxu0 }
 0x514   :  { %v8444_v41 = vadd.f32 %v8196_v48, %v1980_v33 }
 0x51e   :  { %1103 = vrot.lane.b32.xlu0 %v8118_v1, %s8078_s7 }
 0x537   :  { %1006 = vadd.xlane.f32.xlu1 %v1005_v9 }
 0x548   :  { %1344 = vrot.lane.b32.xlu1 %v8202_v52, %s8082_s11 }
 0x58b   :  { %v1331_v14 = vpop.xlane.xlu1 %1330 }
 0x58c   :  { %v1333_v11 = vsub.f32 %v7505_v45, %v1331_v14 }
 0x58d   :  { %v1328_v20 = vpop.xlane.xlu0 %1327 }
 0x58e   :  { %v1336_v24 = vmul.f32 1.442695, %v1333_v11  ;;  %v1332_v27 = vsub.f32 %v1317_v44, %v1328_v20 }
 0x58f   :  { %v1347_v1 = vpop.permute.xlu1 %1346 }
 0x590   :  { %7818 = vpow2.f32 %v1336_v24  ;;  %v1334_v21 = vmul.f32 1.442695, %v1332_v27 }
 0x591   :  { %v1010_v57 = vpop.xlane.xlu0 %1009 }
 0x592   :  { %7820 = vpow2.f32 %v1334_v21 }
 0x593   :  { %7822 = vrcp.f32 %v1010_v57 }
 0x595   :  { %v8432_v59 = vpop.permute.xlu0 %1103 }
 0x596   :  { %10374 = vst [vmem:[#allocation12_spill] sm:$0xff] %v8432_v59  ;;  %7494 = vmatprep.subr.mxu1 %v8432_v59 }
 0x597   :  { %7495 = vmatpush3.msra.mxu1 %v8432_v59 }
 0x598   :  { %7506 = vmatprep.subr.mxu1 %v1347_v1 }
 0x59d   :  { %v7819_v50 = vpop.eup %7818 }
 0x59e   :  { %v1341_v52 = vsel %vm326_vm9, %v7819_v50, 0.0 }
 0x59f   :  { %v7821_v22 = vpop.eup %7820  ;;  %1342 = vadd.xlane.f32.xlu1 %v1341_v52 }
 0x5a0   :  { %v1338_v25 = vsel %vm326_vm9, %v7821_v22, 0.0  ;;  %v7823_v23 = vpop.eup %7822 }
 0x5a1   :  { %1339 = vadd.xlane.f32.xlu0 %v1338_v25 }
 0x5b0   :  { %2009 = vrot.lane.b32.xlu1 %v8439_v12, %s8072_s0 }
 0x5b4   :  { %2112 = vrot.lane.b32.xlu1 %v8444_v41, %s8069_s22 }
 0x5b7   :  { %1436 = vrot.lane.b32.xlu0 %v8116_v0, %s8078_s7 }
 0x5bb   :  { %2007 = vrot.lane.b32.xlu0 %v8444_v41, %s8072_s0 }
 0x5c0   :  { %v1007_v16 = vpop.xlane.xlu1 %1006 }
 0x5c1   :  { %7824 = vrcp.f32 %v1007_v16 }
 0x5c9   :  { %v7479_v17 = vpop.f32.mrf.mxu1 }
 0x5ca   :  { %v863_v19 = vrot.slane %v7479_v17, 1  ;;  %v864_v30 = vrot.slane %v7479_v17, 2  ;;  %v865_v31 = vrot.slane %v7479_v17, 3  ;;  %v866_v43 = vrot.slane %v7479_v17, 4 }
 0x5cb   :  { %v894_v48 = vadd.f32 %v7479_v17, %v8385_v61  ;;  %v845_v45 = vpop.f32.mrf.mxu1  ;;  %v867_v47 = vrot.slane %v7479_v17, 5  ;;  %v868_v51 = vrot.slane %v7479_v17, 6  ;;  %v869_v56 = vrot.slane %v7479_v17, 7 }
 0x5cc   :  { %v895_v44 = vadd.f32 %v863_v19, %v8387_v13  ;;  %v896_v0 = vadd.f32 %v864_v30, %v8389_v26  ;;  %v8456_v46 = vadd.f32 %v865_v31, %v8391_v28  ;;  %v856_v4 = vrot.slane %v845_v45, 1 }
 0x5cd   :  { %v857_v3 = vrot.slane %v845_v45, 2  ;;  %v858_v5 = vrot.slane %v845_v45, 3  ;;  %v859_v6 = vrot.slane %v845_v45, 4  ;;  %v886_v7 = vadd.f32 %v845_v45, %v8395_v29  ;;  %v7493_v8 = vpop.f32.mrf.mxu1 }
 0x5ce   :  { %v7825_v61 = vpop.eup %7824  ;;  %v887_v9 = vadd.f32 %v856_v4, %v8397_v32  ;;  %v1101_v14 = vmul.f32 %v7823_v23, %v7493_v8  ;;  %v860_v11 = vrot.slane %v845_v45, 5  ;;  %v861_v20 = vrot.slane %v845_v45, 6 }
 0x5cf   :  { %v888_v13 = vadd.f32 %v857_v3, %v8399_v34  ;;  %v889_v26 = vadd.f32 %v858_v5, %v8401_v35  ;;  %v1089_v28 = vpop.f32.mrf.mxu1  ;;  %v862_v24 = vrot.slane %v845_v45, 7  ;;  %v890_v27 = vadd.f32 %v859_v6, %v8403_v2  ;;  %v1345_v35 = vpop.permute.xlu1 %1344 }
 0x5d0   :  { %v1100_v21 = vmul.f32 %v7825_v61, %v1089_v28  ;;  %v891_v57 = vadd.f32 %v860_v11, %v8405_v36  ;;  %v892_v29 = vadd.f32 %v861_v20, %v8407_v37  ;;  %v898_v52 = vadd.f32 %v866_v43, %v8393_v15 }
 0x5d1   :  { %v893_v32 = vadd.f32 %v862_v24, %v8409_v38  ;;  %v899_v25 = vadd.f32 %v867_v47, %v8411_v10  ;;  %v900_v62 = vadd.f32 %v868_v51, %v8413_v39  ;;  %v901_v34 = vadd.f32 %v869_v56, %v8415_v40 }
 0x5d2   :  { %7496 = vmatprep.mubr.msk.f32.mxu1 %vm242_vm8, %v1100_v21 }
 0x5d3   :  { %7497 = vmatmul.mubr.msk.f32.vlgmr.msra.gmra.mxu1 %vm242_vm8, %v1101_v14 }
 0x5d4   :  { %7507 = vmatpush3.msra.mxu1 %v1347_v1  ;;  %7510 = vmatprep.mubr.msk.f32.mxu1 %vm326_vm9, %v7821_v22 }
 0x5d5   :  { %7508 = vmatprep.subr.mxu1 %v1345_v35 }
 0x5d6   :  { %7509 = vmatpush3.msra.mxu1 %v1345_v35 }
 0x5d7   :  { %7511 = vmatmul.mubr.msk.f32.vlgmr.msra.gmra.mxu1 %vm326_vm9, %v7819_v50 }
 0x628   :  { %v1343_v2 = vpop.xlane.xlu1 %1342 }
 0x629   :  { %7826 = vrcp.f32 %v1343_v2 }
 0x62a   :  { %v1340_v15 = vpop.xlane.xlu0 %1339 }
 0x62b   :  { %7828 = vrcp.f32 %v1340_v15 }
 0x62c   :  { %v2010_v37 = vpop.permute.xlu1 %2009 }
 0x62e   :  { %v8474_v36 = vpop.permute.xlu0 %1436 }
 0x62f   :  { %7513 = vmatprep.subr.mxu1 %v8474_v36 }
 0x630   :  { %7514 = vmatpush3.msra.mxu1 %v8474_v36 }
 0x631   :  { %7529 = vmatprep.subr.msk.mxu1 %vm242_vm8, %v2010_v37 }
 0x636   :  { %v7827_v45 = vpop.eup %7826 }
 0x638   :  { %v7829_v61 = vpop.eup %7828 }
 0x693   :  { %v7498_v38 = vpop.f32.mrf.mxu1 }
 0x694   :  { %v1196_v10 = vrot.slane %v7498_v38, 1  ;;  %v1197_v39 = vrot.slane %v7498_v38, 2  ;;  %v1198_v40 = vrot.slane %v7498_v38, 3  ;;  %v1199_v1 = vrot.slane %v7498_v38, 4 }
 0x695   :  { %v1227_v22 = vadd.f32 %v7498_v38, %v894_v48  ;;  %v1178_v50 = vpop.f32.mrf.mxu1  ;;  %v1200_v33 = vrot.slane %v7498_v38, 5  ;;  %v1201_v16 = vrot.slane %v7498_v38, 6  ;;  %v1202_v17 = vrot.slane %v7498_v38, 7 }
 0x696   :  { %v1228_v19 = vadd.f32 %v1196_v10, %v895_v44  ;;  %v1229_v30 = vadd.f32 %v1197_v39, %v896_v0  ;;  %v1189_v31 = vrot.slane %v1178_v50, 1  ;;  %v1190_v43 = vrot.slane %v1178_v50, 2 }
 0x697   :  { %v1191_v47 = vrot.slane %v1178_v50, 3  ;;  %v1192_v51 = vrot.slane %v1178_v50, 4  ;;  %v1219_v56 = vadd.f32 %v1178_v50, %v886_v7  ;;  %v7512_v4 = vpop.f32.mrf.mxu1  ;;  %v1193_v23 = vrot.slane %v1178_v50, 5 }
 0x698   :  { %v1220_v3 = vadd.f32 %v1189_v31, %v887_v9  ;;  %v1221_v5 = vadd.f32 %v1190_v43, %v888_v13  ;;  %v1434_v6 = vmul.f32 %v7827_v45, %v7512_v4  ;;  %v1194_v8 = vrot.slane %v1178_v50, 6  ;;  %v2008_v9 = vpop.permute.xlu0 %2007 }
 0x699   :  { %v1422_v48 = vpop.f32.mrf.mxu1  ;;  %v1195_v14 = vrot.slane %v1178_v50, 7  ;;  %v1222_v11 = vadd.f32 %v1191_v47, %v889_v26  ;;  %v1223_v20 = vadd.f32 %v1192_v51, %v890_v27  ;;  %v1224_v28 = vadd.f32 %v1193_v23, %v891_v57 }
 0x69a   :  { %v1433_v44 = vmul.f32 %v7829_v61, %v1422_v48  ;;  %v1225_v0 = vadd.f32 %v1194_v8, %v892_v29  ;;  %v1230_v24 = vadd.f32 %v1198_v40, %v8456_v46  ;;  %v1231_v21 = vadd.f32 %v1199_v1, %v898_v52  ;;  %v2113_v61 = vpop.permute.xlu1 %2112 }
 0x69b   :  { %v1226_v35 = vadd.f32 %v1195_v14, %v893_v32  ;;  %v1232_v15 = vadd.f32 %v1200_v33, %v899_v25  ;;  %v1233_v7 = vadd.f32 %v1201_v16, %v900_v62  ;;  %v1234_v2 = vadd.f32 %v1202_v17, %v901_v34 }
 0x69c   :  { %7515 = vmatprep.mubr.msk.f32.mxu1 %vm242_vm8, %v1433_v44 }
 0x69d   :  { %7516 = vmatmul.mubr.msk.f32.vlgmr.msra.gmra.mxu1 %vm242_vm8, %v1434_v6 }
 0x69e   :  { %7530 = vmatpush3.xpose.msk.msra.mxu1 %vm242_vm8, %v2010_v37  ;;  %7533 = vmatprep.mubr.msk.f32.mxu1 %vm242_vm8, %v8444_v41 }
 0x69f   :  { %7531 = vmatprep.subr.msk.mxu1 %vm242_vm8, %v2008_v9 }
 0x6a2   :  { %7532 = vmatpush3.xpose.msk.msra.mxu1 %vm242_vm8, %v2008_v9 }
 0x6a3   :  { %7543 = vmatprep.subr.mxu1 %v8281_v60 }
 0x6a5   :  { %7534 = vmatmul.mubr.msk.f32.vlgmr.msra.gmra.mxu1 %vm242_vm8, %v8439_v12 }
 0x6a6   :  { %7544 = vmatpush3.msra.mxu1 %v8281_v60 }
 0x75d   :  { %v7517_v46 = vpop.f32.mrf.mxu1 }
 0x75e   :  { %v1529_v13 = vrot.slane %v7517_v46, 1  ;;  %v1530_v26 = vrot.slane %v7517_v46, 2  ;;  %v1531_v27 = vrot.slane %v7517_v46, 3  ;;  %v8491_v57 = vadd.f32 %v7517_v46, %v1227_v22 }
 0x75f   :  { %v1511_v29 = vpop.f32.mrf.mxu1  ;;  %v1532_v52 = vrot.slane %v7517_v46, 4  ;;  %v1533_v32 = vrot.slane %v7517_v46, 5  ;;  %v1534_v25 = vrot.slane %v7517_v46, 6  ;;  %v1535_v62 = vrot.slane %v7517_v46, 7 }
 0x760   :  { %10375 = vst [vmem:[#allocation13_spill] sm:$0xff] %v8491_v57  ;;  %v8493_v34 = vadd.f32 %v1529_v13, %v1228_v19  ;;  %v1522_v37 = vrot.slane %v1511_v29, 1  ;;  %v1523_v38 = vrot.slane %v1511_v29, 2  ;;  %v1524_v10 = vrot.slane %v1511_v29, 3 }
 0x761   :  { %v8495_v39 = vadd.f32 %v1511_v29, %v1219_v56  ;;  %v1525_v40 = vrot.slane %v1511_v29, 4  ;;  %v1526_v1 = vrot.slane %v1511_v29, 5  ;;  %v1527_v50 = vrot.slane %v1511_v29, 6 }
 0x762   :  { %10376 = vst [vmem:[#allocation14_spill] sm:$0xff] %v8493_v34  ;;  %v8497_v33 = vadd.f32 %v1522_v37, %v1220_v3  ;;  %v1528_v16 = vrot.slane %v1511_v29, 7  ;;  %v8499_v22 = vadd.f32 %v1523_v38, %v1221_v5  ;;  %v8501_v17 = vadd.f32 %v1524_v10, %v1222_v11 }
 0x763   :  { %10377 = vst [vmem:[#allocation15_spill] sm:$0xff] %v8495_v39  ;;  %v8503_v31 = vadd.f32 %v1525_v40, %v1223_v20  ;;  %v8505_v43 = vadd.f32 %v1526_v1, %v1224_v28  ;;  %v8507_v19 = vadd.f32 %v1527_v50, %v1225_v0  ;;  %v8509_v45 = vadd.f32 %v1530_v26, %v1229_v30 }
 0x764   :  { %10378 = vst [vmem:[#allocation16_spill] sm:$0xff] %v8497_v33  ;;  %10379 = vst [vmem:[#allocation17_spill] sm:$0xff] %v8499_v22  ;;  %v8511_v47 = vadd.f32 %v1528_v16, %v1226_v35  ;;  %v8513_v56 = vadd.f32 %v1531_v27, %v1230_v24  ;;  %v8516_v23 = vadd.f32 %v1532_v52, %v1231_v21 }
 0x765   :  { %10380 = vst [vmem:[#allocation18_spill] sm:$0xff] %v8501_v17  ;;  %10381 = vst [vmem:[#allocation19_spill] sm:$0xff] %v8503_v31  ;;  %v7535_v51 = vpop.f32.mrf.mxu1  ;;  %v8518_v5 = vadd.f32 %v1533_v32, %v1232_v15  ;;  %v8520_v6 = vadd.f32 %v1534_v25, %v1233_v7  ;;  %v8522_v8 = vadd.f32 %v1535_v62, %v1234_v2 }
 0x766   :  { %10382 = vst [vmem:[#allocation20_spill] sm:$0xff] %v8505_v43  ;;  %10383 = vst [vmem:[#allocation21_spill] sm:$0xff] %v8507_v19  ;;  %v2097_v4 = vsel %vm326_vm9, %v7535_v51, -inf }
 0x767   :  { %10384 = vst [vmem:[#allocation22_spill] sm:$0xff] %v8509_v45  ;;  %10385 = vst [vmem:[#allocation23_spill] sm:$0xff] %v8511_v47  ;;  %2098 = vmax.xlane.f32.xlu0 %v2097_v4  ;;  %v2085_v3 = vpop.f32.mrf.mxu1 }
 0x768   :  { %10386 = vst [vmem:[#allocation24_spill] sm:$0xff] %v8513_v56  ;;  %10387 = vst [vmem:[#allocation25_spill] sm:$0xff] %v8516_v23  ;;  %v2094_v30 = vsel %vm326_vm9, %v2085_v3, -inf }
 0x769   :  { %10388 = vst [vmem:[#allocation26_spill] sm:$0xff] %v8518_v5  ;;  %10389 = vst [vmem:[#allocation27_spill] sm:$0xff] %v8520_v6  ;;  %2095 = vmax.xlane.f32.xlu1 %v2094_v30 }
 0x76a   :  { %10390 = vst [vmem:[#allocation28_spill] sm:$0xff] %v8522_v8 }
 0x77a   :  { %2338 = vrot.lane.b32.xlu1 %v8439_v12, %s8073_s2 }
 0x77d   :  { %2114 = vrot.lane.b32.xlu0 %v8439_v12, %s8069_s22 }
 0x77e   :  { %2332 = vrot.lane.b32.xlu1 %v8444_v41, %s8074_s30 }
 0x781   :  { %2336 = vrot.lane.b32.xlu0 %v8444_v41, %s8073_s2 }
 0x782   :  { %2667 = vrot.lane.b32.xlu1 %v8439_v12, %s8075_s4 }
 0x785   :  { %2334 = vrot.lane.b32.xlu0 %v8439_v12, %s8074_s30 }
 0x786   :  { %2661 = vrot.lane.b32.xlu1 %v8444_v41, %s8076_s5 }
 0x789   :  { %2665 = vrot.lane.b32.xlu0 %v8444_v41, %s8075_s4 }
 0x78d   :  { %2663 = vrot.lane.b32.xlu0 %v8439_v12, %s8076_s5 }
 0x7f0   :  { %v2099_v48 = vpop.xlane.xlu0 %2098 }
 0x7f1   :  { %v2101_v14 = vsub.f32 %v7535_v51, %v2099_v48 }
 0x7f2   :  { %v2096_v11 = vpop.xlane.xlu1 %2095 }
 0x7f3   :  { %v2104_v20 = vmul.f32 1.442695, %v2101_v14  ;;  %v2100_v28 = vsub.f32 %v2085_v3, %v2096_v11 }
 0x7f4   :  { %v2115_v44 = vpop.permute.xlu0 %2114 }
 0x7f5   :  { %7830 = vpow2.f32 %v2104_v20  ;;  %v2102_v0 = vmul.f32 1.442695, %v2100_v28  ;;  %7536 = vmatprep.subr.mxu0 %v2115_v44 }
 0x7f6   :  { %7537 = vmatpush3.msra.mxu0 %v2115_v44  ;;  %v2339_v24 = vpop.permute.xlu1 %2338 }
 0x7f7   :  { %7832 = vpow2.f32 %v2102_v0  ;;  %7538 = vmatprep.subr.mxu0 %v2113_v61 }
 0x7f8   :  { %7539 = vmatpush3.msra.mxu0 %v2113_v61  ;;  %v2337_v15 = vpop.permute.xlu0 %2336 }
 0x7f9   :  { %7548 = vmatprep.subr.msk.mxu0 %vm242_vm8, %v2339_v24 }
 0x7fa   :  { %v2333_v35 = vpop.permute.xlu1 %2332 }
 0x7fc   :  { %v2335_v13 = vpop.permute.xlu0 %2334 }
 0x7fe   :  { %v2668_v46 = vpop.permute.xlu1 %2667 }
 0x800   :  { %v2666_v27 = vpop.permute.xlu0 %2665 }
 0x802   :  { %v7831_v21 = vpop.eup %7830  ;;  %v2662_v26 = vpop.permute.xlu1 %2661 }
 0x803   :  { %v2109_v7 = vsel %vm326_vm9, %v7831_v21, 0.0 }
 0x804   :  { %v7833_v2 = vpop.eup %7832  ;;  %2110 = vadd.xlane.f32.xlu0 %v2109_v7  ;;  %v2664_v29 = vpop.permute.xlu0 %2663  ;;  %v8589_v7 = vld [vmem:[#allocation5 + $0x18] sm:$0xff] }
 0x805   :  { %7540 = vmatprep.mubr.msk.f32.mxu0 %vm326_vm9, %v7833_v2  ;;  %v2106_v9 = vsel %vm326_vm9, %v7833_v2, 0.0 }
 0x806   :  { %7541 = vmatmul.mubr.msk.f32.vlgmr.msra.gmra.mxu0 %vm326_vm9, %v7831_v21  ;;  %2107 = vadd.xlane.f32.xlu1 %v2106_v9 }
 0x807   :  { %7549 = vmatpush3.xpose.msk.msra.mxu0 %vm242_vm8, %v2339_v24  ;;  %7552 = vmatprep.mubr.msk.f32.mxu0 %vm242_vm8, %v2333_v35 }
 0x808   :  { %7550 = vmatprep.subr.msk.mxu0 %vm242_vm8, %v2337_v15 }
 0x80b   :  { %7551 = vmatpush3.xpose.msk.msra.mxu0 %vm242_vm8, %v2337_v15 }
 0x80c   :  { %7567 = vmatprep.subr.msk.mxu0 %vm242_vm8, %v2668_v46 }
 0x80e   :  { %7553 = vmatmul.mubr.msk.f32.vlgmr.msra.gmra.mxu0 %vm242_vm8, %v2335_v13  ;;  %v8595_v13 = vld [vmem:[#allocation5 + $0x10] sm:$0xff] }
 0x80f   :  { %7568 = vmatpush3.xpose.msk.msra.mxu0 %vm242_vm8, %v2668_v46  ;;  %7571 = vmatprep.mubr.msk.f32.mxu0 %vm242_vm8, %v2662_v26 }
 0x810   :  { %7569 = vmatprep.subr.msk.mxu0 %vm242_vm8, %v2666_v27 }
 0x813   :  { %7570 = vmatpush3.xpose.msk.msra.mxu0 %vm242_vm8, %v2666_v27 }
 0x816   :  { %7572 = vmatmul.mubr.msk.f32.vlgmr.msra.gmra.mxu0 %vm242_vm8, %v2664_v29  ;;  %v8601_v29 = vld [vmem:[#allocation5 + $0x8] sm:$0xff] }
 0x88d   :  { %v2111_v32 = vpop.xlane.xlu0 %2110 }
 0x88f   :  { %v2108_v52 = vpop.xlane.xlu1 %2107 }
 0x890   :  { %7834 = vrcp.f32 %v2108_v52  ;;  %v8607_v52 = vld [vmem:[#allocation5] sm:$0xff] }
 0x891   :  { %7836 = vrcp.f32 %v2111_v32  ;;  %v1999_v32 = vadd.f32 %v8351_v42, %v8313_v49 }
 0x89d   :  { %v7835_v62 = vpop.eup %7834 }
 0x89e   :  { %v7837_v38 = vpop.eup %7836 }
 0x8c6   :  { %v7542_v25 = vpop.f32.mrf.mxu0 }
 0x8c7   :  { %v2202_v40 = vmul.f32 %v7837_v38, %v7542_v25  ;;  %v2000_v25 = vadd.f32 %v8351_v42, %v8316_v53 }
 0x8c8   :  { %v2190_v37 = vpop.f32.mrf.mxu0 }
 0x8c9   :  { %v2201_v10 = vmul.f32 %v7835_v62, %v2190_v37  ;;  %v2001_v62 = vadd.f32 %v8351_v42, %v8318_v54  ;;  %v2003_v54 = vadd.f32 %v8351_v42, %v8323_v58  ;;  %v3597_v58 = vld [vmem:[#allocation2 + $0x1a] sm:$0x1] }
 0x8cb   :  { %7545 = vmatprep.mubr.msk.f32.mxu1 %vm242_vm8, %v2201_v10 }
 0x8cc   :  { %7546 = vmatmul.mubr.msk.f32.vlgmr.msra.gmra.mxu1 %vm242_vm8, %v2202_v40 }
 0x8ce   :  { %v7554_v1 = vpop.f32.mrf.mxu0 }
 0x8cf   :  { %v2426_v50 = vsel %vm326_vm9, %v7554_v1, -inf }
 0x8d0   :  { %2427 = vmax.xlane.f32.xlu1 %v2426_v50  ;;  %v2414_v16 = vpop.f32.mrf.mxu0 }
 0x8d1   :  { %v2423_v51 = vsel %vm326_vm9, %v2414_v16, -inf }
 0x8d2   :  { %2424 = vmax.xlane.f32.xlu0 %v2423_v51  ;;  %v2004_v51 = vadd.f32 %v8351_v42, %v8327_v63  ;;  %v3598_v63 = vld [vmem:[#allocation2 + $0x1e] sm:$0x1] }
 0x8d6   :  { %v8575_v4 = vpop.f32.mrf.mxu0 }
 0x8d7   :  { %v2755_v30 = vsel %vm326_vm9, %v8575_v4, -inf }
 0x8d8   :  { %v8577_v3 = vpop.f32.mrf.mxu0 }
 0x8d9   :  { %v2752_v61 = vsel %vm326_vm9, %v8577_v3, -inf }
 0x8e1   :  { %2441 = vrot.lane.b32.xlu1 %v8444_v41, %s8077_s6 }
 0x8e5   :  { %2996 = vrot.lane.b32.xlu1 %v8439_v12, %s8079_s8 }
 0x8e8   :  { %2443 = vrot.lane.b32.xlu0 %v8439_v12, %s8077_s6 }
 0x8e9   :  { %2990 = vrot.lane.b32.xlu1 %v8444_v41, %s8080_s9 }
 0x8ec   :  { %2994 = vrot.lane.b32.xlu0 %v8444_v41, %s8079_s8 }
 0x8f0   :  { %2992 = vrot.lane.b32.xlu0 %v8439_v12, %s8080_s9 }
 0x90d   :  { %2756 = vmax.xlane.f32.xlu1 %v2755_v30 }
 0x90f   :  { %2753 = vmax.xlane.f32.xlu0 %v2752_v61 }
 0x959   :  { %v2428_v48 = vpop.xlane.xlu1 %2427 }
 0x95a   :  { %v2430_v14 = vsub.f32 %v7554_v1, %v2428_v48  ;;  %v2002_v1 = vadd.f32 %v8351_v42, %v8320_v55 }
 0x95b   :  { %v2425_v11 = vpop.xlane.xlu0 %2424 }
 0x95c   :  { %v2433_v20 = vmul.f32 1.442695, %v2430_v14  ;;  %v2429_v28 = vsub.f32 %v2414_v16, %v2425_v11  ;;  %v3591_v11 = vld [vmem:[#allocation2 + $0x2] sm:$0x1] }
 0x95d   :  { %v2442_v44 = vpop.permute.xlu1 %2441 }
 0x95e   :  { %7838 = vpow2.f32 %v2433_v20  ;;  %v2431_v0 = vmul.f32 1.442695, %v2429_v28  ;;  %v3592_v20 = vld [vmem:[#allocation2 + $0x6] sm:$0x1]  ;;  %v3593_v28 = vld [vmem:[#allocation2 + $0xa] sm:$0x1] }
 0x95f   :  { %v2444_v24 = vpop.permute.xlu0 %2443 }
 0x960   :  { %7840 = vpow2.f32 %v2431_v0  ;;  %7555 = vmatprep.subr.mxu1 %v2444_v24  ;;  %v3595_v0 = vld [vmem:[#allocation2 + $0x12] sm:$0x1] }
 0x961   :  { %7556 = vmatpush3.msra.mxu1 %v2444_v24  ;;  %v2997_v21 = vpop.permute.xlu1 %2996  ;;  %v3596_v24 = vld [vmem:[#allocation2 + $0x16] sm:$0x1] }
 0x962   :  { %7557 = vmatprep.subr.mxu1 %v2442_v44  ;;  %7586 = vmatprep.subr.msk.mxu0 %vm242_vm8, %v2997_v21 }
 0x963   :  { %v2995_v35 = vpop.permute.xlu0 %2994  ;;  %7558 = vmatpush3.msra.mxu1 %v2442_v44  ;;  %7587 = vmatpush3.xpose.msk.msra.mxu0 %vm242_vm8, %v2997_v21  ;;  %v3594_v44 = vld [vmem:[#allocation2 + $0xe] sm:$0x1]  ;;  %v3623_v21 = vrot.slane %v3592_v20, 7 }
 0x964   :  { %7562 = vmatprep.subr.mxu1 %v8294_v18  ;;  %7588 = vmatprep.subr.msk.mxu0 %vm242_vm8, %v2995_v35  ;;  %v3627_v42 = vrot.slane %v3594_v44, 5 }
 0x965   :  { %v2991_v15 = vpop.permute.xlu1 %2990 }
 0x966   :  { %7590 = vmatprep.mubr.msk.f32.mxu0 %vm242_vm8, %v2991_v15  ;;  %v3629_v15 = vrot.slane %v3595_v0, 4 }
 0x967   :  { %7589 = vmatpush3.xpose.msk.msra.mxu0 %vm242_vm8, %v2995_v35  ;;  %v2993_v2 = vpop.permute.xlu0 %2992  ;;  %v3625_v35 = vrot.slane %v3593_v28, 6 }
 0x968   :  { %7605 = vmatprep.subr.mxu0 %v8589_v7 }
 0x96a   :  { %7591 = vmatmul.mubr.msk.f32.vlgmr.msra.gmra.mxu0 %vm242_vm8, %v2993_v2  ;;  %v3631_v2 = vrot.slane %v3596_v24, 3 }
 0x96b   :  { %v7839_v9 = vpop.eup %7838  ;;  %7606 = vmatpush3.msra.mxu0 %v8589_v7 }
 0x96c   :  { %v2438_v46 = vsel %vm326_vm9, %v7839_v9, 0.0  ;;  %7607 = vmatprep.subr.mxu0 %v8595_v13 }
 0x96d   :  { %v7841_v26 = vpop.eup %7840  ;;  %2439 = vadd.xlane.f32.xlu0 %v2438_v46  ;;  %7608 = vmatpush3.msra.mxu0 %v8595_v13  ;;  %v3624_v46 = vsel %vm102_vm0, %v3623_v21, %v3591_v11 }
 0x96e   :  { %7559 = vmatprep.mubr.msk.f32.mxu1 %vm326_vm9, %v7841_v26  ;;  %v2435_v27 = vsel %vm326_vm9, %v7841_v26, 0.0  ;;  %7609 = vmatprep.subr.mxu0 %v8601_v29  ;;  %v3599_v26 = vld [vmem:[#allocation2 + $0x22] sm:$0x1] }
 0x96f   :  { %2436 = vadd.xlane.f32.xlu1 %v2435_v27  ;;  %7560 = vmatmul.mubr.msk.f32.vlgmr.msra.gmra.mxu1 %vm326_vm9, %v7839_v9  ;;  %v3633_v9 = vrot.slane %v3597_v58, 2  ;;  %v3600_v27 = vld [vmem:[#allocation2 + $0x26] sm:$0x1] }
 0x970   :  { %7563 = vmatpush3.msra.mxu1 %v8294_v18  ;;  %7610 = vmatpush3.msra.mxu0 %v8601_v29 }
 0x971   :  { %7611 = vmatprep.subr.mxu0 %v8607_v52 }
 0x972   :  { %7612 = vmatpush3.msra.mxu0 %v8607_v52 }
 0x980   :  { %2770 = vrot.lane.b32.xlu1 %v8444_v41, %s8081_s10 }
 0x983   :  { %2772 = vrot.lane.b32.xlu0 %v8439_v12, %s8081_s10 }
 0x98c   :  { %v8621_v37 = vpop.f32.mrf.mxu1 }
 0x98d   :  { %v2294_v38 = vrot.slane %v8621_v37, 2  ;;  %v2295_v10 = vrot.slane %v8621_v37, 3  ;;  %v2296_v40 = vrot.slane %v8621_v37, 4  ;;  %v2297_v50 = vrot.slane %v8621_v37, 5 }
 0x98e   :  { %v2298_v30 = vrot.slane %v8621_v37, 6  ;;  %v2299_v61 = vrot.slane %v8621_v37, 7 }
 0x98f   :  { %v8629_v49 = vadd.f32 %v2294_v38, %v1999_v32  ;;  %v8631_v16 = vadd.f32 %v2295_v10, %v2000_v25  ;;  %v8633_v53 = vadd.f32 %v2296_v40, %v2001_v62  ;;  %v8641_v48 = vadd.f32 %v2297_v50, %v2002_v1  ;;  %v8648_v32 = vld [vmem:[#allocation2 + $0x2a] sm:$0x1]  ;;  %v8651_v62 = vld [vmem:[#allocation2 + $0x2e] sm:$0x1]  ;;  %v8653_v38 = vld [vmem:[#allocation2 + $0x32] sm:$0x1] }
 0x990   :  { %v8643_v55 = vadd.f32 %v2298_v30, %v2003_v54  ;;  %v8645_v14 = vadd.f32 %v2299_v61, %v2004_v51  ;;  %v3626_v25 = vsel %vm105_vm1, %v3625_v35, %v3624_v46  ;;  %v8655_v10 = vld [vmem:[#allocation2 + $0x36] sm:$0x1]  ;;  %v3635_v1 = vrot.slane %v3598_v63, 1  ;;  %v8658_v50 = vld [vmem:[#allocation2 + $0x3a] sm:$0x1] }
 0x991   :  { %v3628_v40 = vsel %vm108_vm2, %v3627_v42, %v3626_v25  ;;  %v3637_v54 = vrot.slane %v3600_v27, 7  ;;  %v3639_v51 = vrot.slane %v8648_v32, 6  ;;  %v8662_v61 = vld [vmem:[#allocation2 + $0x3e] sm:$0x1]  ;;  %v3641_v11 = vrot.slane %v8651_v62, 5 }
 0x992   :  { %v3630_v30 = vsel %vm111_vm3, %v3629_v15, %v3628_v40  ;;  %v3643_v20 = vrot.slane %v8653_v38, 4  ;;  %v3645_v0 = vrot.slane %v8655_v10, 3  ;;  %v3647_v21 = vrot.slane %v8658_v50, 2 }
 0x993   :  { %v3632_v28 = vsel %vm114_vm4, %v3631_v2, %v3630_v30  ;;  %v3638_v44 = vsel %vm102_vm0, %v3637_v54, %v3599_v26  ;;  %v3649_v42 = vrot.slane %v8662_v61, 1 }
 0x994   :  { %v3634_v24 = vsel %vm117_vm5, %v3633_v9, %v3632_v28  ;;  %v3640_v58 = vsel %vm105_vm1, %v3639_v51, %v3638_v44 }
 0x995   :  { %v3636_v35 = vsel %vm120_vm6, %v3635_v1, %v3634_v24  ;;  %v3642_v63 = vsel %vm108_vm2, %v3641_v11, %v3640_v58  ;;  %v8684_v24 = vpop.f32.mrf.mxu1 }
 0x996   :  { %7613 = vmatprep.mubr.msk.f32.mxu0 %vm136_vm7, %v3636_v35  ;;  %v3644_v15 = vsel %vm111_vm3, %v3643_v20, %v3642_v63  ;;  %v2757_v40 = vpop.xlane.xlu1 %2756  ;;  %v2292_v8 = vrot.slane %v8684_v24, 7 }
 0x997   :  { %v3646_v2 = vsel %vm114_vm4, %v3645_v0, %v3644_v15  ;;  %v2759_v54 = vsub.f32 %v8575_v4, %v2757_v40 }
 0x998   :  { %v3648_v46 = vsel %vm117_vm5, %v3647_v21, %v3646_v2  ;;  %v2754_v26 = vpop.xlane.xlu0 %2753 }
 0x999   :  { %v3650_v9 = vsel %vm120_vm6, %v3649_v42, %v3648_v46  ;;  %v2758_v1 = vsub.f32 %v8577_v3, %v2754_v26  ;;  %v2762_v30 = vmul.f32 1.442695, %v2759_v54 }
 0x99a   :  { %7614 = vmatmul.mubr.msk.f32.vlgmr.msra.gmra.mxu0 %vm136_vm7, %v3650_v9 }
 0x99b   :  { %v2760_v51 = vmul.f32 1.442695, %v2758_v1 }
 0x99d   :  { %7842 = vpow2.f32 %v2760_v51 }
 0x99e   :  { %7844 = vpow2.f32 %v2762_v30 }
 0x9aa   :  { %v7843_v44 = vpop.eup %7842 }
 0x9ab   :  { %v7845_v3 = vpop.eup %7844  ;;  %v2764_v21 = vsel %vm326_vm9, %v7843_v44, 0.0 }
 0x9ac   :  { %v2767_v42 = vsel %vm326_vm9, %v7845_v3, 0.0 }
 0x9f6   :  { %v2440_v27 = vpop.xlane.xlu0 %2439 }
 0x9f8   :  { %v2437_v11 = vpop.xlane.xlu1 %2436 }
 0x9f9   :  { %7846 = vrcp.f32 %v2437_v11 }
 0x9fa   :  { %v2773_v25 = vpop.permute.xlu0 %2772  ;;  %7848 = vrcp.f32 %v2440_v27 }
 0x9fb   :  { %7574 = vmatprep.subr.mxu1 %v2773_v25 }
 0x9fc   :  { %v2771_v9 = vpop.permute.xlu1 %2770 }
 0xa06   :  { %v7847_v35 = vpop.eup %7846 }
 0xa07   :  { %v7849_v15 = vpop.eup %7848 }
 0xa2a   :  { %v7592_v20 = vpop.f32.mrf.mxu0 }
 0xa2b   :  { %v3084_v28 = vsel %vm326_vm9, %v7592_v20, -inf }
 0xa2c   :  { %3085 = vmax.xlane.f32.xlu1 %v3084_v28  ;;  %v3072_v0 = vpop.f32.mrf.mxu0 }
 0xa2d   :  { %v3081_v58 = vsel %vm326_vm9, %v3072_v0, -inf }
 0xa2e   :  { %3082 = vmax.xlane.f32.xlu0 %v3081_v58 }
 0xa2f   :  { %v7561_v4 = vpop.f32.mrf.mxu1 }
 0xa30   :  { %2765 = vadd.xlane.f32.xlu1 %v2764_v21  ;;  %v2531_v46 = vmul.f32 %v7849_v15, %v7561_v4  ;;  %v7947_v21 = vld [vmem:[#allocation2 + $0x1] sm:$0x1] }
 0xa31   :  { %v2519_v63 = vpop.f32.mrf.mxu1 }
 0xa32   :  { %v2530_v2 = vmul.f32 %v7847_v35, %v2519_v63  ;;  %2768 = vadd.xlane.f32.xlu0 %v2767_v42  ;;  %v8724_v35 = vld [vmem:[#allocation7 + $0x1] ss:$0 sm:$0xff]  ;;  %v7949_v42 = vld [vmem:[#allocation2 + $0x5] sm:$0x1] }
 0xa33   :  { %v1989_v63 = vadd.f32 %v8724_v35, %v7947_v21  ;;  %v1990_v15 = vadd.f32 %v7949_v42, %v8724_v35  ;;  %v2293_v21 = vrot.slane %v8621_v37, 1  ;;  %v7957_v42 = vld [vmem:[#allocation2 + $0x1d] sm:$0x1] }
 0xa34   :  { %7564 = vmatprep.mubr.msk.f32.mxu1 %vm242_vm8, %v2530_v2  ;;  %v7950_v2 = vld [vmem:[#allocation2 + $0x9] sm:$0x1] }
 0xa35   :  { %7565 = vmatmul.mubr.msk.f32.vlgmr.msra.gmra.mxu1 %vm242_vm8, %v2531_v46  ;;  %v1991_v46 = vadd.f32 %v7950_v2, %v8724_v35  ;;  %v1996_v2 = vadd.f32 %v7957_v42, %v8724_v35  ;;  %v2316_v6 = vadd.f32 %v8684_v24, %v1989_v63 }
 0xa36   :  { %7575 = vmatpush3.msra.mxu1 %v2773_v25  ;;  %7578 = vmatprep.mubr.msk.f32.mxu1 %vm326_vm9, %v7843_v44 }
 0xa37   :  { %7576 = vmatprep.subr.mxu1 %v2771_v9  ;;  %v2323_v17 = vadd.f32 %v2292_v8, %v1996_v2 }
 0xa38   :  { %7577 = vmatpush3.msra.mxu1 %v2771_v9  ;;  %v7951_v9 = vld [vmem:[#allocation2 + $0xd] sm:$0x1] }
 0xa39   :  { %7581 = vmatprep.subr.mxu1 %v8432_v59  ;;  %7579 = vmatmul.mubr.msk.f32.vlgmr.msra.gmra.mxu1 %vm326_vm9, %v7845_v3 }
 0xa3a   :  { %7582 = vmatpush3.msra.mxu1 %v8432_v59 }
 0xa41   :  { %3099 = vrot.lane.b32.xlu1 %v8444_v41, %s8082_s11 }
 0xa48   :  { %3101 = vrot.lane.b32.xlu0 %v8439_v12, %s8082_s11 }
 0xab5   :  { %v3086_v26 = vpop.xlane.xlu1 %3085 }
 0xab6   :  { %v3088_v27 = vsub.f32 %v7592_v20, %v3086_v26  ;;  %v7615_v20 = vpop.f32.mrf.mxu0  ;;  %v1992_v26 = vadd.f32 %v7951_v9, %v8724_v35  ;;  %v2286_v9 = vrot.slane %v8684_v24, 1 }
 0xab7   :  { %v3083_v40 = vpop.xlane.xlu0 %3082 }
 0xab8   :  { %v3091_v25 = vmul.f32 1.442695, %v3088_v27  ;;  %v3087_v1 = vsub.f32 %v3072_v0, %v3083_v40  ;;  %v3721_v44 = vpop.f32.mrf.mxu0  ;;  %v8710_v0 = vld [vmem:[#allocation7] ss:$0 sm:$0xff]  ;;  %v7952_v27 = vld [vmem:[#allocation2 + $0x11] sm:$0x1]  ;;  %v2317_v42 = vadd.f32 %v2286_v9, %v1990_v15 }
 0xab9   :  { %10391 = vst [vmem:[#allocation29_spill] sm:$0xff] %v8710_v0  ;;  %v8713_v58 = vadd.f32 %v8710_v0, %v3721_v44  ;;  %v8716_v3 = vadd.f32 %v8710_v0, %v7615_v20  ;;  %v2766_v4 = vpop.xlane.xlu1 %2765  ;;  %v1993_v40 = vadd.f32 %v7952_v27, %v8724_v35  ;;  %v7956_v20 = vld [vmem:[#allocation2 + $0x25] sm:$0x1]  ;;  %v2287_v27 = vrot.slane %v8684_v24, 2 }
 0xaba   :  { %7850 = vpow2.f32 %v3091_v25  ;;  %v3089_v54 = vmul.f32 1.442695, %v3087_v1  ;;  %v7953_v25 = vld [vmem:[#allocation2 + $0x15] sm:$0x1]  ;;  %v1998_v44 = vadd.f32 %v7956_v20, %v8724_v35 }
 0xabb   :  { %v2769_v51 = vpop.xlane.xlu0 %2768  ;;  %v1994_v1 = vadd.f32 %v7953_v25, %v8724_v35  ;;  %v2289_v25 = vrot.slane %v8684_v24, 4  ;;  %v2318_v19 = vadd.f32 %v2287_v27, %v1991_v46 }
 0xabc   :  { %7852 = vpow2.f32 %v3089_v54  ;;  %v7954_v54 = vld [vmem:[#allocation2 + $0x19] sm:$0x1]  ;;  %v2325_v47 = vadd.f32 %v2293_v21, %v1998_v44 }
 0xabd   :  { %7854 = vrcp.f32 %v2769_v51  ;;  %v1995_v51 = vadd.f32 %v7954_v54, %v8724_v35  ;;  %v2290_v54 = vrot.slane %v8684_v24, 5  ;;  %v2320_v43 = vadd.f32 %v2289_v25, %v1993_v40 }
 0xabe   :  { %7856 = vrcp.f32 %v2766_v4  ;;  %v2288_v4 = vrot.slane %v8684_v24, 3 }
 0xabf   :  { %v8699_v30 = vpop.permute.xlu0 %3101  ;;  %v2321_v31 = vadd.f32 %v2290_v54, %v1994_v1 }
 0xac0   :  { %7593 = vmatprep.subr.mxu1 %v8699_v30  ;;  %v2319_v5 = vadd.f32 %v2288_v4, %v1992_v26 }
 0xac7   :  { %v8702_v11 = vpop.eup %7850 }
 0xac8   :  { %v3096_v41 = vsel %vm326_vm9, %v8702_v11, 0.0 }
 0xac9   :  { %v8706_v28 = vpop.eup %7852  ;;  %3097 = vadd.xlane.f32.xlu0 %v3096_v41  ;;  %v7955_v41 = vld [vmem:[#allocation2 + $0x21] sm:$0x1] }
 0xaca   :  { %v3093_v12 = vsel %vm326_vm9, %v8706_v28, 0.0  ;;  %v7855_v46 = vpop.eup %7854 }
 0xacb   :  { %3094 = vadd.xlane.f32.xlu1 %v3093_v12  ;;  %v1997_v12 = vadd.f32 %v7955_v41, %v8724_v35  ;;  %v2291_v41 = vrot.slane %v8684_v24, 6  ;;  %v7857_v27 = vpop.eup %7856 }
 0xacd   :  { %v2324_v20 = vadd.f32 %v8621_v37, %v1997_v12  ;;  %v2322_v56 = vadd.f32 %v2291_v41, %v1995_v51 }
 0xadc   :  { %3748 = vrot.lane.b32.xlu1 %v8713_v58, %s8072_s0 }
 0xadf   :  { %3750 = vrot.lane.b32.xlu0 %v8716_v3, %s8072_s0 }
 0xae0   :  { %3853 = vrot.lane.b32.xlu1 %v8713_v58, %s8069_s22 }
 0xaf5   :  { %v7566_v23 = vpop.f32.mrf.mxu1 }
 0xaf6   :  { %v2622_v57 = vrot.slane %v7566_v23, 1  ;;  %v2623_v45 = vrot.slane %v7566_v23, 2  ;;  %v2624_v39 = vrot.slane %v7566_v23, 3  ;;  %v2625_v22 = vrot.slane %v7566_v23, 4 }
 0xaf7   :  { %v2653_v34 = vadd.f32 %v7566_v23, %v2324_v20  ;;  %v2604_v33 = vpop.f32.mrf.mxu1  ;;  %v2626_v0 = vrot.slane %v7566_v23, 5  ;;  %v2627_v59 = vrot.slane %v7566_v23, 6  ;;  %v2628_v37 = vrot.slane %v7566_v23, 7 }
 0xaf8   :  { %v2654_v12 = vadd.f32 %v2622_v57, %v2325_v47  ;;  %v2655_v24 = vadd.f32 %v2623_v45, %v8629_v49  ;;  %v8748_v63 = vadd.f32 %v2624_v39, %v8631_v16  ;;  %v2615_v15 = vrot.slane %v2604_v33, 1 }
 0xaf9   :  { %v2616_v26 = vrot.slane %v2604_v33, 2  ;;  %v2617_v40 = vrot.slane %v2604_v33, 3  ;;  %v2618_v8 = vrot.slane %v2604_v33, 4  ;;  %v2645_v1 = vadd.f32 %v2604_v33, %v2316_v6  ;;  %v7580_v51 = vpop.f32.mrf.mxu1 }
 0xafa   :  { %v2646_v44 = vadd.f32 %v2615_v15, %v2317_v42  ;;  %v2860_v21 = vmul.f32 %v7855_v46, %v7580_v51  ;;  %v2619_v2 = vrot.slane %v2604_v33, 5  ;;  %v2620_v9 = vrot.slane %v2604_v33, 6 }
 0xafb   :  { %v2647_v4 = vadd.f32 %v2616_v26, %v2318_v19  ;;  %v2648_v23 = vadd.f32 %v2617_v40, %v2319_v5  ;;  %v2848_v57 = vpop.f32.mrf.mxu1  ;;  %v2621_v47 = vrot.slane %v2604_v33, 7  ;;  %v2649_v45 = vadd.f32 %v2618_v8, %v2320_v43  ;;  %v3100_v19 = vpop.permute.xlu1 %3099 }
 0xafc   :  { %v2859_v49 = vmul.f32 %v7857_v27, %v2848_v57  ;;  %v2650_v39 = vadd.f32 %v2619_v2, %v2321_v31  ;;  %v2651_v16 = vadd.f32 %v2620_v9, %v2322_v56  ;;  %v2657_v25 = vadd.f32 %v2625_v22, %v8633_v53 }
 0xafd   :  { %v2652_v54 = vadd.f32 %v2621_v47, %v2323_v17  ;;  %v2658_v41 = vadd.f32 %v2626_v0, %v8641_v48  ;;  %v2659_v6 = vadd.f32 %v2627_v59, %v8643_v55  ;;  %v2660_v20 = vadd.f32 %v2628_v37, %v8645_v14 }
 0xafe   :  { %7583 = vmatprep.mubr.msk.f32.mxu1 %vm242_vm8, %v2859_v49 }
 0xaff   :  { %7584 = vmatmul.mubr.msk.f32.vlgmr.msra.gmra.mxu1 %vm242_vm8, %v2860_v21 }
 0xb00   :  { %7594 = vmatpush3.msra.mxu1 %v8699_v30  ;;  %7597 = vmatprep.mubr.msk.f32.mxu1 %vm326_vm9, %v8706_v28 }
 0xb01   :  { %7595 = vmatprep.subr.mxu1 %v3100_v19 }
 0xb02   :  { %7596 = vmatpush3.msra.mxu1 %v3100_v19 }
 0xb03   :  { %7600 = vmatprep.subr.mxu1 %v8474_v36  ;;  %7598 = vmatmul.mubr.msk.f32.vlgmr.msra.gmra.mxu1 %vm326_vm9, %v8702_v11 }
 0xb04   :  { %7601 = vmatpush3.msra.mxu1 %v8474_v36 }
 0xb52   :  { %v3098_v59 = vpop.xlane.xlu0 %3097 }
 0xb53   :  { %7858 = vrcp.f32 %v3098_v59 }
 0xb54   :  { %v3095_v22 = vpop.xlane.xlu1 %3094 }
 0xb55   :  { %7860 = vrcp.f32 %v3095_v22 }
 0xb56   :  { %v3751_v33 = vpop.permute.xlu0 %3750 }
 0xb57   :  { %7616 = vmatprep.subr.msk.mxu1 %vm242_vm8, %v3751_v33 }
 0xb60   :  { %v7859_v37 = vpop.eup %7858 }
 0xb62   :  { %v7861_v27 = vpop.eup %7860 }
 0xbbf   :  { %v7585_v17 = vpop.f32.mrf.mxu1 }
 0xbc0   :  { %v2951_v31 = vrot.slane %v7585_v17, 1  ;;  %v2952_v43 = vrot.slane %v7585_v17, 2  ;;  %v2953_v56 = vrot.slane %v7585_v17, 3  ;;  %v2954_v5 = vrot.slane %v7585_v17, 4 }
 0xbc1   :  { %v2982_v53 = vadd.f32 %v7585_v17, %v2653_v34  ;;  %v2933_v48 = vpop.f32.mrf.mxu1  ;;  %v2955_v55 = vrot.slane %v7585_v17, 5  ;;  %v2956_v14 = vrot.slane %v7585_v17, 6  ;;  %v2957_v30 = vrot.slane %v7585_v17, 7 }
 0xbc2   :  { %v2983_v11 = vadd.f32 %v2951_v31, %v2654_v12  ;;  %v2984_v28 = vadd.f32 %v2952_v43, %v2655_v24  ;;  %v2944_v0 = vrot.slane %v2933_v48, 1  ;;  %v2945_v42 = vrot.slane %v2933_v48, 2 }
 0xbc3   :  { %v2946_v15 = vrot.slane %v2933_v48, 3  ;;  %v2947_v46 = vrot.slane %v2933_v48, 4  ;;  %v2974_v26 = vadd.f32 %v2933_v48, %v2645_v1  ;;  %v7599_v40 = vpop.f32.mrf.mxu1  ;;  %v2948_v8 = vrot.slane %v2933_v48, 5 }
 0xbc4   :  { %v2975_v51 = vadd.f32 %v2944_v0, %v2646_v44  ;;  %v2976_v21 = vadd.f32 %v2945_v42, %v2647_v4  ;;  %v3189_v2 = vmul.f32 %v7859_v37, %v7599_v40  ;;  %v2949_v9 = vrot.slane %v2933_v48, 6  ;;  %v3749_v44 = vpop.permute.xlu1 %3748 }
 0xbc5   :  { %v3177_v34 = vpop.f32.mrf.mxu1  ;;  %v2950_v57 = vrot.slane %v2933_v48, 7  ;;  %v2977_v47 = vadd.f32 %v2946_v15, %v2648_v23  ;;  %v2978_v49 = vadd.f32 %v2947_v46, %v2649_v45  ;;  %v2979_v19 = vadd.f32 %v2948_v8, %v2650_v39 }
 0xbc6   :  { %v3188_v12 = vmul.f32 %v7861_v27, %v3177_v34  ;;  %v2980_v24 = vadd.f32 %v2949_v9, %v2651_v16  ;;  %v2985_v59 = vadd.f32 %v2953_v56, %v8748_v63  ;;  %v2986_v22 = vadd.f32 %v2954_v5, %v2657_v25 }
 0xbc7   :  { %v2981_v17 = vadd.f32 %v2950_v57, %v2652_v54  ;;  %v2987_v31 = vadd.f32 %v2955_v55, %v2658_v41  ;;  %v2988_v1 = vadd.f32 %v2956_v14, %v2659_v6  ;;  %v2989_v43 = vadd.f32 %v2957_v30, %v2660_v20 }
 0xbc8   :  { %7602 = vmatprep.mubr.msk.f32.mxu1 %vm242_vm8, %v3188_v12 }
 0xbc9   :  { %7603 = vmatmul.mubr.msk.f32.vlgmr.msra.gmra.mxu1 %vm242_vm8, %v3189_v2 }
 0xbca   :  { %7617 = vmatpush3.xpose.msk.msra.mxu1 %vm242_vm8, %v3751_v33  ;;  %7620 = vmatprep.mubr.msk.f32.mxu1 %vm242_vm8, %v8713_v58 }
 0xbcb   :  { %7618 = vmatprep.subr.msk.mxu1 %vm242_vm8, %v3749_v44 }
 0xbce   :  { %7619 = vmatpush3.xpose.msk.msra.mxu1 %vm242_vm8, %v3749_v44 }
 0xbcf   :  { %7630 = vmatprep.subr.mxu1 %v8281_v60 }
 0xbd1   :  { %7621 = vmatmul.mubr.msk.f32.vlgmr.msra.gmra.mxu1 %vm242_vm8, %v8716_v3 }
 0xbd2   :  { %7631 = vmatpush3.msra.mxu1 %v8281_v60 }
 0xc89   :  { %v7604_v63 = vpop.f32.mrf.mxu1 }
 0xc8a   :  { %v3280_v4 = vrot.slane %v7604_v63, 1  ;;  %v3281_v23 = vrot.slane %v7604_v63, 2  ;;  %v3282_v45 = vrot.slane %v7604_v63, 3  ;;  %v8776_v39 = vadd.f32 %v7604_v63, %v2982_v53 }
 0xc8b   :  { %v3262_v16 = vpop.f32.mrf.mxu1  ;;  %v3283_v25 = vrot.slane %v7604_v63, 4  ;;  %v3284_v54 = vrot.slane %v7604_v63, 5  ;;  %v3285_v41 = vrot.slane %v7604_v63, 6  ;;  %v3286_v6 = vrot.slane %v7604_v63, 7 }
 0xc8c   :  { %10392 = vst [vmem:[#allocation30_spill] sm:$0xff] %v8776_v39  ;;  %v8778_v20 = vadd.f32 %v3280_v4, %v2983_v11  ;;  %v3273_v33 = vrot.slane %v3262_v16, 1  ;;  %v3274_v56 = vrot.slane %v3262_v16, 2  ;;  %v3275_v5 = vrot.slane %v3262_v16, 3 }
 0xc8d   :  { %v8780_v48 = vadd.f32 %v3262_v16, %v2974_v26  ;;  %v3276_v55 = vrot.slane %v3262_v16, 4  ;;  %v3277_v14 = vrot.slane %v3262_v16, 5  ;;  %v3278_v30 = vrot.slane %v3262_v16, 6 }
 0xc8e   :  { %v8782_v0 = vadd.f32 %v3273_v33, %v2975_v51  ;;  %v3279_v42 = vrot.slane %v3262_v16, 7  ;;  %v8784_v53 = vadd.f32 %v3274_v56, %v2976_v21  ;;  %v8786_v37 = vadd.f32 %v3275_v5, %v2977_v47  ;;  %v3854_v47 = vpop.permute.xlu1 %3853 }
 0xc8f   :  { %10393 = vst [vmem:[#allocation31_spill] sm:$0xff] %v8780_v48  ;;  %v8788_v15 = vadd.f32 %v3276_v55, %v2978_v49  ;;  %v8790_v46 = vadd.f32 %v3277_v14, %v2979_v19  ;;  %v8792_v11 = vadd.f32 %v3278_v30, %v2980_v24  ;;  %v8794_v40 = vadd.f32 %v3281_v23, %v2984_v28 }
 0xc90   :  { %10394 = vst [vmem:[#allocation32_spill] sm:$0xff] %v8782_v0  ;;  %10395 = vst [vmem:[#allocation33_spill] sm:$0xff] %v8784_v53  ;;  %v8796_v26 = vadd.f32 %v3279_v42, %v2981_v17  ;;  %v8798_v2 = vadd.f32 %v3282_v45, %v2985_v59  ;;  %v8801_v9 = vadd.f32 %v3283_v25, %v2986_v22 }
 0xc91   :  { %10396 = vst [vmem:[#allocation34_spill] sm:$0xff] %v8786_v37  ;;  %10397 = vst [vmem:[#allocation35_spill] sm:$0xff] %v8788_v15  ;;  %v7622_v8 = vpop.f32.mrf.mxu1  ;;  %v8803_v27 = vadd.f32 %v3284_v54, %v2987_v31  ;;  %v8805_v34 = vadd.f32 %v3285_v41, %v2988_v1  ;;  %v8807_v57 = vadd.f32 %v3286_v6, %v2989_v43 }
 0xc92   :  { %10398 = vst [vmem:[#allocation36_spill] sm:$0xff] %v8790_v46  ;;  %10399 = vst [vmem:[#allocation37_spill] sm:$0xff] %v8792_v11  ;;  %v3838_v51 = vsel %vm326_vm9, %v7622_v8, -inf }
 0xc93   :  { %10400 = vst [vmem:[#allocation38_spill] sm:$0xff] %v8794_v40  ;;  %10401 = vst [vmem:[#allocation39_spill] sm:$0xff] %v8796_v26  ;;  %3839 = vmax.xlane.f32.xlu0 %v3838_v51  ;;  %v3826_v21 = vpop.f32.mrf.mxu1 }
 0xc94   :  { %10402 = vst [vmem:[#allocation40_spill] sm:$0xff] %v8798_v2  ;;  %10403 = vst [vmem:[#allocation41_spill] sm:$0xff] %v8801_v9  ;;  %v3835_v28 = vsel %vm326_vm9, %v3826_v21, -inf }
 0xc95   :  { %10404 = vst [vmem:[#allocation42_spill] sm:$0xff] %v8803_v27  ;;  %10405 = vst [vmem:[#allocation43_spill] sm:$0xff] %v8805_v34  ;;  %3836 = vmax.xlane.f32.xlu1 %v3835_v28 }
 0xc96   :  { %10406 = vst [vmem:[#allocation44_spill] sm:$0xff] %v8807_v57 }
 0xca6   :  { %4079 = vrot.lane.b32.xlu1 %v8716_v3, %s8073_s2 }
 0xca9   :  { %3855 = vrot.lane.b32.xlu0 %v8716_v3, %s8069_s22 }
 0xcaa   :  { %4073 = vrot.lane.b32.xlu1 %v8713_v58, %s8074_s30 }
 0xcad   :  { %4077 = vrot.lane.b32.xlu0 %v8713_v58, %s8073_s2 }
 0xcae   :  { %4408 = vrot.lane.b32.xlu1 %v8716_v3, %s8075_s4 }
 0xcb1   :  { %4075 = vrot.lane.b32.xlu0 %v8716_v3, %s8074_s30 }
 0xcb2   :  { %4402 = vrot.lane.b32.xlu1 %v8713_v58, %s8076_s5 }
 0xcb5   :  { %4406 = vrot.lane.b32.xlu0 %v8713_v58, %s8075_s4 }
 0xcb9   :  { %4404 = vrot.lane.b32.xlu0 %v8716_v3, %s8076_s5 }
 0xd1c   :  { %v3840_v49 = vpop.xlane.xlu0 %3839 }
 0xd1d   :  { %v3842_v19 = vsub.f32 %v7622_v8, %v3840_v49 }
 0xd1e   :  { %v3837_v12 = vpop.xlane.xlu1 %3836 }
 0xd1f   :  { %v3845_v24 = vmul.f32 1.442695, %v3842_v19  ;;  %v3841_v59 = vsub.f32 %v3826_v21, %v3837_v12 }
 0xd20   :  { %v3856_v22 = vpop.permute.xlu0 %3855 }
 0xd21   :  { %7862 = vpow2.f32 %v3845_v24  ;;  %v3843_v17 = vmul.f32 1.442695, %v3841_v59  ;;  %7623 = vmatprep.subr.mxu0 %v3856_v22 }
 0xd22   :  { %7624 = vmatpush3.msra.mxu0 %v3856_v22  ;;  %v4080_v31 = vpop.permute.xlu1 %4079 }
 0xd23   :  { %7864 = vpow2.f32 %v3843_v17  ;;  %7625 = vmatprep.subr.mxu0 %v3854_v47 }
 0xd24   :  { %7626 = vmatpush3.msra.mxu0 %v3854_v47  ;;  %v4078_v44 = vpop.permute.xlu0 %4077 }
 0xd25   :  { %7635 = vmatprep.subr.msk.mxu0 %vm242_vm8, %v4080_v31 }
 0xd26   :  { %v4074_v43 = vpop.permute.xlu1 %4073 }
 0xd28   :  { %v4076_v16 = vpop.permute.xlu0 %4075 }
 0xd2a   :  { %v4409_v45 = vpop.permute.xlu1 %4408 }
 0xd2c   :  { %v4407_v54 = vpop.permute.xlu0 %4406 }
 0xd2e   :  { %v7863_v1 = vpop.eup %7862  ;;  %v4403_v25 = vpop.permute.xlu1 %4402 }
 0xd2f   :  { %v3850_v63 = vsel %vm326_vm9, %v7863_v1, 0.0 }
 0xd30   :  { %v7865_v4 = vpop.eup %7864  ;;  %3851 = vadd.xlane.f32.xlu0 %v3850_v63  ;;  %v4405_v41 = vpop.permute.xlu0 %4404 }
 0xd31   :  { %7627 = vmatprep.mubr.msk.f32.mxu0 %vm326_vm9, %v7865_v4  ;;  %v3847_v23 = vsel %vm326_vm9, %v7865_v4, 0.0 }
 0xd32   :  { %7628 = vmatmul.mubr.msk.f32.vlgmr.msra.gmra.mxu0 %vm326_vm9, %v7863_v1  ;;  %3848 = vadd.xlane.f32.xlu1 %v3847_v23 }
 0xd33   :  { %7636 = vmatpush3.xpose.msk.msra.mxu0 %vm242_vm8, %v4080_v31  ;;  %7639 = vmatprep.mubr.msk.f32.mxu0 %vm242_vm8, %v4074_v43 }
 0xd34   :  { %7637 = vmatprep.subr.msk.mxu0 %vm242_vm8, %v4078_v44 }
 0xd37   :  { %7638 = vmatpush3.xpose.msk.msra.mxu0 %vm242_vm8, %v4078_v44 }
 0xd38   :  { %7654 = vmatprep.subr.msk.mxu0 %vm242_vm8, %v4409_v45 }
 0xd3a   :  { %7640 = vmatmul.mubr.msk.f32.vlgmr.msra.gmra.mxu0 %vm242_vm8, %v4076_v16 }
 0xd3b   :  { %7655 = vmatpush3.xpose.msk.msra.mxu0 %vm242_vm8, %v4409_v45  ;;  %7658 = vmatprep.mubr.msk.f32.mxu0 %vm242_vm8, %v4403_v25 }
 0xd3c   :  { %7656 = vmatprep.subr.msk.mxu0 %vm242_vm8, %v4407_v54 }
 0xd3f   :  { %7657 = vmatpush3.xpose.msk.msra.mxu0 %vm242_vm8, %v4407_v54 }
 0xd42   :  { %7659 = vmatmul.mubr.msk.f32.vlgmr.msra.gmra.mxu0 %vm242_vm8, %v4405_v41 }
 0xdb9   :  { %v3852_v33 = vpop.xlane.xlu0 %3851 }
 0xdbb   :  { %v3849_v6 = vpop.xlane.xlu1 %3848 }
 0xdbc   :  { %7866 = vrcp.f32 %v3849_v6  ;;  %v3742_v6 = vadd.f32 %v8724_v35, %v8653_v38  ;;  %v3744_v38 = vadd.f32 %v8724_v35, %v8658_v50  ;;  %v5338_v50 = vld [vmem:[#allocation2 + $0x1b] sm:$0x1] }
 0xdbd   :  { %7868 = vrcp.f32 %v3852_v33 }
 0xdc9   :  { %v7867_v5 = vpop.eup %7866 }
 0xdca   :  { %v7869_v14 = vpop.eup %7868 }
 0xdf2   :  { %v7629_v56 = vpop.f32.mrf.mxu0 }
 0xdf3   :  { %v3943_v42 = vmul.f32 %v7869_v14, %v7629_v56 }
 0xdf4   :  { %v3931_v55 = vpop.f32.mrf.mxu0 }
 0xdf5   :  { %v3942_v30 = vmul.f32 %v7867_v5, %v3931_v55  ;;  %v3743_v5 = vadd.f32 %v8724_v35, %v8655_v10 }
 0xdf7   :  { %7632 = vmatprep.mubr.msk.f32.mxu1 %vm242_vm8, %v3942_v30  ;;  %v3745_v30 = vadd.f32 %v8724_v35, %v8662_v61  ;;  %v5339_v61 = vld [vmem:[#allocation2 + $0x1f] sm:$0x1] }
 0xdf8   :  { %7633 = vmatmul.mubr.msk.f32.vlgmr.msra.gmra.mxu1 %vm242_vm8, %v3943_v42 }
 0xdfa   :  { %v7641_v8 = vpop.f32.mrf.mxu0 }
 0xdfb   :  { %v4167_v51 = vsel %vm326_vm9, %v7641_v8, -inf }
 0xdfc   :  { %4168 = vmax.xlane.f32.xlu1 %v4167_v51  ;;  %v4155_v21 = vpop.f32.mrf.mxu0 }
 0xdfd   :  { %v4164_v28 = vsel %vm326_vm9, %v4155_v21, -inf }
 0xdfe   :  { %4165 = vmax.xlane.f32.xlu0 %v4164_v28  ;;  %v5332_v28 = vld [vmem:[#allocation2 + $0x3] sm:$0x1] }
 0xe02   :  { %v8860_v47 = vpop.f32.mrf.mxu0 }
 0xe03   :  { %v4496_v19 = vsel %vm326_vm9, %v8860_v47, -inf }
 0xe04   :  { %v8862_v49 = vpop.f32.mrf.mxu0 }
 0xe05   :  { %v4493_v12 = vsel %vm326_vm9, %v8862_v49, -inf }
 0xe0d   :  { %4182 = vrot.lane.b32.xlu1 %v8713_v58, %s8077_s6 }
 0xe11   :  { %4737 = vrot.lane.b32.xlu1 %v8716_v3, %s8079_s8 }
 0xe14   :  { %4184 = vrot.lane.b32.xlu0 %v8716_v3, %s8077_s6 }
 0xe15   :  { %4731 = vrot.lane.b32.xlu1 %v8713_v58, %s8080_s9 }
 0xe18   :  { %4735 = vrot.lane.b32.xlu0 %v8713_v58, %s8079_s8 }
 0xe1c   :  { %4733 = vrot.lane.b32.xlu0 %v8716_v3, %s8080_s9 }
 0xe39   :  { %4497 = vmax.xlane.f32.xlu1 %v4496_v19  ;;  %v5333_v19 = vld [vmem:[#allocation2 + $0x7] sm:$0x1] }
 0xe3b   :  { %4494 = vmax.xlane.f32.xlu0 %v4493_v12  ;;  %v5334_v12 = vld [vmem:[#allocation2 + $0xb] sm:$0x1] }
 0xe85   :  { %v4169_v24 = vpop.xlane.xlu1 %4168 }
 0xe86   :  { %v4171_v59 = vsub.f32 %v7641_v8, %v4169_v24  ;;  %v5335_v24 = vld [vmem:[#allocation2 + $0xf] sm:$0x1] }
 0xe87   :  { %v4166_v22 = vpop.xlane.xlu0 %4165 }
 0xe88   :  { %v4174_v17 = vmul.f32 1.442695, %v4171_v59  ;;  %v4170_v31 = vsub.f32 %v4155_v21, %v4166_v22  ;;  %v5336_v59 = vld [vmem:[#allocation2 + $0x13] sm:$0x1]  ;;  %v5337_v22 = vld [vmem:[#allocation2 + $0x17] sm:$0x1] }
 0xe89   :  { %v4183_v1 = vpop.permute.xlu1 %4182 }
 0xe8a   :  { %7870 = vpow2.f32 %v4174_v17  ;;  %v4172_v43 = vmul.f32 1.442695, %v4170_v31  ;;  %v5364_v17 = vrot.slane %v5333_v19, 7  ;;  %v5366_v31 = vrot.slane %v5334_v12, 6 }
 0xe8b   :  { %v4185_v44 = vpop.permute.xlu0 %4184 }
 0xe8c   :  { %7872 = vpow2.f32 %v4172_v43  ;;  %7642 = vmatprep.subr.mxu1 %v4185_v44  ;;  %v5370_v43 = vrot.slane %v5336_v59, 4 }
 0xe8d   :  { %7643 = vmatpush3.msra.mxu1 %v4185_v44  ;;  %v4738_v63 = vpop.permute.xlu1 %4737  ;;  %v5372_v44 = vrot.slane %v5337_v22, 3 }
 0xe8e   :  { %7644 = vmatprep.subr.mxu1 %v4183_v1  ;;  %7673 = vmatprep.subr.msk.mxu0 %vm242_vm8, %v4738_v63 }
 0xe8f   :  { %v4736_v4 = vpop.permute.xlu0 %4735  ;;  %7645 = vmatpush3.msra.mxu1 %v4183_v1  ;;  %7674 = vmatpush3.xpose.msk.msra.mxu0 %vm242_vm8, %v4738_v63  ;;  %v5368_v1 = vrot.slane %v5335_v24, 5  ;;  %v5374_v63 = vrot.slane %v5338_v50, 2 }
 0xe90   :  { %7649 = vmatprep.subr.mxu1 %v8294_v18  ;;  %7675 = vmatprep.subr.msk.mxu0 %vm242_vm8, %v4736_v4 }
 0xe91   :  { %v4732_v23 = vpop.permute.xlu1 %4731 }
 0xe92   :  { %7677 = vmatprep.mubr.msk.f32.mxu0 %vm242_vm8, %v4732_v23  ;;  %v5340_v23 = vld [vmem:[#allocation2 + $0x23] sm:$0x1] }
 0xe93   :  { %7676 = vmatpush3.xpose.msk.msra.mxu0 %vm242_vm8, %v4736_v4  ;;  %v4734_v45 = vpop.permute.xlu0 %4733  ;;  %v5365_v4 = vsel %vm102_vm0, %v5364_v17, %v5332_v28 }
 0xe94   :  { %7692 = vmatprep.subr.mxu0 %v8589_v7 }
 0xe96   :  { %7678 = vmatmul.mubr.msk.f32.vlgmr.msra.gmra.mxu0 %vm242_vm8, %v4734_v45  ;;  %v5341_v45 = vld [vmem:[#allocation2 + $0x27] sm:$0x1] }
 0xe97   :  { %v7871_v16 = vpop.eup %7870  ;;  %7693 = vmatpush3.msra.mxu0 %v8589_v7  ;;  %v3740_v7 = vadd.f32 %v8724_v35, %v8648_v32 }
 0xe98   :  { %v4179_v25 = vsel %vm326_vm9, %v7871_v16, 0.0  ;;  %7694 = vmatprep.subr.mxu0 %v8595_v13 }
 0xe99   :  { %v7873_v54 = vpop.eup %7872  ;;  %4180 = vadd.xlane.f32.xlu0 %v4179_v25  ;;  %7695 = vmatpush3.msra.mxu0 %v8595_v13  ;;  %v3741_v13 = vadd.f32 %v8724_v35, %v8651_v62  ;;  %v5367_v25 = vsel %vm105_vm1, %v5366_v31, %v5365_v4 }
 0xe9a   :  { %7646 = vmatprep.mubr.msk.f32.mxu1 %vm326_vm9, %v7873_v54  ;;  %v4176_v41 = vsel %vm326_vm9, %v7873_v54, 0.0  ;;  %7696 = vmatprep.subr.mxu0 %v8601_v29  ;;  %v8928_v54 = vld [vmem:[#allocation2 + $0x2f] sm:$0x1] }
 0xe9b   :  { %4177 = vadd.xlane.f32.xlu1 %v4176_v41  ;;  %7647 = vmatmul.mubr.msk.f32.vlgmr.msra.gmra.mxu1 %vm326_vm9, %v7871_v16  ;;  %v8925_v16 = vld [vmem:[#allocation2 + $0x2b] sm:$0x1]  ;;  %v8930_v41 = vld [vmem:[#allocation2 + $0x33] sm:$0x1] }
 0xe9c   :  { %7650 = vmatpush3.msra.mxu1 %v8294_v18  ;;  %7697 = vmatpush3.msra.mxu0 %v8601_v29 }
 0xe9d   :  { %7698 = vmatprep.subr.mxu0 %v8607_v52 }
 0xe9e   :  { %7699 = vmatpush3.msra.mxu0 %v8607_v52 }
 0xeac   :  { %4511 = vrot.lane.b32.xlu1 %v8713_v58, %s8081_s10 }
 0xeaf   :  { %4513 = vrot.lane.b32.xlu0 %v8716_v3, %s8081_s10 }
 0xeb8   :  { %v8898_v29 = vpop.f32.mrf.mxu1 }
 0xeb9   :  { %v4035_v33 = vrot.slane %v8898_v29, 2  ;;  %v4036_v52 = vrot.slane %v8898_v29, 3  ;;  %v4037_v56 = vrot.slane %v8898_v29, 4  ;;  %v4038_v55 = vrot.slane %v8898_v29, 5 }
 0xeba   :  { %v4039_v42 = vrot.slane %v8898_v29, 6  ;;  %v4040_v8 = vrot.slane %v8898_v29, 7 }
 0xebb   :  { %v8906_v32 = vadd.f32 %v4035_v33, %v3740_v7  ;;  %v8908_v14 = vadd.f32 %v4036_v52, %v3741_v13  ;;  %v8910_v62 = vadd.f32 %v4037_v56, %v3742_v6  ;;  %v8918_v51 = vadd.f32 %v4038_v55, %v3743_v5  ;;  %v8932_v7 = vld [vmem:[#allocation2 + $0x37] sm:$0x1]  ;;  %v8935_v33 = vld [vmem:[#allocation2 + $0x3b] sm:$0x1]  ;;  %v8939_v55 = vld [vmem:[#allocation2 + $0x3f] sm:$0x1] }
 0xebc   :  { %v8920_v10 = vadd.f32 %v4039_v42, %v3744_v38  ;;  %v8922_v21 = vadd.f32 %v4040_v8, %v3745_v30  ;;  %v5369_v13 = vsel %vm108_vm2, %v5368_v1, %v5367_v25  ;;  %v5376_v6 = vrot.slane %v5339_v61, 1 }
 0xebd   :  { %v5378_v52 = vrot.slane %v5341_v45, 7  ;;  %v5380_v56 = vrot.slane %v8925_v16, 6  ;;  %v5371_v5 = vsel %vm111_vm3, %v5370_v43, %v5369_v13  ;;  %v5382_v38 = vrot.slane %v8928_v54, 5 }
 0xebe   :  { %v5384_v30 = vrot.slane %v8930_v41, 4  ;;  %v5373_v42 = vsel %vm114_vm4, %v5372_v44, %v5371_v5  ;;  %v5386_v28 = vrot.slane %v8932_v7, 3  ;;  %v5388_v24 = vrot.slane %v8935_v33, 2 }
 0xebf   :  { %v5379_v8 = vsel %vm102_vm0, %v5378_v52, %v5340_v23  ;;  %v5375_v19 = vsel %vm117_vm5, %v5374_v63, %v5373_v42  ;;  %v5390_v50 = vrot.slane %v8939_v55, 1 }
 0xec0   :  { %v5381_v12 = vsel %vm105_vm1, %v5380_v56, %v5379_v8  ;;  %v5377_v59 = vsel %vm120_vm6, %v5376_v6, %v5375_v19 }
 0xec1   :  { %v5383_v22 = vsel %vm108_vm2, %v5382_v38, %v5381_v12  ;;  %7700 = vmatprep.mubr.msk.f32.mxu0 %vm136_vm7, %v5377_v59 }
 0xec2   :  { %v5385_v17 = vsel %vm111_vm3, %v5384_v30, %v5383_v22  ;;  %v4498_v4 = vpop.xlane.xlu1 %4497  ;;  %v8961_v30 = vpop.f32.mrf.mxu1 }
 0xec3   :  { %v5387_v31 = vsel %vm114_vm4, %v5386_v28, %v5385_v17  ;;  %v4500_v45 = vsub.f32 %v8860_v47, %v4498_v4  ;;  %v10407_v17 = vld [vmem:[#allocation12_spill] sm:$0xff] }
 0xec4   :  { %v5389_v61 = vsel %vm117_vm5, %v5388_v24, %v5387_v31  ;;  %v4495_v43 = vpop.xlane.xlu0 %4494 }
 0xec5   :  { %v5391_v1 = vsel %vm120_vm6, %v5390_v50, %v5389_v61  ;;  %v4499_v23 = vsub.f32 %v8862_v49, %v4495_v43  ;;  %v4503_v13 = vmul.f32 1.442695, %v4500_v45 }
 0xec6   :  { %7701 = vmatmul.mubr.msk.f32.vlgmr.msra.gmra.mxu0 %vm136_vm7, %v5391_v1 }
 0xec7   :  { %v4501_v25 = vmul.f32 1.442695, %v4499_v23 }
 0xec9   :  { %7874 = vpow2.f32 %v4501_v25 }
 0xeca   :  { %7876 = vpow2.f32 %v4503_v13 }
 0xed6   :  { %v7875_v5 = vpop.eup %7874 }
 0xed7   :  { %v7877_v49 = vpop.eup %7876  ;;  %v4505_v8 = vsel %vm326_vm9, %v7875_v5, 0.0 }
 0xed8   :  { %v4508_v12 = vsel %vm326_vm9, %v7877_v49, 0.0 }
 0xf22   :  { %v4181_v44 = vpop.xlane.xlu0 %4180 }
 0xf24   :  { %v4178_v6 = vpop.xlane.xlu1 %4177 }
 0xf25   :  { %7878 = vrcp.f32 %v4178_v6 }
 0xf26   :  { %v4514_v63 = vpop.permute.xlu0 %4513  ;;  %7880 = vrcp.f32 %v4181_v44 }
 0xf27   :  { %7661 = vmatprep.subr.mxu1 %v4514_v63 }
 0xf28   :  { %v4512_v50 = vpop.permute.xlu1 %4511 }
 0xf32   :  { %v7879_v28 = vpop.eup %7878 }
 0xf33   :  { %v7881_v24 = vpop.eup %7880 }
 0xf56   :  { %v7679_v52 = vpop.f32.mrf.mxu0 }
 0xf57   :  { %v4825_v56 = vsel %vm326_vm9, %v7679_v52, -inf }
 0xf58   :  { %4826 = vmax.xlane.f32.xlu1 %v4825_v56  ;;  %v4813_v38 = vpop.f32.mrf.mxu0 }
 0xf59   :  { %v4822_v42 = vsel %vm326_vm9, %v4813_v38, -inf }
 0xf5a   :  { %4823 = vmax.xlane.f32.xlu0 %v4822_v42  ;;  %v7958_v42 = vld [vmem:[#allocation2 + $0x2] sm:$0x1] }
 0xf5b   :  { %v7648_v47 = vpop.f32.mrf.mxu1 }
 0xf5c   :  { %4506 = vadd.xlane.f32.xlu1 %v4505_v8  ;;  %v4272_v22 = vmul.f32 %v7881_v24, %v7648_v47  ;;  %v7959_v47 = vld [vmem:[#allocation2 + $0x6] sm:$0x1] }
 0xf5d   :  { %v4260_v19 = vpop.f32.mrf.mxu1  ;;  %v3731_v8 = vadd.f32 %v7959_v47, %v8724_v35  ;;  %v4031_v47 = vrot.slane %v8961_v30, 5 }
 0xf5e   :  { %v4271_v59 = vmul.f32 %v7879_v28, %v4260_v19  ;;  %4509 = vadd.xlane.f32.xlu0 %v4508_v12  ;;  %v7960_v28 = vld [vmem:[#allocation2 + $0xa] sm:$0x1]  ;;  %v7961_v12 = vld [vmem:[#allocation2 + $0xe] sm:$0x1] }
 0xf5f   :  { %v3732_v19 = vadd.f32 %v7960_v28, %v8724_v35  ;;  %v3733_v24 = vadd.f32 %v7961_v12, %v8724_v35  ;;  %v4032_v28 = vrot.slane %v8961_v30, 6  ;;  %v4033_v12 = vrot.slane %v8961_v30, 7 }
 0xf60   :  { %7651 = vmatprep.mubr.msk.f32.mxu1 %vm242_vm8, %v4271_v59  ;;  %v7962_v59 = vld [vmem:[#allocation2 + $0x12] sm:$0x1] }
 0xf61   :  { %7652 = vmatmul.mubr.msk.f32.vlgmr.msra.gmra.mxu1 %vm242_vm8, %v4272_v22  ;;  %v3734_v22 = vadd.f32 %v7962_v59, %v8724_v35 }
 0xf62   :  { %7662 = vmatpush3.msra.mxu1 %v4514_v63  ;;  %7665 = vmatprep.mubr.msk.f32.mxu1 %vm326_vm9, %v7875_v5 }
 0xf63   :  { %7663 = vmatprep.subr.mxu1 %v4512_v50 }
 0xf64   :  { %7664 = vmatpush3.msra.mxu1 %v4512_v50  ;;  %v7963_v50 = vld [vmem:[#allocation2 + $0x16] sm:$0x1] }
 0xf65   :  { %7668 = vmatprep.subr.mxu1 %v10407_v17  ;;  %7666 = vmatmul.mubr.msk.f32.vlgmr.msra.gmra.mxu1 %vm326_vm9, %v7877_v49  ;;  %v3730_v49 = vadd.f32 %v7958_v42, %v8724_v35  ;;  %v4030_v42 = vrot.slane %v8961_v30, 4 }
 0xf66   :  { %7669 = vmatpush3.msra.mxu1 %v10407_v17 }
 0xf6d   :  { %4840 = vrot.lane.b32.xlu1 %v8713_v58, %s8082_s11 }
 0xf74   :  { %4842 = vrot.lane.b32.xlu0 %v8716_v3, %s8082_s11 }
 0xf86   :  { %v7702_v13 = vpop.f32.mrf.mxu0 }
 0xf88   :  { %v5462_v6 = vpop.f32.mrf.mxu0 }
 0xfe1   :  { %v4827_v31 = vpop.xlane.xlu1 %4826 }
 0xfe2   :  { %v4829_v61 = vsub.f32 %v7679_v52, %v4827_v31  ;;  %v10408_v52 = vld [vmem:[#allocation29_spill] sm:$0xff]  ;;  %v3735_v31 = vadd.f32 %v7963_v50, %v8724_v35 }
 0xfe3   :  { %v4824_v1 = vpop.xlane.xlu0 %4823  ;;  %v8988_v56 = vadd.f32 %v10408_v52, %v5462_v6  ;;  %v8991_v5 = vadd.f32 %v10408_v52, %v7702_v13  ;;  %v4027_v6 = vrot.slane %v8961_v30, 1  ;;  %v4028_v52 = vrot.slane %v8961_v30, 2 }
 0xfe4   :  { %v4832_v43 = vmul.f32 1.442695, %v4829_v61  ;;  %v4828_v44 = vsub.f32 %v4813_v38, %v4824_v1  ;;  %v7964_v61 = vld [vmem:[#allocation2 + $0x1a] sm:$0x1]  ;;  %v4062_v26 = vadd.f32 %v4031_v47, %v3735_v31 }
 0xfe5   :  { %v4507_v38 = vpop.xlane.xlu1 %4506  ;;  %v3736_v1 = vadd.f32 %v7964_v61, %v8724_v35  ;;  %v4057_v61 = vadd.f32 %v8961_v30, %v3730_v49 }
 0xfe6   :  { %7882 = vpow2.f32 %v4832_v43  ;;  %v4830_v63 = vmul.f32 1.442695, %v4828_v44  ;;  %v7965_v43 = vld [vmem:[#allocation2 + $0x22] sm:$0x1] }
 0xfe7   :  { %v4510_v4 = vpop.xlane.xlu0 %4509  ;;  %v3738_v44 = vadd.f32 %v7965_v43, %v8724_v35  ;;  %v4059_v43 = vadd.f32 %v4028_v52, %v3732_v19  ;;  %v4063_v34 = vadd.f32 %v4032_v28, %v3736_v1 }
 0xfe8   :  { %7884 = vpow2.f32 %v4830_v63  ;;  %v7966_v63 = vld [vmem:[#allocation2 + $0x26] sm:$0x1] }
 0xfe9   :  { %7886 = vrcp.f32 %v4510_v4  ;;  %v3739_v4 = vadd.f32 %v7966_v63, %v8724_v35  ;;  %v4065_v59 = vadd.f32 %v8898_v29, %v3738_v44 }
 0xfea   :  { %7888 = vrcp.f32 %v4507_v38  ;;  %v4029_v38 = vrot.slane %v8961_v30, 3 }
 0xfeb   :  { %v8976_v23 = vpop.permute.xlu0 %4842 }
 0xfec   :  { %7680 = vmatprep.subr.mxu1 %v8976_v23  ;;  %v4060_v63 = vadd.f32 %v4029_v38, %v3733_v24 }
 0xff3   :  { %v8979_v45 = vpop.eup %7882 }
 0xff4   :  { %v4837_v58 = vsel %vm326_vm9, %v8979_v45, 0.0 }
 0xff5   :  { %v8983_v25 = vpop.eup %7884  ;;  %4838 = vadd.xlane.f32.xlu0 %v4837_v58  ;;  %v4034_v58 = vrot.slane %v8898_v29, 1 }
 0xff6   :  { %v4834_v3 = vsel %vm326_vm9, %v8983_v25, 0.0  ;;  %v7887_v19 = vpop.eup %7886 }
 0xff7   :  { %4835 = vadd.xlane.f32.xlu1 %v4834_v3  ;;  %v7967_v3 = vld [vmem:[#allocation2 + $0x1e] sm:$0x1]  ;;  %v4066_v50 = vadd.f32 %v4034_v58, %v3739_v4  ;;  %v7889_v38 = vpop.eup %7888 }
 0xff8   :  { %v3737_v13 = vadd.f32 %v7967_v3, %v8724_v35  ;;  %v4058_v35 = vadd.f32 %v4027_v6, %v3731_v8  ;;  %v4061_v3 = vadd.f32 %v4030_v42, %v3734_v22 }
 0xffa   :  { %v4064_v11 = vadd.f32 %v4033_v12, %v3737_v13 }
0x1008   :  { %5489 = vrot.lane.b32.xlu1 %v8988_v56, %s8072_s0 }
0x100b   :  { %5491 = vrot.lane.b32.xlu0 %v8991_v5, %s8072_s0 }
0x100c   :  { %5594 = vrot.lane.b32.xlu1 %v8988_v56, %s8069_s22 }
0x1021   :  { %v7653_v57 = vpop.f32.mrf.mxu1 }
0x1022   :  { %v4363_v27 = vrot.slane %v7653_v57, 1  ;;  %v4364_v46 = vrot.slane %v7653_v57, 2  ;;  %v4365_v9 = vrot.slane %v7653_v57, 3  ;;  %v4366_v15 = vrot.slane %v7653_v57, 4 }
0x1023   :  { %v4394_v2 = vadd.f32 %v7653_v57, %v4065_v59  ;;  %v4345_v37 = vpop.f32.mrf.mxu1  ;;  %v4367_v39 = vrot.slane %v7653_v57, 5  ;;  %v4368_v40 = vrot.slane %v7653_v57, 6  ;;  %v4369_v29 = vrot.slane %v7653_v57, 7 }
0x1024   :  { %v4395_v44 = vadd.f32 %v4363_v27, %v4066_v50  ;;  %v4396_v30 = vadd.f32 %v4364_v46, %v8906_v32  ;;  %v9021_v49 = vadd.f32 %v4365_v9, %v8908_v14  ;;  %v4356_v8 = vrot.slane %v4345_v37, 1 }
0x1025   :  { %v4357_v24 = vrot.slane %v4345_v37, 2  ;;  %v4358_v22 = vrot.slane %v4345_v37, 3  ;;  %v4359_v31 = vrot.slane %v4345_v37, 4  ;;  %v4386_v1 = vadd.f32 %v4345_v37, %v4057_v61  ;;  %v7667_v4 = vpop.f32.mrf.mxu1 }
0x1026   :  { %v4387_v58 = vadd.f32 %v4356_v8, %v4058_v35  ;;  %v4601_v13 = vmul.f32 %v7887_v19, %v7667_v4  ;;  %v4360_v6 = vrot.slane %v4345_v37, 5  ;;  %v4361_v52 = vrot.slane %v4345_v37, 6  ;;  %v4841_v35 = vpop.permute.xlu1 %4840 }
0x1027   :  { %v4388_v42 = vadd.f32 %v4357_v24, %v4059_v43  ;;  %v4389_v57 = vadd.f32 %v4358_v22, %v4060_v63  ;;  %v4589_v27 = vpop.f32.mrf.mxu1  ;;  %v4362_v47 = vrot.slane %v4345_v37, 7  ;;  %v4390_v46 = vadd.f32 %v4359_v31, %v4061_v3 }
0x1028   :  { %v4600_v32 = vmul.f32 %v7889_v38, %v4589_v27  ;;  %v4391_v9 = vadd.f32 %v4360_v6, %v4062_v26  ;;  %v4392_v14 = vadd.f32 %v4361_v52, %v4063_v34  ;;  %v4398_v28 = vadd.f32 %v4366_v15, %v8910_v62 }
0x1029   :  { %v4393_v12 = vadd.f32 %v4362_v47, %v4064_v11  ;;  %v4399_v59 = vadd.f32 %v4367_v39, %v8918_v51  ;;  %v4400_v50 = vadd.f32 %v4368_v40, %v8920_v10  ;;  %v4401_v61 = vadd.f32 %v4369_v29, %v8922_v21 }
0x102a   :  { %7670 = vmatprep.mubr.msk.f32.mxu1 %vm242_vm8, %v4600_v32 }
0x102b   :  { %7671 = vmatmul.mubr.msk.f32.vlgmr.msra.gmra.mxu1 %vm242_vm8, %v4601_v13 }
0x102c   :  { %7681 = vmatpush3.msra.mxu1 %v8976_v23  ;;  %7684 = vmatprep.mubr.msk.f32.mxu1 %vm326_vm9, %v8983_v25 }
0x102d   :  { %7682 = vmatprep.subr.mxu1 %v4841_v35 }
0x102e   :  { %7683 = vmatpush3.msra.mxu1 %v4841_v35 }
0x102f   :  { %7687 = vmatprep.subr.mxu1 %v8474_v36  ;;  %7685 = vmatmul.mubr.msk.f32.vlgmr.msra.gmra.mxu1 %vm326_vm9, %v8979_v45 }
0x1030   :  { %7688 = vmatpush3.msra.mxu1 %v8474_v36 }
0x107e   :  { %v4839_v39 = vpop.xlane.xlu0 %4838 }
0x107f   :  { %7890 = vrcp.f32 %v4839_v39 }
0x1080   :  { %v4836_v15 = vpop.xlane.xlu1 %4835 }
0x1081   :  { %7892 = vrcp.f32 %v4836_v15 }
0x1082   :  { %v5492_v37 = vpop.permute.xlu0 %5491 }
0x1083   :  { %7703 = vmatprep.subr.msk.mxu1 %vm242_vm8, %v5492_v37 }
0x108c   :  { %v7891_v29 = vpop.eup %7890 }
0x108e   :  { %v7893_v38 = vpop.eup %7892 }
0x10eb   :  { %v7672_v11 = vpop.f32.mrf.mxu1 }
0x10ec   :  { %v4692_v40 = vrot.slane %v7672_v11, 1  ;;  %v4693_v26 = vrot.slane %v7672_v11, 2  ;;  %v4694_v34 = vrot.slane %v7672_v11, 3  ;;  %v4695_v62 = vrot.slane %v7672_v11, 4 }
0x10ed   :  { %v4723_v51 = vadd.f32 %v7672_v11, %v4394_v2  ;;  %v4674_v10 = vpop.f32.mrf.mxu1  ;;  %v4696_v21 = vrot.slane %v7672_v11, 5  ;;  %v4697_v23 = vrot.slane %v7672_v11, 6  ;;  %v4698_v25 = vrot.slane %v7672_v11, 7 }
0x10ee   :  { %v4724_v45 = vadd.f32 %v4692_v40, %v4395_v44  ;;  %v4725_v43 = vadd.f32 %v4693_v26, %v4396_v30  ;;  %v4685_v63 = vrot.slane %v4674_v10, 1  ;;  %v4686_v3 = vrot.slane %v4674_v10, 2 }
0x10ef   :  { %v4687_v8 = vrot.slane %v4674_v10, 3  ;;  %v4688_v19 = vrot.slane %v4674_v10, 4  ;;  %v4715_v24 = vadd.f32 %v4674_v10, %v4386_v1  ;;  %v7686_v22 = vpop.f32.mrf.mxu1  ;;  %v4689_v31 = vrot.slane %v4674_v10, 5 }
0x10f0   :  { %v4716_v4 = vadd.f32 %v4685_v63, %v4387_v58  ;;  %v4717_v13 = vadd.f32 %v4686_v3, %v4388_v42  ;;  %v4930_v6 = vmul.f32 %v7891_v29, %v7686_v22  ;;  %v4690_v52 = vrot.slane %v4674_v10, 6  ;;  %v5490_v58 = vpop.permute.xlu1 %5489 }
0x10f1   :  { %v4918_v2 = vpop.f32.mrf.mxu1  ;;  %v4691_v27 = vrot.slane %v4674_v10, 7  ;;  %v4718_v47 = vadd.f32 %v4687_v8, %v4389_v57  ;;  %v4719_v32 = vadd.f32 %v4688_v19, %v4390_v46  ;;  %v4720_v35 = vadd.f32 %v4689_v31, %v4391_v9 }
0x10f2   :  { %v4929_v44 = vmul.f32 %v7893_v38, %v4918_v2  ;;  %v4721_v30 = vadd.f32 %v4690_v52, %v4392_v14  ;;  %v4726_v39 = vadd.f32 %v4694_v34, %v9021_v49  ;;  %v4727_v15 = vadd.f32 %v4695_v62, %v4398_v28 }
0x10f3   :  { %v4722_v11 = vadd.f32 %v4691_v27, %v4393_v12  ;;  %v4728_v40 = vadd.f32 %v4696_v21, %v4399_v59  ;;  %v4729_v1 = vadd.f32 %v4697_v23, %v4400_v50  ;;  %v4730_v26 = vadd.f32 %v4698_v25, %v4401_v61 }
0x10f4   :  { %7689 = vmatprep.mubr.msk.f32.mxu1 %vm242_vm8, %v4929_v44  ;;  %v5595_v27 = vpop.permute.xlu1 %5594 }
0x10f5   :  { %7690 = vmatmul.mubr.msk.f32.vlgmr.msra.gmra.mxu1 %vm242_vm8, %v4930_v6 }
0x10f6   :  { %7704 = vmatpush3.xpose.msk.msra.mxu1 %vm242_vm8, %v5492_v37  ;;  %7707 = vmatprep.mubr.msk.f32.mxu1 %vm242_vm8, %v8988_v56 }
0x10f7   :  { %7705 = vmatprep.subr.msk.mxu1 %vm242_vm8, %v5490_v58 }
0x10fa   :  { %7706 = vmatpush3.xpose.msk.msra.mxu1 %vm242_vm8, %v5490_v58 }
0x10fb   :  { %7717 = vmatprep.subr.mxu1 %v8281_v60 }
0x10fd   :  { %7708 = vmatmul.mubr.msk.f32.vlgmr.msra.gmra.mxu1 %vm242_vm8, %v8991_v5 }
0x10fe   :  { %7718 = vmatpush3.msra.mxu1 %v8281_v60 }
0x11b5   :  { %v7691_v49 = vpop.f32.mrf.mxu1 }
0x11b6   :  { %v5021_v42 = vrot.slane %v7691_v49, 1  ;;  %v5022_v57 = vrot.slane %v7691_v49, 2  ;;  %v5023_v46 = vrot.slane %v7691_v49, 3  ;;  %v9049_v9 = vadd.f32 %v7691_v49, %v4723_v51 }
0x11b7   :  { %v5003_v14 = vpop.f32.mrf.mxu1  ;;  %v5024_v28 = vrot.slane %v7691_v49, 4  ;;  %v5025_v12 = vrot.slane %v7691_v49, 5  ;;  %v5026_v59 = vrot.slane %v7691_v49, 6  ;;  %v5027_v50 = vrot.slane %v7691_v49, 7 }
0x11b8   :  { %10409 = vst [vmem:[#allocation12_spill] sm:$0xff] %v9049_v9  ;;  %v9051_v61 = vadd.f32 %v5021_v42, %v4724_v45  ;;  %v5014_v37 = vrot.slane %v5003_v14, 1  ;;  %v5015_v34 = vrot.slane %v5003_v14, 2  ;;  %v5016_v62 = vrot.slane %v5003_v14, 3 }
0x11b9   :  { %v9053_v10 = vadd.f32 %v5003_v14, %v4715_v24  ;;  %v5017_v21 = vrot.slane %v5003_v14, 4  ;;  %v5018_v60 = vrot.slane %v5003_v14, 5  ;;  %v5019_v23 = vrot.slane %v5003_v14, 6 }
0x11ba   :  { %10410 = vst [vmem:[#allocation29_spill] sm:$0xff] %v9051_v61  ;;  %v9055_v25 = vadd.f32 %v5014_v37, %v4716_v4  ;;  %v5020_v63 = vrot.slane %v5003_v14, 7  ;;  %v9057_v51 = vadd.f32 %v5015_v34, %v4717_v13  ;;  %v9059_v3 = vadd.f32 %v5016_v62, %v4718_v47 }
0x11bb   :  { %10411 = vst [vmem:[#allocation45_spill] sm:$0xff] %v9053_v10  ;;  %v9061_v29 = vadd.f32 %v5017_v21, %v4719_v32  ;;  %v9063_v8 = vadd.f32 %v5018_v60, %v4720_v35  ;;  %v9065_v45 = vadd.f32 %v5019_v23, %v4721_v30  ;;  %v9067_v19 = vadd.f32 %v5022_v57, %v4725_v43 }
0x11bc   :  { %10412 = vst [vmem:[#allocation46_spill] sm:$0xff] %v9055_v25  ;;  %10413 = vst [vmem:[#allocation47_spill] sm:$0xff] %v9057_v51  ;;  %v9069_v24 = vadd.f32 %v5020_v63, %v4722_v11  ;;  %v9071_v31 = vadd.f32 %v5023_v46, %v4726_v39  ;;  %v9074_v6 = vadd.f32 %v5024_v28, %v4727_v15 }
0x11bd   :  { %10414 = vst [vmem:[#allocation48_spill] sm:$0xff] %v9059_v3  ;;  %10415 = vst [vmem:[#allocation49_spill] sm:$0xff] %v9061_v29  ;;  %v7709_v22 = vpop.f32.mrf.mxu1  ;;  %v9076_v52 = vadd.f32 %v5025_v12, %v4728_v40  ;;  %v9078_v38 = vadd.f32 %v5026_v59, %v4729_v1  ;;  %v9080_v2 = vadd.f32 %v5027_v50, %v4730_v26 }
0x11be   :  { %10416 = vst [vmem:[#allocation50_spill] sm:$0xff] %v9063_v8  ;;  %10417 = vst [vmem:[#allocation51_spill] sm:$0xff] %v9065_v45  ;;  %v5579_v4 = vsel %vm326_vm9, %v7709_v22, -inf }
0x11bf   :  { %10418 = vst [vmem:[#allocation52_spill] sm:$0xff] %v9067_v19  ;;  %10419 = vst [vmem:[#allocation53_spill] sm:$0xff] %v9069_v24  ;;  %5580 = vmax.xlane.f32.xlu0 %v5579_v4  ;;  %v5567_v13 = vpop.f32.mrf.mxu1 }
0x11c0   :  { %10420 = vst [vmem:[#allocation54_spill] sm:$0xff] %v9071_v31  ;;  %10421 = vst [vmem:[#allocation55_spill] sm:$0xff] %v9074_v6  ;;  %v5576_v43 = vsel %vm326_vm9, %v5567_v13, -inf }
0x11c1   :  { %10422 = vst [vmem:[#allocation56_spill] sm:$0xff] %v9076_v52  ;;  %10423 = vst [vmem:[#allocation57_spill] sm:$0xff] %v9078_v38  ;;  %5577 = vmax.xlane.f32.xlu1 %v5576_v43 }
0x11c2   :  { %10424 = vst [vmem:[#allocation58_spill] sm:$0xff] %v9080_v2 }
0x11d2   :  { %5820 = vrot.lane.b32.xlu1 %v8991_v5, %s8073_s2 }
0x11d5   :  { %5596 = vrot.lane.b32.xlu0 %v8991_v5, %s8069_s22 }
0x11d6   :  { %5814 = vrot.lane.b32.xlu1 %v8988_v56, %s8074_s30 }
0x11d9   :  { %5818 = vrot.lane.b32.xlu0 %v8988_v56, %s8073_s2 }
0x11da   :  { %6149 = vrot.lane.b32.xlu1 %v8991_v5, %s8075_s4 }
0x11dd   :  { %5816 = vrot.lane.b32.xlu0 %v8991_v5, %s8074_s30 }
0x11de   :  { %6143 = vrot.lane.b32.xlu1 %v8988_v56, %s8076_s5 }
0x11e1   :  { %6147 = vrot.lane.b32.xlu0 %v8988_v56, %s8075_s4 }
0x11e5   :  { %6145 = vrot.lane.b32.xlu0 %v8991_v5, %s8076_s5 }
0x1248   :  { %v5581_v47 = vpop.xlane.xlu0 %5580 }
0x1249   :  { %v5583_v32 = vsub.f32 %v7709_v22, %v5581_v47 }
0x124a   :  { %v5578_v35 = vpop.xlane.xlu1 %5577 }
0x124b   :  { %v5586_v44 = vmul.f32 1.442695, %v5583_v32  ;;  %v5582_v30 = vsub.f32 %v5567_v13, %v5578_v35 }
0x124c   :  { %v5597_v39 = vpop.permute.xlu0 %5596 }
0x124d   :  { %7894 = vpow2.f32 %v5586_v44  ;;  %v5584_v15 = vmul.f32 1.442695, %v5582_v30  ;;  %7710 = vmatprep.subr.mxu0 %v5597_v39 }
0x124e   :  { %7711 = vmatpush3.msra.mxu0 %v5597_v39  ;;  %v5821_v11 = vpop.permute.xlu1 %5820 }
0x124f   :  { %7896 = vpow2.f32 %v5584_v15  ;;  %7712 = vmatprep.subr.mxu0 %v5595_v27 }
0x1250   :  { %7713 = vmatpush3.msra.mxu0 %v5595_v27  ;;  %v5819_v26 = vpop.permute.xlu0 %5818 }
0x1251   :  { %7722 = vmatprep.subr.msk.mxu0 %vm242_vm8, %v5821_v11 }
0x1252   :  { %v5815_v1 = vpop.permute.xlu1 %5814 }
0x1254   :  { %v5817_v46 = vpop.permute.xlu0 %5816 }
0x1256   :  { %v6150_v57 = vpop.permute.xlu1 %6149 }
0x1258   :  { %v6148_v28 = vpop.permute.xlu0 %6147 }
0x125a   :  { %v7895_v40 = vpop.eup %7894  ;;  %v6144_v14 = vpop.permute.xlu1 %6143 }
0x125b   :  { %v5591_v58 = vsel %vm326_vm9, %v7895_v40, 0.0 }
0x125c   :  { %v7897_v49 = vpop.eup %7896  ;;  %5592 = vadd.xlane.f32.xlu0 %v5591_v58  ;;  %v6146_v12 = vpop.permute.xlu0 %6145 }
0x125d   :  { %7714 = vmatprep.mubr.msk.f32.mxu0 %vm326_vm9, %v7897_v49  ;;  %v5588_v42 = vsel %vm326_vm9, %v7897_v49, 0.0 }
0x125e   :  { %7715 = vmatmul.mubr.msk.f32.vlgmr.msra.gmra.mxu0 %vm326_vm9, %v7895_v40  ;;  %5589 = vadd.xlane.f32.xlu1 %v5588_v42 }
0x125f   :  { %7723 = vmatpush3.xpose.msk.msra.mxu0 %vm242_vm8, %v5821_v11  ;;  %7726 = vmatprep.mubr.msk.f32.mxu0 %vm242_vm8, %v5815_v1 }
0x1260   :  { %7724 = vmatprep.subr.msk.mxu0 %vm242_vm8, %v5819_v26 }
0x1263   :  { %7725 = vmatpush3.xpose.msk.msra.mxu0 %vm242_vm8, %v5819_v26 }
0x1264   :  { %7741 = vmatprep.subr.msk.mxu0 %vm242_vm8, %v6150_v57 }
0x1266   :  { %7727 = vmatmul.mubr.msk.f32.vlgmr.msra.gmra.mxu0 %vm242_vm8, %v5817_v46 }
0x1267   :  { %7742 = vmatpush3.xpose.msk.msra.mxu0 %vm242_vm8, %v6150_v57  ;;  %7745 = vmatprep.mubr.msk.f32.mxu0 %vm242_vm8, %v6144_v14 }
0x1268   :  { %7743 = vmatprep.subr.msk.mxu0 %vm242_vm8, %v6148_v28 }
0x126b   :  { %7744 = vmatpush3.xpose.msk.msra.mxu0 %vm242_vm8, %v6148_v28 }
0x126e   :  { %7746 = vmatmul.mubr.msk.f32.vlgmr.msra.gmra.mxu0 %vm242_vm8, %v6146_v12  ;;  %v9157_v12 = vld [vmem:[#allocation7 + $0x1] ss:$0 sm:$0xff] }
0x12e5   :  { %v5593_v50 = vpop.xlane.xlu0 %5592 }
0x12e7   :  { %v5590_v59 = vpop.xlane.xlu1 %5589 }
0x12e8   :  { %7898 = vrcp.f32 %v5590_v59  ;;  %v5481_v59 = vadd.f32 %v9157_v12, %v8925_v16 }
0x12e9   :  { %7900 = vrcp.f32 %v5593_v50  ;;  %v5482_v50 = vadd.f32 %v9157_v12, %v8928_v54  ;;  %v5486_v54 = vadd.f32 %v9157_v12, %v8939_v55 }
0x12f5   :  { %v7899_v34 = vpop.eup %7898 }
0x12f6   :  { %v7901_v21 = vpop.eup %7900 }
0x131e   :  { %v7716_v37 = vpop.f32.mrf.mxu0 }
0x131f   :  { %v5684_v23 = vmul.f32 %v7901_v21, %v7716_v37  ;;  %v5483_v37 = vadd.f32 %v9157_v12, %v8930_v41 }
0x1320   :  { %v5672_v62 = vpop.f32.mrf.mxu0 }
0x1321   :  { %v5683_v60 = vmul.f32 %v7899_v34, %v5672_v62  ;;  %v5485_v62 = vadd.f32 %v9157_v12, %v8935_v33 }
0x1323   :  { %7719 = vmatprep.mubr.msk.f32.mxu1 %vm242_vm8, %v5683_v60 }
0x1324   :  { %7720 = vmatmul.mubr.msk.f32.vlgmr.msra.gmra.mxu1 %vm242_vm8, %v5684_v23 }
0x1326   :  { %v7728_v63 = vpop.f32.mrf.mxu0 }
0x1327   :  { %v5908_v22 = vsel %vm326_vm9, %v7728_v63, -inf }
0x1328   :  { %5909 = vmax.xlane.f32.xlu1 %v5908_v22  ;;  %v5896_v4 = vpop.f32.mrf.mxu0 }
0x1329   :  { %v5905_v13 = vsel %vm326_vm9, %v5896_v4, -inf }
0x132a   :  { %5906 = vmax.xlane.f32.xlu0 %v5905_v13 }
0x132e   :  { %v9133_v43 = vpop.f32.mrf.mxu0 }
0x132f   :  { %v6237_v47 = vsel %vm326_vm9, %v9133_v43, -inf }
0x1330   :  { %v9135_v27 = vpop.f32.mrf.mxu0 }
0x1331   :  { %v6234_v32 = vsel %vm326_vm9, %v9135_v27, -inf }
0x1339   :  { %5923 = vrot.lane.b32.xlu1 %v8988_v56, %s8077_s6 }
0x133d   :  { %6478 = vrot.lane.b32.xlu1 %v8991_v5, %s8079_s8 }
0x1340   :  { %5925 = vrot.lane.b32.xlu0 %v8991_v5, %s8077_s6 }
0x1341   :  { %6472 = vrot.lane.b32.xlu1 %v8988_v56, %s8080_s9 }
0x1344   :  { %6476 = vrot.lane.b32.xlu0 %v8988_v56, %s8079_s8 }
0x1348   :  { %6474 = vrot.lane.b32.xlu0 %v8991_v5, %s8080_s9 }
0x1365   :  { %6238 = vmax.xlane.f32.xlu1 %v6237_v47 }
0x1367   :  { %6235 = vmax.xlane.f32.xlu0 %v6234_v32 }
0x13b1   :  { %v5910_v35 = vpop.xlane.xlu1 %5909 }
0x13b2   :  { %v5912_v44 = vsub.f32 %v7728_v63, %v5910_v35 }
0x13b3   :  { %v5907_v30 = vpop.xlane.xlu0 %5906 }
0x13b4   :  { %v5915_v39 = vmul.f32 1.442695, %v5912_v44  ;;  %v5911_v15 = vsub.f32 %v5896_v4, %v5907_v30 }
0x13b5   :  { %v5924_v11 = vpop.permute.xlu1 %5923 }
0x13b6   :  { %7902 = vpow2.f32 %v5915_v39  ;;  %v5913_v40 = vmul.f32 1.442695, %v5911_v15 }
0x13b7   :  { %v5926_v1 = vpop.permute.xlu0 %5925 }
0x13b8   :  { %7904 = vpow2.f32 %v5913_v40  ;;  %7729 = vmatprep.subr.mxu1 %v5926_v1 }
0x13b9   :  { %7730 = vmatpush3.msra.mxu1 %v5926_v1  ;;  %v6479_v26 = vpop.permute.xlu1 %6478 }
0x13ba   :  { %7731 = vmatprep.subr.mxu1 %v5924_v11  ;;  %7760 = vmatprep.subr.msk.mxu0 %vm242_vm8, %v6479_v26 }
0x13bb   :  { %v6477_v58 = vpop.permute.xlu0 %6476  ;;  %7732 = vmatpush3.msra.mxu1 %v5924_v11  ;;  %7761 = vmatpush3.xpose.msk.msra.mxu0 %vm242_vm8, %v6479_v26 }
0x13bc   :  { %7736 = vmatprep.subr.mxu1 %v8294_v18  ;;  %7762 = vmatprep.subr.msk.mxu0 %vm242_vm8, %v6477_v58 }
0x13bd   :  { %v6473_v49 = vpop.permute.xlu1 %6472 }
0x13be   :  { %7764 = vmatprep.mubr.msk.f32.mxu0 %vm242_vm8, %v6473_v49 }
0x13bf   :  { %7763 = vmatpush3.xpose.msk.msra.mxu0 %vm242_vm8, %v6477_v58  ;;  %v6475_v42 = vpop.permute.xlu0 %6474 }
0x13c2   :  { %7765 = vmatmul.mubr.msk.f32.vlgmr.msra.gmra.mxu0 %vm242_vm8, %v6475_v42 }
0x13c3   :  { %v7903_v57 = vpop.eup %7902 }
0x13c4   :  { %v5920_v46 = vsel %vm326_vm9, %v7903_v57, 0.0 }
0x13c5   :  { %v7905_v14 = vpop.eup %7904  ;;  %5921 = vadd.xlane.f32.xlu0 %v5920_v46 }
0x13c6   :  { %7733 = vmatprep.mubr.msk.f32.mxu1 %vm326_vm9, %v7905_v14  ;;  %v5917_v28 = vsel %vm326_vm9, %v7905_v14, 0.0 }
0x13c7   :  { %5918 = vadd.xlane.f32.xlu1 %v5917_v28  ;;  %7734 = vmatmul.mubr.msk.f32.vlgmr.msra.gmra.mxu1 %vm326_vm9, %v7903_v57 }
0x13c8   :  { %7737 = vmatpush3.msra.mxu1 %v8294_v18  ;;  %v5484_v18 = vadd.f32 %v9157_v12, %v8932_v7 }
0x13d8   :  { %6252 = vrot.lane.b32.xlu1 %v8988_v56, %s8081_s10 }
0x13db   :  { %6254 = vrot.lane.b32.xlu0 %v8991_v5, %s8081_s10 }
0x13e4   :  { %v9167_v34 = vpop.f32.mrf.mxu1 }
0x13e5   :  { %v5776_v21 = vrot.slane %v9167_v34, 2  ;;  %v5777_v60 = vrot.slane %v9167_v34, 3  ;;  %v5778_v16 = vrot.slane %v9167_v34, 4  ;;  %v5779_v23 = vrot.slane %v9167_v34, 5 }
0x13e6   :  { %v5780_v41 = vrot.slane %v9167_v34, 6  ;;  %v5781_v33 = vrot.slane %v9167_v34, 7  ;;  %v9194_v42 = vpop.f32.mrf.mxu1 }
0x13e7   :  { %v9178_v63 = vadd.f32 %v5776_v21, %v5481_v59  ;;  %v9180_v7 = vadd.f32 %v5777_v60, %v5482_v50  ;;  %v9182_v22 = vadd.f32 %v5778_v16, %v5483_v37  ;;  %v9185_v4 = vadd.f32 %v5779_v23, %v5484_v18  ;;  %v10425_v21 = vld [vmem:[#allocation16_spill] sm:$0xff]  ;;  %v10426_v16 = vld [vmem:[#allocation14_spill] sm:$0xff] }
0x13e8   :  { %v9187_v13 = vadd.f32 %v5780_v41, %v5485_v62  ;;  %v9189_v47 = vadd.f32 %v5781_v33, %v5486_v54  ;;  %v1584_v60 = vrot.slane %v10425_v21, 7  ;;  %v1598_v54 = vrot.slane %v10426_v16, 7  ;;  %v10427_v33 = vld [vmem:[#allocation17_spill] sm:$0xff] }
0x13ee   :  { %v6239_v44 = vpop.xlane.xlu1 %6238 }
0x13ef   :  { %v6241_v39 = vsub.f32 %v9133_v43, %v6239_v44 }
0x13f0   :  { %v6236_v32 = vpop.xlane.xlu0 %6235 }
0x13f1   :  { %v6240_v30 = vsub.f32 %v9135_v27, %v6236_v32  ;;  %v6244_v11 = vmul.f32 1.442695, %v6241_v39  ;;  %v1586_v32 = vrot.slane %v10427_v33, 6  ;;  %v3335_v39 = vrot.slane %v8782_v0, 7  ;;  %v10445_v0 = vld [vmem:[#allocation36_spill] sm:$0xff] }
0x13f3   :  { %v6242_v15 = vmul.f32 1.442695, %v6240_v30  ;;  %v10429_v30 = vld [vmem:[#allocation22_spill] sm:$0xff] }
0x13f5   :  { %7906 = vpow2.f32 %v6242_v15 }
0x13f6   :  { %7908 = vpow2.f32 %v6244_v11  ;;  %v10430_v11 = vld [vmem:[#allocation13_spill] sm:$0xff] }
0x1402   :  { %v7907_v58 = vpop.eup %7906 }
0x1403   :  { %v7909_v27 = vpop.eup %7908  ;;  %v6246_v46 = vsel %vm326_vm9, %v7907_v58, 0.0 }
0x1404   :  { %v6249_v59 = vsel %vm326_vm9, %v7909_v27, 0.0 }
0x144e   :  { %v5922_v55 = vpop.xlane.xlu0 %5921 }
0x1450   :  { %v5919_v40 = vpop.xlane.xlu1 %5918 }
0x1451   :  { %7910 = vrcp.f32 %v5919_v40  ;;  %v3349_v40 = vrot.slane %v8778_v20, 7 }
0x1452   :  { %v6255_v35 = vpop.permute.xlu0 %6254  ;;  %7912 = vrcp.f32 %v5922_v55 }
0x1453   :  { %7748 = vmatprep.subr.mxu1 %v6255_v35 }
0x1454   :  { %v6253_v62 = vpop.permute.xlu1 %6252 }
0x145e   :  { %v7911_v14 = vpop.eup %7910 }
0x145f   :  { %v7913_v50 = vpop.eup %7912 }
0x1482   :  { %v7766_v1 = vpop.f32.mrf.mxu0 }
0x1483   :  { %v6566_v26 = vsel %vm326_vm9, %v7766_v1, -inf }
0x1484   :  { %6567 = vmax.xlane.f32.xlu1 %v6566_v26  ;;  %v6554_v49 = vpop.f32.mrf.mxu0 }
0x1485   :  { %v6563_v57 = vsel %vm326_vm9, %v6554_v49, -inf }
0x1486   :  { %6564 = vmax.xlane.f32.xlu0 %v6563_v57 }
0x1487   :  { %v7735_v43 = vpop.f32.mrf.mxu1 }
0x1488   :  { %6247 = vadd.xlane.f32.xlu1 %v6246_v46  ;;  %v6013_v18 = vmul.f32 %v7913_v50, %v7735_v43  ;;  %v10433_v50 = vld [vmem:[#allocation38_spill] sm:$0xff] }
0x1489   :  { %v6001_v28 = vpop.f32.mrf.mxu1 }
0x148a   :  { %v6012_v37 = vmul.f32 %v7911_v14, %v6001_v28  ;;  %6250 = vadd.xlane.f32.xlu0 %v6249_v59  ;;  %v5076_v14 = vrot.slane %v9055_v25, 7  ;;  %v10432_v28 = vld [vmem:[#allocation24_spill] sm:$0xff] }
0x148b   :  { %v1602_v59 = vrot.slane %v10432_v28, 5 }
0x148c   :  { %7738 = vmatprep.mubr.msk.f32.mxu1 %vm242_vm8, %v6012_v37  ;;  %v3351_v37 = vrot.slane %v10433_v50, 6 }
0x148d   :  { %7739 = vmatmul.mubr.msk.f32.vlgmr.msra.gmra.mxu1 %vm242_vm8, %v6013_v18 }
0x148e   :  { %7749 = vmatpush3.msra.mxu1 %v6255_v35  ;;  %7752 = vmatprep.mubr.msk.f32.mxu1 %vm326_vm9, %v7907_v58  ;;  %v10428_v35 = vld [vmem:[#allocation15_spill] sm:$0xff]  ;;  %v3337_v58 = vrot.slane %v8784_v53, 6 }
0x148f   :  { %7750 = vmatprep.subr.mxu1 %v6253_v62  ;;  %v1585_v44 = vsel %vm102_vm0, %v1584_v60, %v10428_v35  ;;  %v10444_v53 = vld [vmem:[#allocation27_spill] sm:$0xff] }
0x1490   :  { %7751 = vmatpush3.msra.mxu1 %v6253_v62  ;;  %v10434_v62 = vld [vmem:[#allocation30_spill] sm:$0xff] }
0x1491   :  { %7755 = vmatprep.subr.mxu1 %v10407_v17  ;;  %7753 = vmatmul.mubr.msk.f32.vlgmr.msra.gmra.mxu1 %vm326_vm9, %v7909_v27  ;;  %v10431_v27 = vld [vmem:[#allocation18_spill] sm:$0xff]  ;;  %v3350_v60 = vsel %vm102_vm0, %v3349_v40, %v10434_v62 }
0x1492   :  { %7756 = vmatpush3.msra.mxu1 %v10407_v17  ;;  %v1600_v17 = vrot.slane %v10429_v30, 6  ;;  %v1588_v43 = vrot.slane %v10431_v27, 5 }
0x1499   :  { %6581 = vrot.lane.b32.xlu1 %v8988_v56, %s8082_s11 }
0x14a0   :  { %6583 = vrot.lane.b32.xlu0 %v8991_v5, %s8082_s11  ;;  %v1599_v5 = vsel %vm102_vm0, %v1598_v54, %v10430_v11  ;;  %v5090_v54 = vrot.slane %v9051_v61, 7 }
0x14a1   :  { %v1601_v46 = vsel %vm105_vm1, %v1600_v17, %v1599_v5 }
0x14a2   :  { %v5091_v61 = vsel %vm102_vm0, %v5090_v54, %v9049_v9 }
0x150d   :  { %v6568_v23 = vpop.xlane.xlu1 %6567 }
0x150e   :  { %v6570_v41 = vsub.f32 %v7766_v1, %v6568_v23  ;;  %v1587_v1 = vsel %vm105_vm1, %v1586_v32, %v1585_v44  ;;  %v10435_v23 = vld [vmem:[#allocation19_spill] sm:$0xff]  ;;  %v1603_v32 = vsel %vm108_vm2, %v1602_v59, %v1601_v46  ;;  %v5078_v44 = vrot.slane %v9057_v51, 6  ;;  %v10439_v51 = vld [vmem:[#allocation40_spill] sm:$0xff] }
0x150f   :  { %v6565_v55 = vpop.xlane.xlu0 %6564  ;;  %v1589_v18 = vsel %vm108_vm2, %v1588_v43, %v1587_v1  ;;  %v10438_v1 = vld [vmem:[#allocation20_spill] sm:$0xff]  ;;  %v3352_v46 = vsel %vm105_vm1, %v3351_v37, %v3350_v60  ;;  %v3353_v25 = vrot.slane %v10439_v51, 5  ;;  %v10442_v37 = vld [vmem:[#allocation21_spill] sm:$0xff] }
0x1510   :  { %v6573_v56 = vmul.f32 1.442695, %v6570_v41  ;;  %v6569_v15 = vsub.f32 %v6554_v49, %v6565_v55  ;;  %v3336_v49 = vsel %vm102_vm0, %v3335_v39, %v8780_v48  ;;  %v1590_v41 = vrot.slane %v10435_v23, 4  ;;  %v10436_v39 = vld [vmem:[#allocation25_spill] sm:$0xff] }
0x1511   :  { %v3338_v55 = vsel %vm105_vm1, %v3337_v58, %v3336_v49  ;;  %v1592_v43 = vrot.slane %v10438_v1, 3  ;;  %v5092_v58 = vrot.slane %v9067_v19, 6  ;;  %v1594_v60 = vrot.slane %v10442_v37, 2 }
0x1512   :  { %7914 = vpow2.f32 %v6573_v56  ;;  %v6571_v26 = vmul.f32 1.442695, %v6569_v15  ;;  %v1604_v56 = vrot.slane %v10436_v39, 4  ;;  %v10437_v15 = vld [vmem:[#allocation34_spill] sm:$0xff]  ;;  %v1591_v40 = vsel %vm111_vm3, %v1590_v41, %v1589_v18 }
0x1513   :  { %v9221_v57 = vpop.xlane.xlu0 %6250  ;;  %v3339_v5 = vrot.slane %v10437_v15, 5  ;;  %v10441_v15 = vld [vmem:[#allocation35_spill] sm:$0xff]  ;;  %v1593_v41 = vsel %vm114_vm4, %v1592_v43, %v1591_v40  ;;  %v3354_v19 = vsel %vm108_vm2, %v3353_v25, %v3352_v46  ;;  %v5093_v9 = vsel %vm105_vm1, %v5092_v58, %v5091_v61 }
0x1514   :  { %7916 = vpow2.f32 %v6571_v26  ;;  %v5077_v26 = vsel %vm102_vm0, %v5076_v14, %v9053_v10  ;;  %v1605_v49 = vsel %vm111_vm3, %v1604_v56, %v1603_v32  ;;  %v10440_v14 = vld [vmem:[#allocation26_spill] sm:$0xff]  ;;  %v3341_v48 = vrot.slane %v10441_v15, 4  ;;  %v10446_v43 = vld [vmem:[#allocation23_spill] sm:$0xff] }
0x1515   :  { %v3340_v59 = vsel %vm108_vm2, %v3339_v5, %v3338_v55  ;;  %v1606_v10 = vrot.slane %v10440_v14, 3  ;;  %v5079_v18 = vsel %vm105_vm1, %v5078_v44, %v5077_v26  ;;  %v5080_v32 = vrot.slane %v9059_v3, 5  ;;  %v10443_v5 = vld [vmem:[#allocation41_spill] sm:$0xff] }
0x1516   :  { %v3342_v56 = vsel %vm111_vm3, %v3341_v48, %v3340_v59  ;;  %v3355_v54 = vrot.slane %v10443_v5, 4  ;;  %v1608_v15 = vrot.slane %v10444_v53, 2  ;;  %v3343_v44 = vrot.slane %v10445_v0, 3  ;;  %v10447_v59 = vld [vmem:[#allocation42_spill] sm:$0xff] }
0x1517   :  { %v9238_v17 = vpop.permute.xlu0 %6583  ;;  %v1607_v55 = vsel %vm114_vm4, %v1606_v10, %v1605_v49  ;;  %v5081_v26 = vsel %vm108_vm2, %v5080_v32, %v5079_v18  ;;  %v5094_v40 = vrot.slane %v9071_v31, 5  ;;  %v1595_v25 = vsel %vm117_vm5, %v1594_v60, %v1593_v41  ;;  %v10448_v41 = vld [vmem:[#allocation37_spill] sm:$0xff] }
0x1518   :  { %7767 = vmatprep.subr.mxu1 %v9238_v17  ;;  %v1596_v46 = vrot.slane %v10446_v43, 1  ;;  %v3356_v10 = vsel %vm111_vm3, %v3355_v54, %v3354_v19  ;;  %v5082_v48 = vrot.slane %v9061_v29, 4  ;;  %v1609_v61 = vsel %vm117_vm5, %v1608_v15, %v1607_v55  ;;  %v10449_v55 = vld [vmem:[#allocation28_spill] sm:$0xff] }
0x1519   :  { %v3344_v58 = vsel %vm114_vm4, %v3343_v44, %v3342_v56  ;;  %v3357_v3 = vrot.slane %v10447_v59, 3  ;;  %v5095_v18 = vsel %vm108_vm2, %v5094_v40, %v5093_v9  ;;  %v3345_v60 = vrot.slane %v10448_v41, 2  ;;  %v10450_v41 = vld [vmem:[#allocation43_spill] sm:$0xff] }
0x151a   :  { %v5083_v31 = vsel %vm111_vm3, %v5082_v48, %v5081_v26  ;;  %v5096_v19 = vrot.slane %v9074_v6, 4  ;;  %v1597_v15 = vsel %vm120_vm6, %v1596_v46, %v1595_v25  ;;  %v1610_v56 = vrot.slane %v10449_v55, 1  ;;  %v10451_v6 = vld [vmem:[#allocation39_spill] sm:$0xff] }
0x151b   :  { %v3358_v44 = vsel %vm114_vm4, %v3357_v3, %v3356_v10  ;;  %v5084_v9 = vrot.slane %v9063_v8, 3  ;;  %v3346_v29 = vsel %vm117_vm5, %v3345_v60, %v3344_v58  ;;  %v3359_v26 = vrot.slane %v10450_v41, 2  ;;  %v10452_v60 = vld [vmem:[#allocation44_spill] sm:$0xff] }
0x151c   :  { %v5097_v48 = vsel %vm111_vm3, %v5096_v19, %v5095_v18  ;;  %v3347_v25 = vrot.slane %v10451_v6, 1  ;;  %v5098_v3 = vrot.slane %v9076_v52, 3  ;;  %v1614_v10 = vsel %vm136_vm7, %v1597_v15, 0.0 }
0x151d   :  { %v5085_v46 = vsel %vm114_vm4, %v5084_v9, %v5083_v31  ;;  %v3360_v8 = vsel %vm117_vm5, %v3359_v26, %v3358_v44  ;;  %v5086_v0 = vrot.slane %v9065_v45, 2  ;;  %v3361_v18 = vrot.slane %v10452_v60, 1 }
0x151e   :  { %v3348_v58 = vsel %vm120_vm6, %v3347_v25, %v3346_v29  ;;  %v5099_v19 = vsel %vm114_vm4, %v5098_v3, %v5097_v48  ;;  %v5100_v31 = vrot.slane %v9078_v38, 2  ;;  %v5088_v44 = vrot.slane %v9069_v24, 1  ;;  %v6248_v25 = vpop.xlane.xlu1 %6247 }
0x151f   :  { %v9273_v49 = vpop.eup %7914  ;;  %v3362_v15 = vsel %vm120_vm6, %v3361_v18, %v3360_v8  ;;  %v3365_v9 = vsel %vm136_vm7, %v3348_v58, 0.0  ;;  %v5102_v26 = vrot.slane %v9080_v2, 1  ;;  %v7971_v18 = vld [vmem:[#allocation2 + $0xb] sm:$0x1]  ;;  %7918 = vrcp.f32 %v6248_v25  ;;  %v7977_v25 = vld [vmem:[#allocation2 + $0x1b] sm:$0x1] }
0x1520   :  { %v6578_v32 = vsel %vm326_vm9, %v9273_v49, 0.0  ;;  %v3368_v48 = vsel %vm136_vm7, %v3362_v15, 0.0  ;;  %7920 = vrcp.f32 %v9221_v57 }
0x1521   :  { %v9284_v54 = vpop.eup %7916  ;;  %6579 = vadd.xlane.f32.xlu0 %v6578_v32  ;;  %v1611_v32 = vsel %vm120_vm6, %v1610_v56, %v1609_v61  ;;  %v5087_v56 = vsel %vm117_vm5, %v5086_v0, %v5085_v46  ;;  %v7969_v46 = vld [vmem:[#allocation2 + $0x3] sm:$0x1] }
0x1522   :  { %v6575_v40 = vsel %vm326_vm9, %v9284_v54, 0.0  ;;  %v1617_v61 = vsel %vm136_vm7, %v1611_v32, 0.0  ;;  %v5089_v29 = vsel %vm120_vm6, %v5088_v44, %v5087_v56  ;;  %v5471_v3 = vadd.f32 %v7969_v46, %v9157_v12  ;;  %v7974_v44 = vld [vmem:[#allocation2 + $0x23] sm:$0x1] }
0x1523   :  { %6576 = vadd.xlane.f32.xlu1 %v6575_v40  ;;  %v5101_v40 = vsel %vm117_vm5, %v5100_v31, %v5099_v19  ;;  %v5106_v32 = vsel %vm136_vm7, %v5089_v29, 0.0  ;;  %v5473_v19 = vadd.f32 %v7971_v18, %v9157_v12  ;;  %v7973_v31 = vld [vmem:[#allocation2 + $0x13] sm:$0x1]  ;;  %v5770_v46 = vrot.slane %v9194_v42, 3 }
0x1524   :  { %v5103_v0 = vsel %vm120_vm6, %v5102_v26, %v5101_v40  ;;  %v5475_v15 = vadd.f32 %v7973_v31, %v9157_v12  ;;  %v7975_v40 = vld [vmem:[#allocation2 + $0x27] sm:$0x1]  ;;  %v5775_v26 = vrot.slane %v9167_v34, 1  ;;  %v5771_v18 = vrot.slane %v9194_v42, 4 }
0x1525   :  { %1615 = vadd.xlane.f32.xlu0 %v1614_v10  ;;  %v5109_v8 = vsel %vm136_vm7, %v5103_v0, 0.0  ;;  %v7970_v10 = vld [vmem:[#allocation2 + $0x7] sm:$0x1]  ;;  %v5480_v29 = vadd.f32 %v7975_v40, %v9157_v12  ;;  %v5773_v31 = vrot.slane %v9194_v42, 6  ;;  %v5798_v24 = vadd.f32 %v9194_v42, %v5471_v3 }
0x1526   :  { %v5472_v58 = vadd.f32 %v7970_v10, %v9157_v12  ;;  %v5477_v10 = vadd.f32 %v7977_v25, %v9157_v12  ;;  %v5802_v52 = vadd.f32 %v5771_v18, %v5475_v15  ;;  %v5774_v25 = vrot.slane %v9194_v42, 7 }
0x1527   :  { %1618 = vadd.xlane.f32.xlu1 %v1617_v61  ;;  %v7972_v61 = vld [vmem:[#allocation2 + $0xf] sm:$0x1] }
0x1528   :  { %v5474_v56 = vadd.f32 %v7972_v61, %v9157_v12  ;;  %v5772_v61 = vrot.slane %v9194_v42, 5  ;;  %v5804_v41 = vadd.f32 %v5773_v31, %v5477_v10 }
0x1529   :  { %3366 = vadd.xlane.f32.xlu0 %v3365_v9  ;;  %v5479_v9 = vadd.f32 %v7974_v44, %v9157_v12  ;;  %v7978_v44 = vld [vmem:[#allocation2 + $0x1f] sm:$0x1] }
0x152a   :  { %v5478_v57 = vadd.f32 %v7978_v44, %v9157_v12  ;;  %v5801_v38 = vadd.f32 %v5770_v46, %v5474_v56 }
0x152b   :  { %3369 = vadd.xlane.f32.xlu1 %v3368_v48  ;;  %v7976_v48 = vld [vmem:[#allocation2 + $0x17] sm:$0x1]  ;;  %v5806_v40 = vadd.f32 %v9167_v34, %v5479_v9 }
0x152c   :  { %v5476_v0 = vadd.f32 %v7976_v48, %v9157_v12  ;;  %v5807_v48 = vadd.f32 %v5775_v26, %v5480_v29  ;;  %v5805_v10 = vadd.f32 %v5774_v25, %v5478_v57  ;;  %v7919_v18 = vpop.eup %7918 }
0x152d   :  { %5107 = vadd.xlane.f32.xlu0 %v5106_v32  ;;  %v5768_v32 = vrot.slane %v9194_v42, 1 }
0x152e   :  { %v5803_v60 = vadd.f32 %v5772_v61, %v5476_v0 }
0x152f   :  { %5110 = vadd.xlane.f32.xlu1 %v5109_v8  ;;  %v5769_v8 = vrot.slane %v9194_v42, 2  ;;  %v5799_v45 = vadd.f32 %v5768_v32, %v5472_v58 }
0x1531   :  { %v5800_v2 = vadd.f32 %v5769_v8, %v5473_v19 }
0x154d   :  { %v7740_v6 = vpop.f32.mrf.mxu1 }
0x154e   :  { %v6104_v59 = vrot.slane %v7740_v6, 1  ;;  %v6105_v5 = vrot.slane %v7740_v6, 2  ;;  %v6106_v43 = vrot.slane %v7740_v6, 3  ;;  %v6107_v51 = vrot.slane %v7740_v6, 4 }
0x154f   :  { %v6135_v37 = vadd.f32 %v7740_v6, %v5806_v40  ;;  %v6086_v12 = vpop.f32.mrf.mxu1  ;;  %v6108_v44 = vrot.slane %v7740_v6, 5  ;;  %v6109_v34 = vrot.slane %v7740_v6, 6  ;;  %v6110_v9 = vrot.slane %v7740_v6, 7 }
0x1550   :  { %v6136_v29 = vadd.f32 %v6104_v59, %v5807_v48  ;;  %v6137_v3 = vadd.f32 %v6105_v5, %v9178_v63  ;;  %v6138_v58 = vadd.f32 %v6106_v43, %v9180_v7  ;;  %v6097_v19 = vrot.slane %v6086_v12, 1  ;;  %v7921_v5 = vpop.eup %7920 }
0x1551   :  { %v6098_v56 = vrot.slane %v6086_v12, 2  ;;  %v6099_v15 = vrot.slane %v6086_v12, 3  ;;  %v6100_v42 = vrot.slane %v6086_v12, 4  ;;  %v7754_v26 = vpop.f32.mrf.mxu1  ;;  %v6127_v0 = vadd.f32 %v6086_v12, %v5798_v24 }
0x1552   :  { %v6128_v32 = vadd.f32 %v6097_v19, %v5799_v45  ;;  %v6139_v8 = vadd.f32 %v6107_v51, %v9182_v22  ;;  %v6140_v46 = vadd.f32 %v6108_v44, %v9185_v4  ;;  %v6141_v63 = vadd.f32 %v6109_v34, %v9187_v13 }
0x1553   :  { %v6330_v61 = vpop.f32.mrf.mxu1  ;;  %v6129_v6 = vadd.f32 %v6098_v56, %v5800_v2  ;;  %v6130_v59 = vadd.f32 %v6099_v15, %v5801_v38  ;;  %v6142_v7 = vadd.f32 %v6110_v9, %v9189_v47  ;;  %v6101_v31 = vrot.slane %v6086_v12, 5  ;;  %v6582_v2 = vpop.permute.xlu1 %6581 }
0x1554   :  { %v6341_v43 = vmul.f32 %v7919_v18, %v6330_v61  ;;  %v6102_v40 = vrot.slane %v6086_v12, 6  ;;  %v6103_v48 = vrot.slane %v6086_v12, 7  ;;  %v6342_v24 = vmul.f32 %v7921_v5, %v7754_v26 }
0x1555   :  { %v6131_v45 = vadd.f32 %v6100_v42, %v5802_v52  ;;  %v6132_v51 = vadd.f32 %v6101_v31, %v5803_v60 }
0x1556   :  { %7757 = vmatprep.mubr.msk.f32.mxu1 %vm242_vm8, %v6341_v43  ;;  %v6133_v22 = vadd.f32 %v6102_v40, %v5804_v41  ;;  %v6134_v4 = vadd.f32 %v6103_v48, %v5805_v10 }
0x1557   :  { %7758 = vmatmul.mubr.msk.f32.vlgmr.msra.gmra.mxu1 %vm242_vm8, %v6342_v24 }
0x1558   :  { %7768 = vmatpush3.msra.mxu1 %v9238_v17  ;;  %7771 = vmatprep.mubr.msk.f32.mxu1 %vm326_vm9, %v9284_v54 }
0x1559   :  { %7769 = vmatprep.subr.mxu1 %v6582_v2 }
0x155a   :  { %7770 = vmatpush3.msra.mxu1 %v6582_v2 }
0x155b   :  { %7774 = vmatprep.subr.mxu1 %v8474_v36  ;;  %7772 = vmatmul.mubr.msk.f32.vlgmr.msra.gmra.mxu1 %vm326_vm9, %v9273_v49 }
0x155c   :  { %7775 = vmatpush3.msra.mxu1 %v8474_v36 }
0x15aa   :  { %v6580_v38 = vpop.xlane.xlu0 %6579 }
0x15ac   :  { %v6577_v52 = vpop.xlane.xlu1 %6576 }
0x15ad   :  { %7922 = vrcp.f32 %v6577_v52 }
0x15ae   :  { %7924 = vrcp.f32 %v6580_v38  ;;  %v1616_v2 = vpop.xlane.xlu0 %1615 }
0x15af   :  { %v9388_v52 = vmul.f32 0.03125, %v1616_v2 }
0x15ba   :  { %v7923_v61 = vpop.eup %7922 }
0x1617   :  { %v7759_v13 = vpop.f32.mrf.mxu1 }
0x1618   :  { %v6433_v47 = vrot.slane %v7759_v13, 1  ;;  %v6434_v41 = vrot.slane %v7759_v13, 2  ;;  %v6435_v17 = vrot.slane %v7759_v13, 3  ;;  %v6436_v60 = vrot.slane %v7759_v13, 4 }
0x1619   :  { %v9354_v57 = vadd.f32 %v7759_v13, %v6135_v37  ;;  %v6415_v54 = vpop.f32.mrf.mxu1  ;;  %v6437_v25 = vrot.slane %v7759_v13, 5  ;;  %v6438_v12 = vrot.slane %v7759_v13, 6  ;;  %v6439_v44 = vrot.slane %v7759_v13, 7 }
0x161a   :  { %v9356_v34 = vadd.f32 %v6433_v47, %v6136_v29  ;;  %v9358_v49 = vadd.f32 %v6434_v41, %v6137_v3  ;;  %v6426_v36 = vrot.slane %v6415_v54, 1  ;;  %v6427_v9 = vrot.slane %v6415_v54, 2 }
0x161b   :  { %v6428_v19 = vrot.slane %v6415_v54, 3  ;;  %v6429_v56 = vrot.slane %v6415_v54, 4  ;;  %v7773_v15 = vpop.f32.mrf.mxu1  ;;  %v9360_v42 = vadd.f32 %v6415_v54, %v6127_v0  ;;  %v9362_v26 = vadd.f32 %v6435_v17, %v6138_v58  ;;  %v7925_v0 = vpop.eup %7924 }
0x161c   :  { %v9364_v10 = vadd.f32 %v6426_v36, %v6128_v32  ;;  %v9366_v37 = vadd.f32 %v6427_v9, %v6129_v6  ;;  %v9368_v18 = vadd.f32 %v6436_v60, %v6139_v8  ;;  %v9372_v3 = vadd.f32 %v6437_v25, %v6140_v46 }
0x161d   :  { %v6659_v29 = vpop.f32.mrf.mxu1  ;;  %v9370_v5 = vadd.f32 %v6428_v19, %v6130_v59  ;;  %v9374_v43 = vadd.f32 %v6438_v12, %v6141_v63  ;;  %v9376_v31 = vadd.f32 %v6439_v44, %v6142_v7  ;;  %v6430_v58 = vrot.slane %v6415_v54, 5  ;;  %v1619_v63 = vpop.xlane.xlu1 %1618 }
0x161e   :  { %v6670_v40 = vmul.f32 %v7923_v61, %v6659_v29  ;;  %v6431_v48 = vrot.slane %v6415_v54, 6  ;;  %v6432_v32 = vrot.slane %v6415_v54, 7  ;;  %v6671_v24 = vmul.f32 %v7925_v0, %v7773_v15 }
0x161f   :  { %v9378_v6 = vadd.f32 %v6429_v56, %v6131_v45  ;;  %v9381_v8 = vadd.f32 %v6430_v58, %v6132_v51  ;;  %v1622_v7 = vmul.f32 0.03125, %v1619_v63  ;;  %v1625_v47 = vrot.slane %v9388_v52, 1 }
0x1620   :  { %7776 = vmatprep.mubr.msk.f32.mxu1 %vm242_vm8, %v6670_v40  ;;  %v9383_v59 = vadd.f32 %v6431_v48, %v6133_v22  ;;  %v9385_v46 = vadd.f32 %v6432_v32, %v6134_v4  ;;  %v1626_v4 = vrot.slane %v9388_v52, 2  ;;  %v1629_v63 = vrot.slane %v9388_v52, 5 }
0x1621   :  { %7777 = vmatmul.mubr.msk.f32.vlgmr.msra.gmra.mxu1 %vm242_vm8, %v6671_v24  ;;  %v1632_v38 = vrot.slane %v1622_v7, 1  ;;  %v1633_v13 = vrot.slane %v1622_v7, 2  ;;  %v3370_v51 = vpop.xlane.xlu1 %3369  ;;  %v1634_v41 = vrot.slane %v1622_v7, 3  ;;  %v9401_v60 = vsub.f32 %v10425_v21, %v1625_v47 }
0x1622   :  { %v9403_v54 = vmul.f32 0.03125, %v3370_v51  ;;  %v1635_v25 = vrot.slane %v1622_v7, 4  ;;  %v1636_v12 = vrot.slane %v1622_v7, 5  ;;  %v9411_v44 = vsub.f32 %v10427_v33, %v1626_v4 }
0x1623   :  { %v9391_v45 = vsub.f32 %v10426_v16, %v1632_v38  ;;  %v9395_v22 = vsub.f32 %v10429_v30, %v1633_v13  ;;  %10453 = vst [vmem:[#allocation16_spill] sm:$0xff] %v9401_v60  ;;  %v9406_v16 = vsub.f32 %v10430_v11, %v1622_v7  ;;  %v9414_v36 = vsub.f32 %v10432_v28, %v1634_v41 }
0x1624   :  { %10454 = vst [vmem:[#allocation14_spill] sm:$0xff] %v9411_v44  ;;  %v1627_v21 = vrot.slane %v9388_v52, 3  ;;  %v1672_v19 = vmul.f32 %v9401_v60, %v9401_v60  ;;  %v1637_v56 = vrot.slane %v1622_v7, 6  ;;  %v1628_v11 = vrot.slane %v9388_v52, 4 }
0x1625   :  { %v1680_v17 = vmul.f32 %v9391_v45, %v9391_v45  ;;  %v1681_v30 = vmul.f32 %v9395_v22, %v9395_v22  ;;  %v1638_v15 = vrot.slane %v1622_v7, 7  ;;  %v1679_v61 = vmul.f32 %v9406_v16, %v9406_v16  ;;  %v3367_v7 = vpop.xlane.xlu0 %3366  ;;  %v5111_v2 = vpop.xlane.xlu1 %5110 }
0x1626   :  { %v9424_v33 = vsub.f32 %v10428_v35, %v9388_v52  ;;  %v3382_v28 = vrot.slane %v9403_v54, 1  ;;  %v9428_v29 = vsub.f32 %v10436_v39, %v1635_v25  ;;  %v9431_v0 = vsub.f32 %v10440_v14, %v1636_v12 }
0x1627   :  { %v1717_v9 = vrot.slane %v1680_v17, 7  ;;  %v1719_v40 = vrot.slane %v1681_v30, 6  ;;  %v1673_v58 = vmul.f32 %v9411_v44, %v9411_v44  ;;  %v1682_v48 = vmul.f32 %v9414_v36, %v9414_v36 }
0x1628   :  { %v9439_v35 = vsub.f32 %v10431_v27, %v1627_v21  ;;  %v1703_v24 = vrot.slane %v1672_v19, 7  ;;  %v1630_v39 = vrot.slane %v9388_v52, 6  ;;  %v3383_v14 = vrot.slane %v9403_v54, 2 }
0x1629   :  { %v1718_v32 = vsel %vm102_vm0, %v1717_v9, %v1679_v61  ;;  %v9445_v38 = vsub.f32 %v10444_v53, %v1637_v56  ;;  %v9448_v13 = vsub.f32 %v10449_v55, %v1638_v15  ;;  %v1671_v47 = vmul.f32 %v9424_v33, %v9424_v33 }
0x162a   :  { %10455 = vst [vmem:[#allocation17_spill] sm:$0xff] %v9439_v35  ;;  %v9453_v27 = vsub.f32 %v8778_v20, %v3382_v28  ;;  %v1683_v51 = vmul.f32 %v9428_v29, %v9428_v29  ;;  %v1720_v4 = vsel %vm105_vm1, %v1719_v40, %v1718_v32  ;;  %v9459_v41 = vsub.f32 %v10435_v23, %v1628_v11  ;;  %v10461_v32 = vld [vmem:[#allocation21_spill] sm:$0xff] }
0x162b   :  { %v1705_v17 = vrot.slane %v1673_v58, 6  ;;  %v1684_v53 = vmul.f32 %v9431_v0, %v9431_v0  ;;  %v1721_v55 = vrot.slane %v1682_v48, 5  ;;  %v1674_v25 = vmul.f32 %v9439_v35, %v9439_v35 }
0x162c   :  { %10456 = vst [vmem:[#allocation15_spill] sm:$0xff] %v9453_v27  ;;  %10457 = vst [vmem:[#allocation22_spill] sm:$0xff] %v9459_v41  ;;  %v1704_v12 = vsel %vm102_vm0, %v1703_v24, %v1671_v47  ;;  %v9466_v20 = vmul.f32 0.03125, %v3367_v7  ;;  %v9468_v30 = vmul.f32 0.03125, %v5111_v2  ;;  %v1631_v9 = vrot.slane %v9388_v52, 7  ;;  %v10463_v47 = vld [vmem:[#allocation40_spill] sm:$0xff] }
0x162d   :  { %v9472_v21 = vsub.f32 %v10433_v50, %v3383_v14  ;;  %v1722_v23 = vsel %vm108_vm2, %v1721_v55, %v1720_v4  ;;  %v9476_v19 = vsub.f32 %v10438_v1, %v1629_v63  ;;  %v3384_v56 = vrot.slane %v9403_v54, 3 }
0x162e   :  { %v3430_v11 = vmul.f32 %v9453_v27, %v9453_v27  ;;  %v1685_v15 = vmul.f32 %v9445_v38, %v9445_v38  ;;  %v1723_v61 = vrot.slane %v1683_v51, 4  ;;  %v1675_v52 = vmul.f32 %v9459_v41, %v9459_v41  ;;  %v10469_v27 = vld [vmem:[#allocation32_spill] sm:$0xff] }
0x162f   :  { %10458 = vst [vmem:[#allocation13_spill] sm:$0xff] %v9472_v21  ;;  %10459 = vst [vmem:[#allocation18_spill] sm:$0xff] %v9476_v19  ;;  %v1706_v50 = vsel %vm105_vm1, %v1705_v17, %v1704_v12  ;;  %v1686_v28 = vmul.f32 %v9448_v13, %v9448_v13  ;;  %v1725_v40 = vrot.slane %v1684_v53, 3  ;;  %v1707_v1 = vrot.slane %v1674_v25, 5  ;;  %v10465_v17 = vld [vmem:[#allocation23_spill] sm:$0xff] }
0x1630   :  { %v9490_v58 = vsub.f32 %v10434_v62, %v9403_v54  ;;  %v1724_v48 = vsel %vm111_vm3, %v1723_v61, %v1722_v23  ;;  %v9494_v24 = vsub.f32 %v10461_v32, %v1630_v39  ;;  %v3385_v63 = vrot.slane %v9403_v54, 4 }
0x1631   :  { %v3431_v14 = vmul.f32 %v9472_v21, %v9472_v21  ;;  %v1676_v7 = vmul.f32 %v9476_v19, %v9476_v19  ;;  %v1708_v2 = vsel %vm108_vm2, %v1707_v1, %v1706_v50  ;;  %v9503_v51 = vsub.f32 %v10463_v47, %v3384_v56  ;;  %v5108_v50 = vpop.xlane.xlu0 %5107 }
0x1632   :  { %10460 = vst [vmem:[#allocation24_spill] sm:$0xff] %v9490_v58  ;;  %10462 = vst [vmem:[#allocation38_spill] sm:$0xff] %v9494_v24  ;;  %v3467_v62 = vrot.slane %v3430_v11, 7  ;;  %v1727_v4 = vrot.slane %v1685_v15, 2  ;;  %v9506_v53 = vsub.f32 %v10465_v17, %v1631_v9  ;;  %v1709_v39 = vrot.slane %v1675_v52, 4  ;;  %v10467_v15 = vld [vmem:[#allocation41_spill] sm:$0xff] }
0x1633   :  { %10464 = vst [vmem:[#allocation30_spill] sm:$0xff] %v9503_v51  ;;  %v3375_v55 = vrot.slane %v9466_v20, 1  ;;  %v1726_v25 = vsel %vm114_vm4, %v1725_v40, %v1724_v48  ;;  %v3386_v12 = vrot.slane %v9403_v54, 5  ;;  %v3387_v23 = vrot.slane %v9403_v54, 6 }
0x1634   :  { %10466 = vst [vmem:[#allocation19_spill] sm:$0xff] %v9506_v53  ;;  %v3429_v61 = vmul.f32 %v9490_v58, %v9490_v58  ;;  %v1677_v56 = vmul.f32 %v9494_v24, %v9494_v24  ;;  %v1710_v11 = vsel %vm111_vm3, %v1709_v39, %v1708_v2  ;;  %v9518_v9 = vsub.f32 %v10467_v15, %v3385_v63  ;;  %v10473_v15 = vld [vmem:[#allocation43_spill] sm:$0xff]  ;;  %v10507_v58 = vld [vmem:[#allocation48_spill] sm:$0xff] }
0x1635   :  { %v3469_v52 = vrot.slane %v3431_v14, 6  ;;  %v1711_v1 = vrot.slane %v1676_v7, 3  ;;  %v3432_v40 = vmul.f32 %v9503_v51, %v9503_v51  ;;  %v3376_v32 = vrot.slane %v9466_v20, 2  ;;  %v10471_v7 = vld [vmem:[#allocation42_spill] sm:$0xff]  ;;  %v10487_v51 = vld [vmem:[#allocation36_spill] sm:$0xff] }
0x1636   :  { %10468 = vst [vmem:[#allocation25_spill] sm:$0xff] %v9518_v9  ;;  %v3468_v48 = vsel %vm102_vm0, %v3467_v62, %v3429_v61  ;;  %v1728_v47 = vsel %vm117_vm5, %v1727_v4, %v1726_v25  ;;  %v1729_v17 = vrot.slane %v1686_v28, 1  ;;  %v3388_v21 = vrot.slane %v9403_v54, 7 }
0x1637   :  { %v9527_v2 = vsub.f32 %v10469_v27, %v3375_v55  ;;  %v1678_v63 = vmul.f32 %v9506_v53, %v9506_v53  ;;  %v1712_v14 = vsel %vm114_vm4, %v1711_v1, %v1710_v11  ;;  %v9533_v39 = vsub.f32 %v10471_v7, %v3386_v12  ;;  %v10475_v11 = vld [vmem:[#allocation33_spill] sm:$0xff]  ;;  %v10477_v1 = vld [vmem:[#allocation44_spill] sm:$0xff] }
0x1638   :  { %v9536_v62 = vsub.f32 %v10473_v15, %v3387_v23  ;;  %v9538_v61 = vmul.f32 0.03125, %v5108_v50  ;;  %v1713_v4 = vrot.slane %v1677_v56, 2  ;;  %v3433_v54 = vmul.f32 %v9518_v9, %v9518_v9  ;;  %v10509_v53 = vld [vmem:[#allocation56_spill] sm:$0xff] }
0x1639   :  { %10470 = vst [vmem:[#allocation20_spill] sm:$0xff] %v9527_v2  ;;  %10472 = vst [vmem:[#allocation26_spill] sm:$0xff] %v9533_v39  ;;  %v3470_v27 = vsel %vm105_vm1, %v3469_v52, %v3468_v48  ;;  %v9544_v28 = vsel %vm120_vm6, %v1729_v17, %v1728_v47  ;;  %v3471_v55 = vrot.slane %v3432_v40, 5  ;;  %v3377_v25 = vrot.slane %v9466_v20, 3 }
0x163a   :  { %10474 = vst [vmem:[#allocation27_spill] sm:$0xff] %v9536_v62  ;;  %v9548_v12 = vsub.f32 %v10475_v11, %v3376_v32  ;;  %v1714_v23 = vsel %vm117_vm5, %v1713_v4, %v1712_v14  ;;  %v9552_v50 = vsub.f32 %v10477_v1, %v3388_v21  ;;  %v3422_v56 = vmul.f32 %v9527_v2, %v9527_v2  ;;  %v10479_v14 = vld [vmem:[#allocation31_spill] sm:$0xff] }
0x163b   :  { %v5123_v7 = vrot.slane %v9468_v30, 1  ;;  %v1715_v52 = vrot.slane %v1678_v63, 1  ;;  %v3434_v48 = vmul.f32 %v9533_v39, %v9533_v39  ;;  %v3435_v40 = vmul.f32 %v9536_v62, %v9536_v62  ;;  %v10481_v63 = vld [vmem:[#allocation34_spill] sm:$0xff]  ;;  %v10485_v39 = vld [vmem:[#allocation35_spill] sm:$0xff] }
0x163c   :  { %10476 = vst [vmem:[#allocation28_spill] sm:$0xff] %v9548_v12  ;;  %10478 = vst [vmem:[#allocation21_spill] sm:$0xff] %v9552_v50  ;;  %v3472_v32 = vsel %vm108_vm2, %v3471_v55, %v3470_v27  ;;  %v3473_v47 = vrot.slane %v3433_v54, 4  ;;  %v3378_v17 = vrot.slane %v9466_v20, 4  ;;  %v3379_v21 = vrot.slane %v9466_v20, 5 }
0x163d   :  { %v9566_v15 = vsub.f32 %v10479_v14, %v9466_v20  ;;  %v9569_v4 = vsel %vm120_vm6, %v1715_v52, %v1714_v23  ;;  %v9572_v11 = vsub.f32 %v10481_v63, %v3377_v25  ;;  %v3423_v1 = vmul.f32 %v9548_v12, %v9548_v12  ;;  %v10483_v14 = vld [vmem:[#allocation29_spill] sm:$0xff] }
0x163e   :  { %v5124_v27 = vrot.slane %v9468_v30, 2  ;;  %v9579_v54 = vmul.f32 %v9552_v50, %v9552_v50  ;;  %v3474_v55 = vsel %vm111_vm3, %v3473_v47, %v3472_v32  ;;  %v3453_v2 = vrot.slane %v3422_v56, 7  ;;  %v10489_v47 = vld [vmem:[#allocation52_spill] sm:$0xff] }
0x163f   :  { %10480 = vst [vmem:[#allocation40_spill] sm:$0xff] %v9566_v15  ;;  %10482 = vst [vmem:[#allocation23_spill] sm:$0xff] %v9572_v11  ;;  %v9583_v62 = vsub.f32 %v10483_v14, %v5123_v7  ;;  %v3475_v23 = vrot.slane %v3434_v48, 3  ;;  %v3380_v52 = vrot.slane %v9466_v20, 6  ;;  %v3381_v25 = vrot.slane %v9466_v20, 7 }
0x1640   :  { %v5116_v63 = vrot.slane %v9538_v61, 1  ;;  %v3477_v12 = vrot.slane %v3435_v40, 2  ;;  %v9589_v9 = vsub.f32 %v10485_v39, %v3378_v17  ;;  %v9592_v50 = vsub.f32 %v10487_v51, %v3379_v21  ;;  %v10491_v21 = vld [vmem:[#allocation37_spill] sm:$0xff] }
0x1641   :  { %10484 = vst [vmem:[#allocation41_spill] sm:$0xff] %v9583_v62  ;;  %v3421_v56 = vmul.f32 %v9566_v15, %v9566_v15  ;;  %v3476_v7 = vsel %vm114_vm4, %v3475_v23, %v3474_v55  ;;  %v3424_v48 = vmul.f32 %v9572_v11, %v9572_v11  ;;  %v3455_v32 = vrot.slane %v3423_v1, 6  ;;  %v10493_v55 = vld [vmem:[#allocation39_spill] sm:$0xff]  ;;  %v10495_v11 = vld [vmem:[#allocation46_spill] sm:$0xff] }
0x1642   :  { %10486 = vst [vmem:[#allocation32_spill] sm:$0xff] %v9589_v9  ;;  %10488 = vst [vmem:[#allocation42_spill] sm:$0xff] %v9592_v50  ;;  %v9600_v20 = vsub.f32 %v10489_v47, %v5124_v27  ;;  %v5125_v39 = vrot.slane %v9468_v30, 3  ;;  %v5171_v51 = vmul.f32 %v9583_v62, %v9583_v62  ;;  %v5117_v17 = vrot.slane %v9538_v61, 2 }
0x1643   :  { %v3454_v40 = vsel %vm102_vm0, %v3453_v2, %v3421_v56  ;;  %v9608_v14 = vsub.f32 %v10491_v21, %v3380_v52  ;;  %v9611_v23 = vsub.f32 %v10493_v55, %v3381_v25  ;;  %v5126_v1 = vrot.slane %v9468_v30, 4  ;;  %v10497_v52 = vld [vmem:[#allocation12_spill] sm:$0xff] }
0x1644   :  { %10490 = vst [vmem:[#allocation43_spill] sm:$0xff] %v9600_v20  ;;  %v9615_v27 = vsub.f32 %v10495_v11, %v5116_v63  ;;  %v9618_v2 = vsel %vm117_vm5, %v3477_v12, %v3476_v7  ;;  %v3425_v56 = vmul.f32 %v9589_v9, %v9589_v9  ;;  %v9624_v47 = vmul.f32 %v9592_v50, %v9592_v50  ;;  %v10499_v7 = vld [vmem:[#allocation54_spill] sm:$0xff]  ;;  %v10501_v50 = vld [vmem:[#allocation47_spill] sm:$0xff] }
0x1645   :  { %10492 = vst [vmem:[#allocation33_spill] sm:$0xff] %v9608_v14  ;;  %10494 = vst [vmem:[#allocation44_spill] sm:$0xff] %v9611_v23  ;;  %v9628_v21 = vsub.f32 %v10497_v52, %v9468_v30  ;;  %v3456_v25 = vsel %vm105_vm1, %v3455_v32, %v3454_v40  ;;  %v3457_v55 = vrot.slane %v3424_v48, 5  ;;  %v5172_v11 = vmul.f32 %v9600_v20, %v9600_v20  ;;  %v10503_v32 = vld [vmem:[#allocation55_spill] sm:$0xff] }
0x1646   :  { %10496 = vst [vmem:[#allocation31_spill] sm:$0xff] %v9615_v27  ;;  %v5118_v12 = vrot.slane %v9538_v61, 3  ;;  %v5127_v63 = vrot.slane %v9468_v30, 5  ;;  %v9636_v62 = vsub.f32 %v10499_v7, %v5125_v39  ;;  %v5208_v9 = vrot.slane %v5171_v51, 7 }
0x1647   :  { %10498 = vst [vmem:[#allocation34_spill] sm:$0xff] %v9628_v21  ;;  %v9639_v15 = vsub.f32 %v10501_v50, %v5117_v17  ;;  %v9643_v52 = vmul.f32 %v9608_v14, %v9608_v14  ;;  %v5128_v48 = vrot.slane %v9468_v30, 6  ;;  %v9647_v40 = vsub.f32 %v10503_v32, %v5126_v1  ;;  %v10505_v1 = vld [vmem:[#allocation45_spill] sm:$0xff] }
0x1648   :  { %10500 = vst [vmem:[#allocation29_spill] sm:$0xff] %v9636_v62  ;;  %v5163_v20 = vmul.f32 %v9615_v27, %v9615_v27  ;;  %v9653_v39 = vmul.f32 %v9611_v23, %v9611_v23  ;;  %v3458_v51 = vsel %vm108_vm2, %v3457_v55, %v3456_v25  ;;  %v5170_v50 = vmul.f32 %v9628_v21, %v9628_v21 }
0x1649   :  { %10502 = vst [vmem:[#allocation35_spill] sm:$0xff] %v9639_v15  ;;  %10504 = vst [vmem:[#allocation36_spill] sm:$0xff] %v9647_v40  ;;  %v5119_v17 = vrot.slane %v9538_v61, 4  ;;  %v5129_v7 = vrot.slane %v9468_v30, 7  ;;  %v5210_v14 = vrot.slane %v5172_v11, 6  ;;  %v9662_v32 = vsub.f32 %v10505_v1, %v9538_v61  ;;  %v10511_v11 = vld [vmem:[#allocation57_spill] sm:$0xff] }
0x164a   :  { %v9665_v27 = vsub.f32 %v10507_v58, %v5118_v12  ;;  %v9668_v23 = vsub.f32 %v10509_v53, %v5127_v63  ;;  %v5173_v25 = vmul.f32 %v9636_v62, %v9636_v62  ;;  %v5209_v55 = vsel %vm102_vm0, %v5208_v9, %v5170_v50  ;;  %v10513_v62 = vld [vmem:[#allocation49_spill] sm:$0xff] }
0x164b   :  { %10506 = vst [vmem:[#allocation52_spill] sm:$0xff] %v9662_v32  ;;  %v5164_v21 = vmul.f32 %v9639_v15, %v9639_v15  ;;  %v3459_v30 = vrot.slane %v3425_v56, 4  ;;  %v9676_v24 = vsub.f32 %v10511_v11, %v5128_v48  ;;  %v9680_v1 = vmul.f32 %v9647_v40, %v9647_v40  ;;  %v10515_v11 = vld [vmem:[#allocation58_spill] sm:$0xff] }
0x164c   :  { %10508 = vst [vmem:[#allocation37_spill] sm:$0xff] %v9665_v27  ;;  %10510 = vst [vmem:[#allocation39_spill] sm:$0xff] %v9668_v23  ;;  %v5194_v58 = vrot.slane %v5163_v20, 7  ;;  %v5120_v12 = vrot.slane %v9538_v61, 5  ;;  %v5121_v63 = vrot.slane %v9538_v61, 6  ;;  %v9686_v9 = vsub.f32 %v10513_v62, %v5119_v17 }
0x164d   :  { %10512 = vst [vmem:[#allocation46_spill] sm:$0xff] %v9676_v24  ;;  %v9689_v50 = vsel %vm111_vm3, %v3459_v30, %v3458_v51  ;;  %v5211_v56 = vsel %vm105_vm1, %v5210_v14, %v5209_v55  ;;  %v5162_v48 = vmul.f32 %v9662_v32, %v9662_v32  ;;  %v9696_v20 = vmul.f32 %v9665_v27, %v9665_v27 }
0x164e   :  { %10514 = vst [vmem:[#allocation12_spill] sm:$0xff] %v9686_v9  ;;  %v9699_v53 = vsub.f32 %v10515_v11, %v5129_v7  ;;  %v9703_v15 = vmul.f32 %v9668_v23, %v9668_v23  ;;  %v5212_v62 = vrot.slane %v5173_v25, 5  ;;  %v5196_v17 = vrot.slane %v5164_v21, 6  ;;  %v10516_v11 = vld [vmem:[#allocation50_spill] sm:$0xff]  ;;  %v10517_v23 = vld [vmem:[#allocation51_spill] sm:$0xff] }
0x164f   :  { %v9707_v51 = vmul.f32 %v9676_v24, %v9676_v24  ;;  %v5195_v30 = vsel %vm102_vm0, %v5194_v58, %v5162_v48  ;;  %v9716_v32 = vsub.f32 %v10516_v11, %v5120_v12  ;;  %v9719_v25 = vsub.f32 %v10517_v23, %v5121_v63 }
0x1650   :  { %v9713_v7 = vsel %vm108_vm2, %v5212_v62, %v5211_v56  ;;  %v9723_v21 = vmul.f32 %v9686_v9, %v9686_v9  ;;  %v5198_v55 = vrot.slane %v9696_v20, 5  ;;  %v5197_v62 = vsel %vm105_vm1, %v5196_v17, %v5195_v30 }
0x16e1   :  { %v7778_v27 = vpop.f32.mrf.mxu1 }
0x16e2   :  { %v6762_v24 = vrot.slane %v7778_v27, 1  ;;  %v6763_v14 = vrot.slane %v7778_v27, 2  ;;  %v6764_v40 = vrot.slane %v7778_v27, 3  ;;  %v6765_v48 = vrot.slane %v7778_v27, 4 }
0x16e3   :  { %v6744_v58 = vpop.f32.mrf.mxu1  ;;  %v6766_v19 = vrot.slane %v7778_v27, 5  ;;  %v6767_v56 = vrot.slane %v7778_v27, 6  ;;  %v9731_v9 = vadd.f32 %v7778_v27, %v9354_v57  ;;  %v6768_v35 = vrot.slane %v7778_v27, 7 }
0x16e4   :  { %v9728_v12 = vadd.f32 %v6762_v24, %v9356_v34  ;;  %v6755_v23 = vrot.slane %v6744_v58, 1  ;;  %v6756_v63 = vrot.slane %v6744_v58, 2  ;;  %v6757_v11 = vrot.slane %v6744_v58, 3 }
0x16e5   :  { %v6758_v41 = vrot.slane %v6744_v58, 4  ;;  %v9734_v44 = vadd.f32 %v6763_v14, %v9358_v49  ;;  %v6759_v20 = vrot.slane %v6744_v58, 5  ;;  %v9737_v60 = vadd.f32 %v6744_v58, %v9360_v42 }
0x16e6   :  { %v9740_v17 = vadd.f32 %v6755_v23, %v9364_v10  ;;  %v9743_v34 = vadd.f32 %v6764_v40, %v9362_v26  ;;  %v9746_v24 = vadd.f32 %v6756_v63, %v9366_v37  ;;  %v9749_v57 = vadd.f32 %v6757_v11, %v9370_v5 }
0x16e7   :  { %v9752_v27 = vadd.f32 %v6765_v48, %v9368_v18  ;;  %v9755_v49 = vadd.f32 %v6766_v19, %v9372_v3  ;;  %v9759_v10 = vadd.f32 %v6767_v56, %v9374_v43  ;;  %v6831_v26 = vrot.slane %v9728_v12, 7 }
0x16e8   :  { %v6817_v42 = vrot.slane %v9740_v17, 7  ;;  %v6833_v40 = vrot.slane %v9734_v44, 6  ;;  %v9764_v37 = vadd.f32 %v6768_v35, %v9376_v31  ;;  %v6835_v5 = vrot.slane %v9743_v34, 5 }
0x16e9   :  { %v6837_v18 = vrot.slane %v9752_v27, 4  ;;  %v6839_v14 = vrot.slane %v9755_v49, 3  ;;  %v6832_v3 = vsel %vm102_vm0, %v6831_v26, %v9731_v9  ;;  %v6760_v19 = vrot.slane %v6744_v58, 6 }
0x16ea   :  { %v6761_v30 = vrot.slane %v6744_v58, 7  ;;  %v9772_v43 = vadd.f32 %v6758_v41, %v9378_v6  ;;  %v6834_v48 = vsel %vm105_vm1, %v6833_v40, %v6832_v3  ;;  %v9776_v56 = vadd.f32 %v6759_v20, %v9381_v8 }
0x16eb   :  { %v6818_v31 = vsel %vm102_vm0, %v6817_v42, %v9737_v60  ;;  %v6819_v35 = vrot.slane %v9746_v24, 6  ;;  %v6836_v23 = vsel %vm108_vm2, %v6835_v5, %v6834_v48  ;;  %v9783_v63 = vadd.f32 %v6760_v19, %v9383_v59 }
0x16ec   :  { %v9786_v58 = vadd.f32 %v6761_v30, %v9385_v46  ;;  %v6821_v6 = vrot.slane %v9749_v57, 5  ;;  %v6838_v41 = vsel %vm111_vm3, %v6837_v18, %v6836_v23  ;;  %v6841_v8 = vrot.slane %v9759_v10, 2 }
0x16ed   :  { %v6820_v11 = vsel %vm105_vm1, %v6819_v35, %v6818_v31  ;;  %v6823_v20 = vrot.slane %v9772_v43, 4  ;;  %v6840_v42 = vsel %vm114_vm4, %v6839_v14, %v6838_v41  ;;  %v6843_v26 = vrot.slane %v9764_v37, 1 }
0x16ee   :  { %v6822_v59 = vsel %vm108_vm2, %v6821_v6, %v6820_v11  ;;  %v6825_v40 = vrot.slane %v9776_v56, 3  ;;  %v6842_v46 = vsel %vm117_vm5, %v6841_v8, %v6840_v42  ;;  %v6827_v18 = vrot.slane %v9783_v63, 2  ;;  %v10521_v42 = vld [vmem:[#allocation53_spill] sm:$0xff] }
0x16ef   :  { %v6824_v5 = vsel %vm111_vm3, %v6823_v20, %v6822_v59  ;;  %v5167_v3 = vmul.f32 %v9716_v32, %v9716_v32  ;;  %v6844_v19 = vsel %vm120_vm6, %v6843_v26, %v6842_v46  ;;  %v6829_v14 = vrot.slane %v9786_v58, 1 }
0x16f0   :  { %v6826_v30 = vsel %vm114_vm4, %v6825_v40, %v6824_v5  ;;  %v5199_v48 = vsel %vm108_vm2, %v5198_v55, %v5197_v62  ;;  %v6850_v31 = vsel %vm136_vm7, %v6844_v19, 0.0  ;;  %v10518_v23 = vrot.slane %v9680_v1, 4 }
0x16f1   :  { %v6828_v35 = vsel %vm117_vm5, %v6827_v18, %v6826_v30  ;;  %v5200_v41 = vrot.slane %v9723_v21, 4  ;;  %6851 = vadd.xlane.f32.xlu1 %v6850_v31  ;;  %v10519_v11 = vrot.slane %v9624_v47, 3  ;;  %v5216_v55 = vrot.slane %v9703_v15, 3 }
0x16f2   :  { %v5215_v6 = vsel %vm111_vm3, %v10518_v23, %v9713_v7  ;;  %v6830_v8 = vsel %vm120_vm6, %v6829_v14, %v6828_v35  ;;  %v10520_v62 = vrot.slane %v9538_v61, 7  ;;  %v3463_v7 = vrot.slane %v9643_v52, 2 }
0x16f3   :  { %v3462_v20 = vsel %vm114_vm4, %v10519_v11, %v9689_v50  ;;  %v6847_v1 = vsel %vm136_vm7, %v6830_v8, 0.0  ;;  %v5168_v21 = vmul.f32 %v9719_v25, %v9719_v25  ;;  %v5201_v59 = vsel %vm111_vm3, %v5200_v41, %v5199_v48 }
0x16f4   :  { %v9822_v26 = vsub.f32 %v10521_v42, %v10520_v62  ;;  %6848 = vadd.xlane.f32.xlu0 %v6847_v1  ;;  %v3479_v47 = vrot.slane %v9579_v54, 1  ;;  %v5177_v15 = vmul.f32 %v9699_v53, %v9699_v53  ;;  %v5217_v61 = vsel %vm114_vm4, %v5216_v55, %v5215_v6 }
0x16f5   :  { %v5202_v50 = vrot.slane %v5167_v3, 3  ;;  %v1736_v40 = vsel %vm136_vm7, %v9544_v28, 0.0  ;;  %v3464_v46 = vsel %vm117_vm5, %v3463_v7, %v3462_v20  ;;  %v5218_v52 = vrot.slane %v9707_v51, 2 }
0x16f6   :  { %1737 = vadd.xlane.f32.xlu1 %v1736_v40  ;;  %v3480_v5 = vsel %vm120_vm6, %v3479_v47, %v9618_v2  ;;  %v3465_v18 = vrot.slane %v9653_v39, 1  ;;  %v5169_v54 = vmul.f32 %v9822_v26, %v9822_v26  ;;  %v1733_v3 = vsel %vm136_vm7, %v9569_v4, 0.0 }
0x16f7   :  { %v5203_v19 = vsel %vm114_vm4, %v5202_v50, %v5201_v59  ;;  %v5219_v28 = vsel %vm117_vm5, %v5218_v52, %v5217_v61  ;;  %v5204_v30 = vrot.slane %v5168_v21, 2  ;;  %v5220_v14 = vrot.slane %v5177_v15, 1 }
0x16f8   :  { %1734 = vadd.xlane.f32.xlu0 %v1733_v3  ;;  %v3466_v51 = vsel %vm120_vm6, %v3465_v18, %v3464_v46  ;;  %v3486_v48 = vsel %vm136_vm7, %v3480_v5, 0.0  ;;  %v5206_v31 = vrot.slane %v5169_v54, 1 }
0x16f9   :  { %v5205_v2 = vsel %vm117_vm5, %v5204_v30, %v5203_v19  ;;  %v5221_v39 = vsel %vm120_vm6, %v5220_v14, %v5219_v28  ;;  %v3483_v35 = vsel %vm136_vm7, %v3466_v51, 0.0 }
0x16fa   :  { %3487 = vadd.xlane.f32.xlu1 %v3486_v48  ;;  %v5207_v4 = vsel %vm120_vm6, %v5206_v31, %v5205_v2  ;;  %v5227_v23 = vsel %vm136_vm7, %v5221_v39, 0.0 }
0x16fb   :  { %v5224_v6 = vsel %vm136_vm7, %v5207_v4, 0.0 }
0x16fc   :  { %3484 = vadd.xlane.f32.xlu0 %v3483_v35 }
0x16fe   :  { %5228 = vadd.xlane.f32.xlu1 %v5227_v23 }
0x1700   :  { %5225 = vadd.xlane.f32.xlu0 %v5224_v6 }
0x177a   :  { %v6852_v41 = vpop.xlane.xlu1 %6851 }
0x177b   :  { %v6854_v8 = vmul.f32 0.03125, %v6852_v41 }
0x177d   :  { %v6849_v11 = vpop.xlane.xlu0 %6848  ;;  %v6864_v55 = vrot.slane %v6854_v8, 1  ;;  %v6865_v62 = vrot.slane %v6854_v8, 2  ;;  %v6866_v42 = vrot.slane %v6854_v8, 3  ;;  %v6867_v7 = vrot.slane %v6854_v8, 4 }
0x177e   :  { %v9854_v20 = vmul.f32 0.03125, %v6849_v11  ;;  %v6868_v21 = vrot.slane %v6854_v8, 5  ;;  %v6869_v59 = vrot.slane %v6854_v8, 6  ;;  %v6870_v47 = vrot.slane %v6854_v8, 7 }
0x177f   :  { %v1738_v1 = vpop.xlane.xlu1 %1737  ;;  %v9857_v61 = vsub.f32 %v9731_v9, %v6854_v8  ;;  %v9860_v50 = vsub.f32 %v9728_v12, %v6864_v55  ;;  %v9863_v40 = vsub.f32 %v9734_v44, %v6865_v62  ;;  %v9866_v52 = vsub.f32 %v9743_v34, %v6866_v42 }
0x1780   :  { %v1740_v15 = vmul.f32 0.03125, %v1738_v1  ;;  %v9869_v5 = vsub.f32 %v9752_v27, %v6867_v7  ;;  %v9872_v18 = vsub.f32 %v9755_v49, %v6868_v21  ;;  %v9875_v54 = vsub.f32 %v9759_v10, %v6869_v59 }
0x1781   :  { %v1735_v46 = vpop.xlane.xlu0 %1734  ;;  %v9878_v12 = vsub.f32 %v9764_v37, %v6870_v47  ;;  %v6911_v44 = vmul.f32 %v9857_v61, %v9857_v61  ;;  %v6912_v34 = vmul.f32 %v9860_v50, %v9860_v50  ;;  %v6913_v27 = vmul.f32 %v9863_v40, %v9863_v40 }
0x1782   :  { %v1742_v9 = vadd.f32 1e-05, %v1740_v15  ;;  %v1739_v19 = vmul.f32 0.03125, %v1735_v46  ;;  %v6914_v49 = vmul.f32 %v9866_v52, %v9866_v52  ;;  %v6915_v10 = vmul.f32 %v9869_v5, %v9869_v5 }
0x1783   :  { %v3488_v3 = vpop.xlane.xlu1 %3487  ;;  %v6916_v30 = vmul.f32 %v9872_v18, %v9872_v18  ;;  %v6917_v14 = vmul.f32 %v9875_v54, %v9875_v54  ;;  %v6918_v48 = vmul.f32 %v9878_v12, %v9878_v12  ;;  %v6949_v2 = vrot.slane %v6912_v34, 7 }
0x1784   :  { %7926 = vrsqrt.f32 %v1742_v9  ;;  %v1741_v28 = vadd.f32 1e-05, %v1739_v19  ;;  %v3490_v37 = vmul.f32 0.03125, %v3488_v3  ;;  %v6951_v39 = vrot.slane %v6913_v27, 6 }
0x1785   :  { %v3485_v51 = vpop.xlane.xlu0 %3484  ;;  %v6950_v23 = vsel %vm102_vm0, %v6949_v2, %v6911_v44  ;;  %v6953_v6 = vrot.slane %v6914_v49, 5  ;;  %v6955_v41 = vrot.slane %v6915_v10, 4  ;;  %v6957_v8 = vrot.slane %v6916_v30, 3 }
0x1786   :  { %7928 = vrsqrt.f32 %v1741_v28  ;;  %v3492_v31 = vadd.f32 1e-05, %v3490_v37  ;;  %v3489_v35 = vmul.f32 0.03125, %v3485_v51  ;;  %v6952_v62 = vsel %vm105_vm1, %v6951_v39, %v6950_v23 }
0x1787   :  { %v5229_v4 = vpop.xlane.xlu1 %5228  ;;  %v6959_v42 = vrot.slane %v6917_v14, 2  ;;  %v6954_v7 = vsel %vm108_vm2, %v6953_v6, %v6952_v62  ;;  %v6961_v21 = vrot.slane %v6918_v48, 1  ;;  %v6857_v59 = vrot.slane %v9854_v20, 1 }
0x1788   :  { %v3491_v11 = vadd.f32 1e-05, %v3489_v35  ;;  %v5231_v55 = vmul.f32 0.03125, %v5229_v4  ;;  %7930 = vrsqrt.f32 %v3492_v31  ;;  %v6956_v46 = vsel %vm111_vm3, %v6955_v41, %v6954_v7  ;;  %v9960_v35 = vld [vmem:[#allocation7 + $0x2] ss:$0 sm:$0xff] }
0x1789   :  { %v5226_v1 = vpop.xlane.xlu0 %5225  ;;  %v6858_v9 = vrot.slane %v9854_v20, 2  ;;  %v6958_v19 = vsel %vm114_vm4, %v6957_v8, %v6956_v46  ;;  %v6859_v44 = vrot.slane %v9854_v20, 3  ;;  %v6860_v3 = vrot.slane %v9854_v20, 4 }
0x178a   :  { %v5233_v47 = vadd.f32 1e-05, %v5231_v55  ;;  %v5230_v15 = vmul.f32 0.03125, %v5226_v1  ;;  %v6861_v34 = vrot.slane %v9854_v20, 5  ;;  %7932 = vrsqrt.f32 %v3491_v11  ;;  %v9963_v1 = vld [vmem:[#allocation7 + $0x3] ss:$0 sm:$0xff] }
0x178b   :  { %v6960_v49 = vsel %vm117_vm5, %v6959_v42, %v6958_v19  ;;  %v6862_v10 = vrot.slane %v9854_v20, 6  ;;  %v6863_v37 = vrot.slane %v9854_v20, 7  ;;  %v9912_v30 = vsub.f32 %v9737_v60, %v9854_v20 }
0x178c   :  { %v5232_v27 = vadd.f32 1e-05, %v5230_v15  ;;  %v6962_v28 = vsel %vm120_vm6, %v6961_v21, %v6960_v49  ;;  %v9915_v51 = vsub.f32 %v9740_v17, %v6857_v59  ;;  %7934 = vrsqrt.f32 %v5233_v47 }
0x178d   :  { %v6968_v14 = vsel %vm136_vm7, %v6962_v28, 0.0  ;;  %v9919_v48 = vsub.f32 %v9746_v24, %v6858_v9  ;;  %v9922_v2 = vsub.f32 %v9749_v57, %v6859_v44  ;;  %v9925_v39 = vsub.f32 %v9772_v43, %v6860_v3 }
0x178e   :  { %7936 = vrsqrt.f32 %v5232_v27  ;;  %6969 = vadd.xlane.f32.xlu1 %v6968_v14  ;;  %v9928_v60 = vsub.f32 %v9776_v56, %v6861_v34  ;;  %v9931_v17 = vsub.f32 %v9783_v63, %v6862_v10  ;;  %v9934_v20 = vsub.f32 %v9786_v58, %v6863_v37 }
0x178f   :  { %v9938_v24 = vmul.f32 %v9912_v30, %v9912_v30  ;;  %v9942_v57 = vmul.f32 %v9915_v51, %v9915_v51  ;;  %v9946_v43 = vmul.f32 %v9919_v48, %v9919_v48  ;;  %v9950_v56 = vmul.f32 %v9922_v2, %v9922_v2 }
0x1790   :  { %v9954_v63 = vmul.f32 %v9925_v39, %v9925_v39  ;;  %v9958_v58 = vmul.f32 %v9928_v60, %v9928_v60 }
0x1791   :  { %v7927_v31 = vpop.eup %7926 }
0x1792   :  { %v1754_v4 = vrot.slane %v7927_v31, 1  ;;  %v1755_v23 = vrot.slane %v7927_v31, 2  ;;  %v1756_v6 = vrot.slane %v7927_v31, 3  ;;  %v1757_v41 = vrot.slane %v7927_v31, 4 }
0x1793   :  { %v7929_v8 = vpop.eup %7928  ;;  %v1758_v11 = vrot.slane %v7927_v31, 5  ;;  %v1759_v55 = vrot.slane %v7927_v31, 6  ;;  %v1760_v62 = vrot.slane %v7927_v31, 7  ;;  %v1785_v42 = vmul.f32 %v7927_v31, %v9406_v16 }
0x1794   :  { %v1786_v7 = vmul.f32 %v1754_v4, %v9391_v45  ;;  %v1787_v21 = vmul.f32 %v1755_v23, %v9395_v22  ;;  %v1788_v59 = vmul.f32 %v1756_v6, %v9414_v36  ;;  %v1789_v47 = vmul.f32 %v1757_v41, %v9428_v29 }
0x1795   :  { %v1790_v15 = vmul.f32 %v1758_v11, %v9431_v0  ;;  %v1791_v46 = vmul.f32 %v1759_v55, %v9445_v38  ;;  %v1792_v9 = vmul.f32 %v1760_v62, %v9448_v13  ;;  %v1805_v19 = vmul.f32 %v9960_v35, %v1785_v42  ;;  %v9973_v44 = vpop.eup %7930 }
0x1796   :  { %v1806_v16 = vmul.f32 %v9960_v35, %v1786_v7  ;;  %v1807_v45 = vmul.f32 %v9960_v35, %v1787_v21  ;;  %v1808_v22 = vmul.f32 %v9960_v35, %v1788_v59  ;;  %v1809_v36 = vmul.f32 %v9960_v35, %v1789_v47  ;;  %v10522_v7 = vld [vmem:[#allocation16_spill] sm:$0xff]  ;;  %v10523_v47 = vld [vmem:[#allocation14_spill] sm:$0xff] }
0x1797   :  { %v1810_v29 = vmul.f32 %v9960_v35, %v1790_v15  ;;  %v1811_v0 = vmul.f32 %v9960_v35, %v1791_v46  ;;  %v1812_v38 = vmul.f32 %v9960_v35, %v1792_v9  ;;  %v1825_v13 = vadd.f32 %v9963_v1, %v1805_v19  ;;  %v9987_v10 = vpop.eup %7932  ;;  %v10524_v46 = vld [vmem:[#allocation17_spill] sm:$0xff]  ;;  %v10525_v19 = vld [vmem:[#allocation22_spill] sm:$0xff] }
0x1798   :  { %v1826_v3 = vadd.f32 %v9963_v1, %v1806_v16  ;;  %v1827_v34 = vadd.f32 %v9963_v1, %v1807_v45  ;;  %v1828_v27 = vadd.f32 %v9963_v1, %v1808_v22  ;;  %v1829_v49 = vadd.f32 %v9963_v1, %v1809_v36  ;;  %v10526_v45 = vld [vmem:[#allocation18_spill] sm:$0xff] }
0x1799   :  { %v1830_v28 = vadd.f32 %v9963_v1, %v1810_v29  ;;  %v1831_v37 = vadd.f32 %v9963_v1, %v1811_v0  ;;  %v1832_v14 = vadd.f32 %v9963_v1, %v1812_v38  ;;  %1842 = vst.msk [vmem:[#allocation8 + $0x20] sm:$0x1] %vm1833_vm10, %v1825_v13  ;;  %v1747_v31 = vrot.slane %v7929_v8, 1  ;;  %v9997_v11 = vpop.eup %7934  ;;  %v10527_v36 = vld [vmem:[#allocation38_spill] sm:$0xff]  ;;  %v10528_v0 = vld [vmem:[#allocation19_spill] sm:$0xff] }
0x179a   :  { %1843 = vst.msk [vmem:[#allocation8 + $0x24] sm:$0x1] %vm1833_vm10, %v1826_v3  ;;  %1844 = vst.msk [vmem:[#allocation8 + $0x28] sm:$0x1] %vm1833_vm10, %v1827_v34  ;;  %v1748_v4 = vrot.slane %v7929_v8, 2  ;;  %v1749_v23 = vrot.slane %v7929_v8, 3  ;;  %v1777_v42 = vmul.f32 %v7929_v8, %v9424_v33 }
0x179b   :  { %1845 = vst.msk [vmem:[#allocation8 + $0x2c] sm:$0x1] %vm1833_vm10, %v1828_v27  ;;  %1846 = vst.msk [vmem:[#allocation8 + $0x30] sm:$0x1] %vm1833_vm10, %v1829_v49  ;;  %v1750_v6 = vrot.slane %v7929_v8, 4  ;;  %v1751_v41 = vrot.slane %v7929_v8, 5  ;;  %v1778_v21 = vmul.f32 %v1747_v31, %v10522_v7  ;;  %v10004_v59 = vpop.eup %7936 }
0x179c   :  { %1847 = vst.msk [vmem:[#allocation8 + $0x34] sm:$0x1] %vm1833_vm10, %v1830_v28  ;;  %1848 = vst.msk [vmem:[#allocation8 + $0x38] sm:$0x1] %vm1833_vm10, %v1831_v37  ;;  %v1752_v55 = vrot.slane %v7929_v8, 6  ;;  %v1753_v62 = vrot.slane %v7929_v8, 7  ;;  %v1779_v15 = vmul.f32 %v1748_v4, %v10523_v47  ;;  %v1780_v9 = vmul.f32 %v1749_v23, %v10524_v46 }
0x179d   :  { %1849 = vst.msk [vmem:[#allocation8 + $0x3c] sm:$0x1] %vm1833_vm10, %v1832_v14  ;;  %v1781_v16 = vmul.f32 %v1750_v6, %v10525_v19  ;;  %v1782_v22 = vmul.f32 %v1751_v41, %v10526_v45  ;;  %v1797_v13 = vmul.f32 %v9960_v35, %v1777_v42  ;;  %v1798_v33 = vmul.f32 %v9960_v35, %v1778_v21 }
0x179e   :  { %v1783_v29 = vmul.f32 %v1752_v55, %v10527_v36  ;;  %v1784_v38 = vmul.f32 %v1753_v62, %v10528_v0  ;;  %v1799_v8 = vmul.f32 %v9960_v35, %v1779_v15  ;;  %v1800_v3 = vmul.f32 %v9960_v35, %v1780_v9  ;;  %v10529_v9 = vld [vmem:[#allocation24_spill] sm:$0xff] }
0x179f   :  { %v1801_v34 = vmul.f32 %v9960_v35, %v1781_v16  ;;  %v1802_v27 = vmul.f32 %v9960_v35, %v1782_v22  ;;  %v1817_v37 = vadd.f32 %v9963_v1, %v1797_v13  ;;  %v1818_v14 = vadd.f32 %v9963_v1, %v1798_v33  ;;  %v10530_v16 = vld [vmem:[#allocation15_spill] sm:$0xff]  ;;  %v10531_v22 = vld [vmem:[#allocation13_spill] sm:$0xff]  ;;  %v10534_v33 = vld [vmem:[#allocation26_spill] sm:$0xff] }
0x17a0   :  { %v1803_v49 = vmul.f32 %v9960_v35, %v1783_v29  ;;  %v1804_v28 = vmul.f32 %v9960_v35, %v1784_v38  ;;  %v1819_v31 = vadd.f32 %v9963_v1, %v1799_v8  ;;  %v1820_v4 = vadd.f32 %v9963_v1, %v1800_v3  ;;  %v10532_v29 = vld [vmem:[#allocation30_spill] sm:$0xff]  ;;  %v10533_v38 = vld [vmem:[#allocation25_spill] sm:$0xff]  ;;  %v10535_v3 = vld [vmem:[#allocation27_spill] sm:$0xff] }
0x17a1   :  { %v1821_v23 = vadd.f32 %v9963_v1, %v1801_v34  ;;  %v1822_v6 = vadd.f32 %v9963_v1, %v1802_v27  ;;  %1834 = vst.msk [vmem:[#allocation8] sm:$0x1] %vm1833_vm10, %v1817_v37  ;;  %1835 = vst.msk [vmem:[#allocation8 + $0x4] sm:$0x1] %vm1833_vm10, %v1818_v14  ;;  %v3504_v62 = vrot.slane %v9973_v44, 1  ;;  %v3505_v42 = vrot.slane %v9973_v44, 2 }
0x17a2   :  { %v1823_v41 = vadd.f32 %v9963_v1, %v1803_v49  ;;  %v1824_v55 = vadd.f32 %v9963_v1, %v1804_v28  ;;  %1836 = vst.msk [vmem:[#allocation8 + $0x8] sm:$0x1] %vm1833_vm10, %v1819_v31  ;;  %1837 = vst.msk [vmem:[#allocation8 + $0xc] sm:$0x1] %vm1833_vm10, %v1820_v4  ;;  %v3506_v7 = vrot.slane %v9973_v44, 3  ;;  %v3507_v21 = vrot.slane %v9973_v44, 4 }
0x17a3   :  { %1838 = vst.msk [vmem:[#allocation8 + $0x10] sm:$0x1] %vm1833_vm10, %v1821_v23  ;;  %1839 = vst.msk [vmem:[#allocation8 + $0x14] sm:$0x1] %vm1833_vm10, %v1822_v6  ;;  %v3508_v47 = vrot.slane %v9973_v44, 5  ;;  %v3509_v15 = vrot.slane %v9973_v44, 6  ;;  %v3535_v19 = vmul.f32 %v9973_v44, %v10529_v9  ;;  %v3536_v45 = vmul.f32 %v3504_v62, %v10530_v16 }
0x17a4   :  { %1840 = vst.msk [vmem:[#allocation8 + $0x18] sm:$0x1] %vm1833_vm10, %v1823_v41  ;;  %1841 = vst.msk [vmem:[#allocation8 + $0x1c] sm:$0x1] %vm1833_vm10, %v1824_v55  ;;  %v3510_v46 = vrot.slane %v9973_v44, 7  ;;  %v3537_v36 = vmul.f32 %v3505_v42, %v10531_v22  ;;  %v3538_v0 = vmul.f32 %v3506_v7, %v10532_v29  ;;  %v3539_v13 = vmul.f32 %v3507_v21, %v10533_v38  ;;  %v10536_v27 = vld [vmem:[#allocation21_spill] sm:$0xff] }
0x17a5   :  { %v3540_v8 = vmul.f32 %v3508_v47, %v10534_v33  ;;  %v3541_v34 = vmul.f32 %v3509_v15, %v10535_v3  ;;  %v3551_v28 = vmul.f32 %v9960_v35, %v3535_v19  ;;  %v3552_v37 = vmul.f32 %v9960_v35, %v3536_v45  ;;  %v10537_v29 = vld [vmem:[#allocation40_spill] sm:$0xff]  ;;  %v10540_v3 = vld [vmem:[#allocation23_spill] sm:$0xff] }
0x17a6   :  { %v3542_v49 = vmul.f32 %v3510_v46, %v10536_v27  ;;  %v3553_v44 = vmul.f32 %v9960_v35, %v3537_v36  ;;  %v3554_v14 = vmul.f32 %v9960_v35, %v3538_v0  ;;  %v3555_v31 = vmul.f32 %v9960_v35, %v3539_v13  ;;  %v10538_v38 = vld [vmem:[#allocation20_spill] sm:$0xff] }
0x17a7   :  { %v3556_v4 = vmul.f32 %v9960_v35, %v3540_v8  ;;  %v3557_v23 = vmul.f32 %v9960_v35, %v3541_v34  ;;  %v3567_v41 = vadd.f32 %v9963_v1, %v3551_v28  ;;  %v3568_v55 = vadd.f32 %v9963_v1, %v3552_v37  ;;  %v10539_v33 = vld [vmem:[#allocation28_spill] sm:$0xff]  ;;  %v10542_v28 = vld [vmem:[#allocation42_spill] sm:$0xff] }
0x17a8   :  { %v3558_v6 = vmul.f32 %v9960_v35, %v3542_v49  ;;  %v3569_v62 = vadd.f32 %v9963_v1, %v3553_v44  ;;  %v3570_v42 = vadd.f32 %v9963_v1, %v3554_v14  ;;  %v3571_v7 = vadd.f32 %v9963_v1, %v3555_v31  ;;  %v10541_v27 = vld [vmem:[#allocation32_spill] sm:$0xff]  ;;  %v10543_v44 = vld [vmem:[#allocation33_spill] sm:$0xff] }
0x17a9   :  { %v3572_v21 = vadd.f32 %v9963_v1, %v3556_v4  ;;  %v3573_v47 = vadd.f32 %v9963_v1, %v3557_v23  ;;  %3583 = vst.msk [vmem:[#allocation8 + $0x21] sm:$0x1] %vm1833_vm10, %v3567_v41  ;;  %3584 = vst.msk [vmem:[#allocation8 + $0x25] sm:$0x1] %vm1833_vm10, %v3568_v55  ;;  %v3497_v46 = vrot.slane %v9987_v10, 1  ;;  %v3498_v9 = vrot.slane %v9987_v10, 2 }
0x17aa   :  { %v3574_v15 = vadd.f32 %v9963_v1, %v3558_v6  ;;  %3585 = vst.msk [vmem:[#allocation8 + $0x29] sm:$0x1] %vm1833_vm10, %v3569_v62  ;;  %v3499_v19 = vrot.slane %v9987_v10, 3  ;;  %3586 = vst.msk [vmem:[#allocation8 + $0x2d] sm:$0x1] %vm1833_vm10, %v3570_v42  ;;  %v3500_v16 = vrot.slane %v9987_v10, 4  ;;  %v3527_v0 = vmul.f32 %v9987_v10, %v10537_v29 }
0x17ab   :  { %3587 = vst.msk [vmem:[#allocation8 + $0x31] sm:$0x1] %vm1833_vm10, %v3571_v7  ;;  %3588 = vst.msk [vmem:[#allocation8 + $0x35] sm:$0x1] %vm1833_vm10, %v3572_v21  ;;  %v3501_v45 = vrot.slane %v9987_v10, 5  ;;  %v3502_v22 = vrot.slane %v9987_v10, 6  ;;  %v3528_v13 = vmul.f32 %v3497_v46, %v10538_v38  ;;  %v3529_v8 = vmul.f32 %v3498_v9, %v10539_v33 }
0x17ac   :  { %3589 = vst.msk [vmem:[#allocation8 + $0x39] sm:$0x1] %vm1833_vm10, %v3573_v47  ;;  %v3503_v36 = vrot.slane %v9987_v10, 7  ;;  %3590 = vst.msk [vmem:[#allocation8 + $0x3d] sm:$0x1] %vm1833_vm10, %v3574_v15  ;;  %v3530_v34 = vmul.f32 %v3499_v19, %v10540_v3  ;;  %v3531_v49 = vmul.f32 %v3500_v16, %v10541_v27  ;;  %v10544_v31 = vld [vmem:[#allocation44_spill] sm:$0xff]  ;;  %v3543_v23 = vmul.f32 %v9960_v35, %v3527_v0 }
0x17ad   :  { %v3532_v37 = vmul.f32 %v3501_v45, %v10542_v28  ;;  %v3533_v14 = vmul.f32 %v3502_v22, %v10543_v44  ;;  %v3544_v6 = vmul.f32 %v9960_v35, %v3528_v13  ;;  %v3545_v10 = vmul.f32 %v9960_v35, %v3529_v8  ;;  %v10545_v8 = vld [vmem:[#allocation34_spill] sm:$0xff] }
0x17ae   :  { %v3534_v4 = vmul.f32 %v3503_v36, %v10544_v31  ;;  %v3546_v41 = vmul.f32 %v9960_v35, %v3530_v34  ;;  %v3547_v55 = vmul.f32 %v9960_v35, %v3531_v49  ;;  %v3559_v21 = vadd.f32 %v9963_v1, %v3543_v23  ;;  %v10546_v34 = vld [vmem:[#allocation41_spill] sm:$0xff]  ;;  %v10547_v49 = vld [vmem:[#allocation43_spill] sm:$0xff] }
0x17af   :  { %v3548_v62 = vmul.f32 %v9960_v35, %v3532_v37  ;;  %v3549_v42 = vmul.f32 %v9960_v35, %v3533_v14  ;;  %v3560_v47 = vadd.f32 %v9963_v1, %v3544_v6  ;;  %v3561_v15 = vadd.f32 %v9963_v1, %v3545_v10  ;;  %v10548_v37 = vld [vmem:[#allocation29_spill] sm:$0xff]  ;;  %v10549_v14 = vld [vmem:[#allocation36_spill] sm:$0xff]  ;;  %v10551_v6 = vld [vmem:[#allocation46_spill] sm:$0xff] }
0x17b0   :  { %v3550_v7 = vmul.f32 %v9960_v35, %v3534_v4  ;;  %v3562_v46 = vadd.f32 %v9963_v1, %v3546_v41  ;;  %v3563_v9 = vadd.f32 %v9963_v1, %v3547_v55  ;;  %3575 = vst.msk [vmem:[#allocation8 + $0x1] sm:$0x1] %vm1833_vm10, %v3559_v21  ;;  %v5245_v22 = vrot.slane %v9997_v11, 1  ;;  %v10550_v4 = vld [vmem:[#allocation39_spill] sm:$0xff] }
0x17b1   :  { %v3564_v19 = vadd.f32 %v9963_v1, %v3548_v62  ;;  %v3565_v16 = vadd.f32 %v9963_v1, %v3549_v42  ;;  %3576 = vst.msk [vmem:[#allocation8 + $0x5] sm:$0x1] %vm1833_vm10, %v3560_v47  ;;  %3577 = vst.msk [vmem:[#allocation8 + $0x9] sm:$0x1] %vm1833_vm10, %v3561_v15  ;;  %v5246_v36 = vrot.slane %v9997_v11, 2  ;;  %v5247_v29 = vrot.slane %v9997_v11, 3 }
0x17b2   :  { %v3566_v45 = vadd.f32 %v9963_v1, %v3550_v7  ;;  %3578 = vst.msk [vmem:[#allocation8 + $0xd] sm:$0x1] %vm1833_vm10, %v3562_v46  ;;  %v5248_v0 = vrot.slane %v9997_v11, 4  ;;  %3579 = vst.msk [vmem:[#allocation8 + $0x11] sm:$0x1] %vm1833_vm10, %v3563_v9  ;;  %v5249_v38 = vrot.slane %v9997_v11, 5  ;;  %v5276_v3 = vmul.f32 %v9997_v11, %v10545_v8 }
0x17b3   :  { %3580 = vst.msk [vmem:[#allocation8 + $0x15] sm:$0x1] %vm1833_vm10, %v3564_v19  ;;  %3581 = vst.msk [vmem:[#allocation8 + $0x19] sm:$0x1] %vm1833_vm10, %v3565_v16  ;;  %v5250_v13 = vrot.slane %v9997_v11, 6  ;;  %v5251_v33 = vrot.slane %v9997_v11, 7  ;;  %v5277_v27 = vmul.f32 %v5245_v22, %v10546_v34  ;;  %v5278_v28 = vmul.f32 %v5246_v36, %v10547_v49 }
0x17b4   :  { %3582 = vst.msk [vmem:[#allocation8 + $0x1d] sm:$0x1] %vm1833_vm10, %v3566_v45  ;;  %v5279_v44 = vmul.f32 %v5247_v29, %v10548_v37  ;;  %v5280_v31 = vmul.f32 %v5248_v0, %v10549_v14  ;;  %v5281_v23 = vmul.f32 %v5249_v38, %v10550_v4  ;;  %v5292_v55 = vmul.f32 %v9960_v35, %v5276_v3  ;;  %v10552_v34 = vld [vmem:[#allocation52_spill] sm:$0xff]  ;;  %v10553_v49 = vld [vmem:[#allocation31_spill] sm:$0xff]  ;;  %v10555_v14 = vld [vmem:[#allocation37_spill] sm:$0xff] }
0x17b5   :  { %v5282_v10 = vmul.f32 %v5250_v13, %v10551_v6  ;;  %v5283_v41 = vmul.f32 %v5251_v33, %v9699_v53  ;;  %v5293_v62 = vmul.f32 %v9960_v35, %v5277_v27  ;;  %v5294_v11 = vmul.f32 %v9960_v35, %v5278_v28  ;;  %v10554_v37 = vld [vmem:[#allocation35_spill] sm:$0xff]  ;;  %v10556_v4 = vld [vmem:[#allocation12_spill] sm:$0xff] }
0x17b6   :  { %v5295_v42 = vmul.f32 %v9960_v35, %v5279_v44  ;;  %v5296_v7 = vmul.f32 %v9960_v35, %v5280_v31  ;;  %v5297_v21 = vmul.f32 %v9960_v35, %v5281_v23  ;;  %v5308_v46 = vadd.f32 %v9963_v1, %v5292_v55 }
0x17b7   :  { %v5298_v47 = vmul.f32 %v9960_v35, %v5282_v10  ;;  %v5299_v15 = vmul.f32 %v9960_v35, %v5283_v41  ;;  %v5309_v53 = vadd.f32 %v9963_v1, %v5293_v62  ;;  %v5310_v9 = vadd.f32 %v9963_v1, %v5294_v11 }
0x17b8   :  { %v5311_v19 = vadd.f32 %v9963_v1, %v5295_v42  ;;  %v5312_v16 = vadd.f32 %v9963_v1, %v5296_v7  ;;  %v5313_v45 = vadd.f32 %v9963_v1, %v5297_v21  ;;  %5324 = vst.msk [vmem:[#allocation8 + $0x22] sm:$0x1] %vm1833_vm10, %v5308_v46  ;;  %v5238_v29 = vrot.slane %v10004_v59, 1 }
0x17b9   :  { %v5314_v22 = vadd.f32 %v9963_v1, %v5298_v47  ;;  %v5315_v36 = vadd.f32 %v9963_v1, %v5299_v15  ;;  %5325 = vst.msk [vmem:[#allocation8 + $0x26] sm:$0x1] %vm1833_vm10, %v5309_v53  ;;  %5326 = vst.msk [vmem:[#allocation8 + $0x2a] sm:$0x1] %vm1833_vm10, %v5310_v9  ;;  %v5239_v0 = vrot.slane %v10004_v59, 2  ;;  %v5240_v38 = vrot.slane %v10004_v59, 3 }
0x17ba   :  { %5327 = vst.msk [vmem:[#allocation8 + $0x2e] sm:$0x1] %vm1833_vm10, %v5311_v19  ;;  %5328 = vst.msk [vmem:[#allocation8 + $0x32] sm:$0x1] %vm1833_vm10, %v5312_v16  ;;  %v5241_v13 = vrot.slane %v10004_v59, 4  ;;  %v5242_v33 = vrot.slane %v10004_v59, 5  ;;  %v5268_v27 = vmul.f32 %v10004_v59, %v10552_v34  ;;  %v5269_v28 = vmul.f32 %v5238_v29, %v10553_v49 }
0x17bb   :  { %5329 = vst.msk [vmem:[#allocation8 + $0x36] sm:$0x1] %vm1833_vm10, %v5313_v45  ;;  %5330 = vst.msk [vmem:[#allocation8 + $0x3a] sm:$0x1] %vm1833_vm10, %v5314_v22  ;;  %v5243_v8 = vrot.slane %v10004_v59, 6  ;;  %v5244_v3 = vrot.slane %v10004_v59, 7  ;;  %v5270_v44 = vmul.f32 %v5239_v0, %v10554_v37  ;;  %v5271_v31 = vmul.f32 %v5240_v38, %v10555_v14 }
0x17bc   :  { %5331 = vst.msk [vmem:[#allocation8 + $0x3e] sm:$0x1] %vm1833_vm10, %v5315_v36  ;;  %v5272_v23 = vmul.f32 %v5241_v13, %v10556_v4  ;;  %v5273_v6 = vmul.f32 %v5242_v33, %v9716_v32  ;;  %v5284_v55 = vmul.f32 %v9960_v35, %v5268_v27  ;;  %v5285_v62 = vmul.f32 %v9960_v35, %v5269_v28 }
0x17bd   :  { %v5274_v10 = vmul.f32 %v5243_v8, %v9719_v25  ;;  %v5275_v41 = vmul.f32 %v5244_v3, %v9822_v26  ;;  %v5286_v59 = vmul.f32 %v9960_v35, %v5270_v44  ;;  %v5287_v11 = vmul.f32 %v9960_v35, %v5271_v31 }
0x17be   :  { %v5288_v42 = vmul.f32 %v9960_v35, %v5272_v23  ;;  %v5289_v7 = vmul.f32 %v9960_v35, %v5273_v6  ;;  %v5300_v25 = vadd.f32 %v9963_v1, %v5284_v55  ;;  %v5301_v26 = vadd.f32 %v9963_v1, %v5285_v62 }
0x17bf   :  { %v5290_v21 = vmul.f32 %v9960_v35, %v5274_v10  ;;  %v5291_v32 = vmul.f32 %v9960_v35, %v5275_v41  ;;  %v5302_v47 = vadd.f32 %v9963_v1, %v5286_v59  ;;  %v5303_v15 = vadd.f32 %v9963_v1, %v5287_v11 }
0x17c0   :  { %v5304_v46 = vadd.f32 %v9963_v1, %v5288_v42  ;;  %v5305_v53 = vadd.f32 %v9963_v1, %v5289_v7  ;;  %5316 = vst.msk [vmem:[#allocation8 + $0x2] sm:$0x1] %vm1833_vm10, %v5300_v25  ;;  %5317 = vst.msk [vmem:[#allocation8 + $0x6] sm:$0x1] %vm1833_vm10, %v5301_v26  ;;  %v6935_v16 = vrot.slane %v9942_v57, 7  ;;  %v6937_v45 = vrot.slane %v9946_v43, 6 }
0x17c1   :  { %v5306_v9 = vadd.f32 %v9963_v1, %v5290_v21  ;;  %v5307_v19 = vadd.f32 %v9963_v1, %v5291_v32  ;;  %5318 = vst.msk [vmem:[#allocation8 + $0xa] sm:$0x1] %vm1833_vm10, %v5302_v47  ;;  %5319 = vst.msk [vmem:[#allocation8 + $0xe] sm:$0x1] %vm1833_vm10, %v5303_v15  ;;  %v6909_v22 = vmul.f32 %v9931_v17, %v9931_v17  ;;  %v6939_v36 = vrot.slane %v9950_v56, 5 }
0x17c2   :  { %5320 = vst.msk [vmem:[#allocation8 + $0x12] sm:$0x1] %vm1833_vm10, %v5304_v46  ;;  %5321 = vst.msk [vmem:[#allocation8 + $0x16] sm:$0x1] %vm1833_vm10, %v5305_v53  ;;  %v6910_v57 = vmul.f32 %v9934_v20, %v9934_v20  ;;  %v6936_v43 = vsel %vm102_vm0, %v6935_v16, %v9938_v24  ;;  %v6941_v0 = vrot.slane %v9954_v63, 4  ;;  %v6943_v13 = vrot.slane %v9958_v58, 3 }
0x17c3   :  { %5322 = vst.msk [vmem:[#allocation8 + $0x1a] sm:$0x1] %vm1833_vm10, %v5306_v9  ;;  %5323 = vst.msk [vmem:[#allocation8 + $0x1e] sm:$0x1] %vm1833_vm10, %v5307_v19  ;;  %v6938_v29 = vsel %vm105_vm1, %v6937_v45, %v6936_v43  ;;  %v6945_v8 = vrot.slane %v6909_v22, 2 }
0x17c4   :  { %v6940_v38 = vsel %vm108_vm2, %v6939_v36, %v6938_v29  ;;  %v6947_v34 = vrot.slane %v6910_v57, 1 }
0x17c5   :  { %v6942_v33 = vsel %vm111_vm3, %v6941_v0, %v6940_v38 }
0x17c6   :  { %v6944_v3 = vsel %vm114_vm4, %v6943_v13, %v6942_v33 }
0x17c7   :  { %v6946_v27 = vsel %vm117_vm5, %v6945_v8, %v6944_v3 }
0x17c8   :  { %v6948_v24 = vsel %vm120_vm6, %v6947_v34, %v6946_v27 }
0x17c9   :  { %v6965_v56 = vsel %vm136_vm7, %v6948_v24, 0.0 }
0x17ca   :  { %6966 = vadd.xlane.f32.xlu0 %v6965_v56 }
0x1817   :  { %v6970_v49 = vpop.xlane.xlu1 %6969 }
0x1818   :  { %v6972_v28 = vmul.f32 0.03125, %v6970_v49 }
0x181a   :  { %v6974_v63 = vadd.f32 1e-05, %v6972_v28 }
0x181c   :  { %7938 = vrsqrt.f32 %v6974_v63 }
0x1829   :  { %v7939_v37 = vpop.eup %7938 }
0x182a   :  { %v6986_v44 = vrot.slane %v7939_v37, 1  ;;  %v6987_v58 = vrot.slane %v7939_v37, 2  ;;  %v6988_v14 = vrot.slane %v7939_v37, 3  ;;  %v6989_v31 = vrot.slane %v7939_v37, 4 }
0x182b   :  { %v6990_v4 = vrot.slane %v7939_v37, 5  ;;  %v6991_v23 = vrot.slane %v7939_v37, 6  ;;  %v6992_v6 = vrot.slane %v7939_v37, 7  ;;  %v7017_v10 = vmul.f32 %v7939_v37, %v9857_v61 }
0x182c   :  { %v7018_v41 = vmul.f32 %v6986_v44, %v9860_v50  ;;  %v7019_v55 = vmul.f32 %v6987_v58, %v9863_v40  ;;  %v7020_v62 = vmul.f32 %v6988_v14, %v9866_v52  ;;  %v7021_v59 = vmul.f32 %v6989_v31, %v9869_v5 }
0x182d   :  { %v7022_v11 = vmul.f32 %v6990_v4, %v9872_v18  ;;  %v7023_v42 = vmul.f32 %v6991_v23, %v9875_v54  ;;  %v7024_v7 = vmul.f32 %v6992_v6, %v9878_v12  ;;  %v7033_v21 = vmul.f32 %v9960_v35, %v7017_v10 }
0x182e   :  { %v7034_v32 = vmul.f32 %v9960_v35, %v7018_v41  ;;  %v7035_v61 = vmul.f32 %v9960_v35, %v7019_v55  ;;  %v7036_v50 = vmul.f32 %v9960_v35, %v7020_v62  ;;  %v7037_v40 = vmul.f32 %v9960_v35, %v7021_v59 }
0x182f   :  { %v7038_v52 = vmul.f32 %v9960_v35, %v7022_v11  ;;  %v7039_v5 = vmul.f32 %v9960_v35, %v7023_v42  ;;  %v7040_v18 = vmul.f32 %v9960_v35, %v7024_v7  ;;  %v7049_v54 = vadd.f32 %v9963_v1, %v7033_v21 }
0x1830   :  { %v7050_v12 = vadd.f32 %v9963_v1, %v7034_v32  ;;  %v7051_v25 = vadd.f32 %v9963_v1, %v7035_v61  ;;  %v7052_v26 = vadd.f32 %v9963_v1, %v7036_v50  ;;  %v7053_v47 = vadd.f32 %v9963_v1, %v7037_v40 }
0x1831   :  { %v7054_v15 = vadd.f32 %v9963_v1, %v7038_v52  ;;  %v7055_v46 = vadd.f32 %v9963_v1, %v7039_v5  ;;  %v7056_v53 = vadd.f32 %v9963_v1, %v7040_v18  ;;  %7065 = vst.msk [vmem:[#allocation8 + $0x23] sm:$0x1] %vm1833_vm10, %v7049_v54 }
0x1832   :  { %7066 = vst.msk [vmem:[#allocation8 + $0x27] sm:$0x1] %vm1833_vm10, %v7050_v12  ;;  %7067 = vst.msk [vmem:[#allocation8 + $0x2b] sm:$0x1] %vm1833_vm10, %v7051_v25 }
0x1833   :  { %7068 = vst.msk [vmem:[#allocation8 + $0x2f] sm:$0x1] %vm1833_vm10, %v7052_v26  ;;  %7069 = vst.msk [vmem:[#allocation8 + $0x33] sm:$0x1] %vm1833_vm10, %v7053_v47 }
0x1834   :  { %7070 = vst.msk [vmem:[#allocation8 + $0x37] sm:$0x1] %vm1833_vm10, %v7054_v15  ;;  %7071 = vst.msk [vmem:[#allocation8 + $0x3b] sm:$0x1] %vm1833_vm10, %v7055_v46 }
0x1835   :  { %7072 = vst.msk [vmem:[#allocation8 + $0x3f] sm:$0x1] %vm1833_vm10, %v7056_v53 }
0x1853   :  { %v6967_v9 = vpop.xlane.xlu0 %6966 }
0x1854   :  { %v6971_v19 = vmul.f32 0.03125, %v6967_v9 }
0x1856   :  { %v6973_v16 = vadd.f32 1e-05, %v6971_v19 }
0x1858   :  { %7940 = vrsqrt.f32 %v6973_v16 }
0x1865   :  { %v7941_v45 = vpop.eup %7940 }
0x1866   :  { %v6979_v22 = vrot.slane %v7941_v45, 1  ;;  %v6980_v57 = vrot.slane %v7941_v45, 2  ;;  %v6981_v43 = vrot.slane %v7941_v45, 3  ;;  %v6982_v36 = vrot.slane %v7941_v45, 4 }
0x1867   :  { %v6983_v29 = vrot.slane %v7941_v45, 5  ;;  %v6984_v0 = vrot.slane %v7941_v45, 6  ;;  %v6985_v38 = vrot.slane %v7941_v45, 7  ;;  %v7009_v13 = vmul.f32 %v7941_v45, %v9912_v30 }
0x1868   :  { %v7010_v33 = vmul.f32 %v6979_v22, %v9915_v51  ;;  %v7011_v8 = vmul.f32 %v6980_v57, %v9919_v48  ;;  %v7012_v3 = vmul.f32 %v6981_v43, %v9922_v2  ;;  %v7013_v34 = vmul.f32 %v6982_v36, %v9925_v39 }
0x1869   :  { %v7014_v27 = vmul.f32 %v6983_v29, %v9928_v60  ;;  %v7015_v24 = vmul.f32 %v6984_v0, %v9931_v17  ;;  %v7016_v56 = vmul.f32 %v6985_v38, %v9934_v20  ;;  %v7025_v49 = vmul.f32 %v9960_v35, %v7009_v13 }
0x186a   :  { %v7026_v28 = vmul.f32 %v9960_v35, %v7010_v33  ;;  %v7027_v30 = vmul.f32 %v9960_v35, %v7011_v8  ;;  %v7028_v51 = vmul.f32 %v9960_v35, %v7012_v3  ;;  %v7029_v48 = vmul.f32 %v9960_v35, %v7013_v34 }
0x186b   :  { %v7030_v2 = vmul.f32 %v9960_v35, %v7014_v27  ;;  %v7031_v39 = vmul.f32 %v9960_v35, %v7015_v24  ;;  %v7032_v60 = vmul.f32 %v9960_v35, %v7016_v56  ;;  %v7041_v17 = vadd.f32 %v9963_v1, %v7025_v49 }
0x186c   :  { %v7042_v20 = vadd.f32 %v9963_v1, %v7026_v28  ;;  %v7043_v63 = vadd.f32 %v9963_v1, %v7027_v30  ;;  %v7044_v37 = vadd.f32 %v9963_v1, %v7028_v51  ;;  %v7045_v44 = vadd.f32 %v9963_v1, %v7029_v48 }
0x186d   :  { %v7046_v58 = vadd.f32 %v9963_v1, %v7030_v2  ;;  %v7047_v14 = vadd.f32 %v9963_v1, %v7031_v39  ;;  %v7048_v31 = vadd.f32 %v9963_v1, %v7032_v60  ;;  %7057 = vst.msk [vmem:[#allocation8 + $0x3] sm:$0x1] %vm1833_vm10, %v7041_v17 }
0x186e   :  { %7058 = vst.msk [vmem:[#allocation8 + $0x7] sm:$0x1] %vm1833_vm10, %v7042_v20  ;;  %7059 = vst.msk [vmem:[#allocation8 + $0xb] sm:$0x1] %vm1833_vm10, %v7043_v63 }
0x186f   :  { %7060 = vst.msk [vmem:[#allocation8 + $0xf] sm:$0x1] %vm1833_vm10, %v7044_v37  ;;  %7061 = vst.msk [vmem:[#allocation8 + $0x13] sm:$0x1] %vm1833_vm10, %v7045_v44 }
0x1870   :  { %7062 = vst.msk [vmem:[#allocation8 + $0x17] sm:$0x1] %vm1833_vm10, %v7046_v58  ;;  %7063 = vst.msk [vmem:[#allocation8 + $0x1b] sm:$0x1] %vm1833_vm10, %v7047_v14 }
0x1871   :  { %7064 = vst.msk [vmem:[#allocation8 + $0x1f] sm:$0x1] %vm1833_vm10, %v7048_v31 }
0x1872   :  { %8050 = shalt.err (!%p8047_p5)
}
0x1873   :  { %7084 = dma.vmem_to_hbm [thread:$0]  %s7079_s13, 1024, %s10287_s3, [#allocation4], %s8069_s22, %s8069_s22, %s8070_s23  }
0x1874   :  { %8063 = dma.done.wait [#allocation4], 1024  }
0x1875   :  { %8064 = vsyncadd [#allocation4], 4294966272 }
0x1876   :  { %7088 = vsyncpa [#allocation3], 1 }
0x1877   :  { %7089 = vsyncpa [#allocation6], 1 }
0x1878   :  { %7090 = vsyncpa [#allocation4], 1 }

</bundles_post_ra>
